<compile_context>
chip_gen: v6e
topology: v6e:2x2x1
jax: 0.10.0
libtpu: 0.0.40
codegen_flags: <defaults>
</compile_context>

<pallas_src>
import functools

import jax
import jax.numpy as jnp
from jax.experimental import pallas as pl
from jax.experimental.pallas import tpu as pltpu

LN_EPS = 1e-5


def _linear_ln_relu(h_bf16, w_ref, b_ref, g_ref, beta_ref, *, apply_dtype):
    """Linear (bf16 MXU, f32 accumulate) + LayerNorm + ReLU on a (TB, K) tile.

    Reductions and rsqrt stay in f32; the normalize/affine/ReLU tail runs in
    `apply_dtype` (bf16 on v6e/v7x, f32 on v5e).  Returns a bf16 tile ready
    to feed the next MXU matmul.
    """
    y = jnp.dot(h_bf16, w_ref[...],
                preferred_element_type=jnp.float32) + b_ref[...]
    # Centered two-pass statistics (robust against |mu| >> std cancellation).
    mu = jnp.mean(y, axis=-1, keepdims=True)
    d = y - mu
    var = jnp.mean(d * d, axis=-1, keepdims=True)
    inv = jax.lax.rsqrt(var + LN_EPS)   # finite even for constant rows (var=0)
    if apply_dtype == jnp.bfloat16:
        yn = d.astype(jnp.bfloat16) * inv.astype(jnp.bfloat16)
        yn = yn * g_ref[...].astype(jnp.bfloat16) \
             + beta_ref[...].astype(jnp.bfloat16)
        return jnp.maximum(yn, 0.0)                       # bf16 -> next dot
    yn = d * inv * g_ref[...] + beta_ref[...]
    return jnp.maximum(yn, 0.0).astype(jnp.bfloat16)      # cast for next dot


def dnn_kernel(x_ref,
               w1_ref, b1_ref, g1_ref, be1_ref,
               w2_ref, b2_ref, g2_ref, be2_ref,
               w3_ref, b3_ref, g3_ref, be3_ref,
               w4_ref, b4_ref,
               o_ref, *, apply_dtype):
    h = x_ref[...].astype(jnp.bfloat16)                   # (TB, D_in)
    h = _linear_ln_relu(h, w1_ref, b1_ref, g1_ref, be1_ref, apply_dtype=apply_dtype)
    h = _linear_ln_relu(h, w2_ref, b2_ref, g2_ref, be2_ref, apply_dtype=apply_dtype)
    h = _linear_ln_relu(h, w3_ref, b3_ref, g3_ref, be3_ref, apply_dtype=apply_dtype)
    # Final Linear (output_dim == 1): VPU multiply + lane reduction instead of
    # an N=1 MXU matmul that would waste the whole systolic array.
    res = jnp.sum(h.astype(jnp.float32) * w4_ref[...],
                  axis=-1, keepdims=True) + b4_ref[0]     # (TB, 1) f32
    o_ref[...] = res.astype(o_ref.dtype)                  # direct (TB,1) store


# ----------------------------------------------------------------------------
# Wrapper / tiling policy
# ----------------------------------------------------------------------------

def _device_kind():
    try:
        return jax.devices()[0].device_kind.lower()
    except Exception:
        return ""


def _num_tensorcores_per_device(kind):
    # v7x exposes 2 TensorCores per chip; v5e / v6e have 1.
    return 2 if "v7" in kind else 1


def _vpu_apply_dtype(kind):
    # v6e / v7x VALUs are bf16-capable; on v5e bf16 elementwise would be
    # emulated and slower, so keep the LN apply tail in f32 there.
    return jnp.bfloat16 if ("v6" in kind or "v7" in kind) else jnp.float32


def _round_up(n, m):
    return -(-n // m) * m


def _pick_batch_tile(B, requested, n_cores):
    bt = max(16, min(_round_up(requested, 16), _round_up(B, 16)))
    # On multi-TC chips prefer >= n_cores grid steps so the "parallel" batch
    # axis shards across TensorCores; pointless on single-TC v5e/v6e.
    while n_cores > 1 and pl.cdiv(B, bt) < n_cores and bt > 16:
        bt = max(16, _round_up(-(-bt // 2), 16))
    return bt


def dnn_forward(x, params, *, batch_tile=512):
    """x: (B, input_dim), f32 or bf16.  Returns (B, 1) float32."""
    B, D_in = x.shape
    assert params["w4"].shape[0] == 1, "VPU final layer assumes output_dim == 1"

    kind = _device_kind()
    n_cores = _num_tensorcores_per_device(kind)
    apply_dtype = _vpu_apply_dtype(kind)
    bt = _pick_batch_tile(B, batch_tile, n_cores)
    grid = (pl.cdiv(B, bt),)
    # No wrapper astype/pad: partial last tile handled by Pallas (garbage rows
    # are row-independent; LN on them stays finite via eps; their OOB output
    # writes are dropped).

    def const_spec(arr):
        # Whole-array block, resident across the batch grid axis.
        return pl.BlockSpec(arr.shape, lambda i: (0,) * arr.ndim)

    in_specs = [
        pl.BlockSpec((bt, D_in), lambda i: (i, 0)),                  # x tile
        const_spec(params["w1"]), const_spec(params["b1"]),
        const_spec(params["g1"]), const_spec(params["be1"]),
        const_spec(params["w2"]), const_spec(params["b2"]),
        const_spec(params["g2"]), const_spec(params["be2"]),
        const_spec(params["w3"]), const_spec(params["b3"]),
        const_spec(params["g3"]), const_spec(params["be3"]),
        const_spec(params["w4"]),
        pl.BlockSpec(memory_space=pltpu.MemorySpace.SMEM),           # b4 scalar
    ]
    out_specs = pl.BlockSpec((bt, 1), lambda i: (i, 0))

    return pl.pallas_call(
        functools.partial(dnn_kernel, apply_dtype=apply_dtype),
        out_shape=jax.ShapeDtypeStruct((B, 1), jnp.float32),
        grid_spec=pltpu.PrefetchScalarGridSpec(
            num_scalar_prefetch=0,
            grid=grid,
            in_specs=in_specs,
            out_specs=out_specs,
        ),
        compiler_params=pltpu.CompilerParams(
            dimension_semantics=("parallel",),
        ),
    )(x,
      params["w1"], params["b1"], params["g1"], params["be1"],
      params["w2"], params["b2"], params["g2"], params["be2"],
      params["w3"], params["b3"], params["g3"], params["be3"],
      params["w4"], params["b4"])


# ----------------------------------------------------------------------------
# Parameter init (mirrors the module's __init__) and a matching reference
# ----------------------------------------------------------------------------

def init_params(key, input_dim, h1, h2, h3, out_dim=1):
    """Synthetic init mirroring the module:
      Linear weights: kaiming_normal_(fan_in, relu) => N(0, sqrt(2/fan_in))
      Linear biases : PyTorch default U(-1/sqrt(fan_in), +1/sqrt(fan_in))
      LayerNorm     : gamma = 1, beta = 0
    Hidden-layer weights are stored transposed (in, out) in bfloat16 for the
    MXU; the final layer is a (1, h3) f32 row (VPU path) plus a scalar bias.
    """
    assert out_dim == 1
    dims = [(input_dim, h1), (h1, h2), (h2, h3), (h3, out_dim)]
    keys = jax.random.split(key, 2 * len(dims))
    params = {}
    for idx, (fan_in, fan_out) in enumerate(dims, start=1):
        wk, bk = keys[2 * (idx - 1)], keys[2 * (idx - 1) + 1]
        std = (2.0 / fan_in) ** 0.5
        w = std * jax.random.normal(wk, (fan_in, fan_out), dtype=jnp.float32)
        bound = 1.0 / (fan_in ** 0.5)
        b = jax.random.uniform(bk, (fan_out,), minval=-bound,
                               maxval=bound).astype(jnp.float32)
        if idx <= 3:  # hidden Linear + LayerNorm
            params[f"w{idx}"] = w.astype(jnp.bfloat16)           # (in, out)
            params[f"b{idx}"] = b.reshape(1, fan_out)
            params[f"g{idx}"] = jnp.ones((1, fan_out), jnp.float32)
            params[f"be{idx}"] = jnp.zeros((1, fan_out), jnp.float32)
        else:         # final Linear, output_dim == 1
            params[f"w{idx}"] = w.T.astype(jnp.float32)          # (1, h3)
            params[f"b{idx}"] = b                                # (1,) -> SMEM
    return params


def dnn_reference(x, params, apply_dtype=jnp.float32):
    """Plain-JAX reference mirroring the kernel numerics (bf16 MXU inputs,
    f32 LN statistics, apply tail in `apply_dtype`)."""
    h = x.astype(jnp.bfloat16)
    for idx in range(1, 4):
        y = jnp.dot(h, params[f"w{idx}"],
                    preferred_element_type=jnp.float32) + params[f"b{idx}"]
        mu = jnp.mean(y, axis=-1, keepdims=True)
        d = y - mu
        var = jnp.mean(d * d, axis=-1, keepdims=True)
        inv = jax.lax.rsqrt(var + LN_EPS)
        if apply_dtype == jnp.bfloat16:
            yn = d.astype(jnp.bfloat16) * inv.astype(jnp.bfloat16)
            yn = yn * params[f"g{idx}"].astype(jnp.bfloat16) \
                 + params[f"be{idx}"].astype(jnp.bfloat16)
            h = jnp.maximum(yn, 0.0)
        else:
            yn = d * inv * params[f"g{idx}"] + params[f"be{idx}"]
            h = jnp.maximum(yn, 0.0).astype(jnp.bfloat16)
    return jnp.sum(h.astype(jnp.float32) * params["w4"],
                   axis=-1, keepdims=True) + params["b4"]


if __name__ == "__main__":
    # Small shapes consistent with the module's structure
    # (input -> h1 -> h2 -> h3 -> 1, each hidden followed by LN + ReLU).
    INPUT_DIM, H1, H2, H3, OUT_DIM = 256, 128, 64, 32, 1
    BATCH = 400  # deliberately not a tile multiple -> exercises boundary block

    key = jax.random.PRNGKey(0)
    pkey, xkey = jax.random.split(key)
    params = init_params(pkey, INPUT_DIM, H1, H2, H3, OUT_DIM)
    x = jax.random.normal(xkey, (BATCH, INPUT_DIM), dtype=jnp.float32)

    out = dnn_forward(x, params, batch_tile=512)
    out = jax.block_until_ready(out)

    apply_dtype = _vpu_apply_dtype(_device_kind())
    ref = dnn_reference(x, params, apply_dtype=apply_dtype)
    assert out.shape == (BATCH, OUT_DIM), out.shape
    max_err = float(jnp.max(jnp.abs(out - ref)))
    assert jnp.allclose(out, ref, atol=1e-2, rtol=1e-2), max_err

    print("KERNEL_OK")
</pallas_src>

<mosaic_0001>
module attributes {stable_mosaic.version = 11 : i64} {
  func.func @dnn_kernel(%arg0: i32, %arg1: memref<400x256xf32, #tpu.memory_space<vmem>>, %arg2: memref<256x128xbf16, #tpu.memory_space<vmem>>, %arg3: memref<1x128xf32, #tpu.memory_space<vmem>>, %arg4: memref<1x128xf32, #tpu.memory_space<vmem>>, %arg5: memref<1x128xf32, #tpu.memory_space<vmem>>, %arg6: memref<128x64xbf16, #tpu.memory_space<vmem>>, %arg7: memref<1x64xf32, #tpu.memory_space<vmem>>, %arg8: memref<1x64xf32, #tpu.memory_space<vmem>>, %arg9: memref<1x64xf32, #tpu.memory_space<vmem>>, %arg10: memref<64x32xbf16, #tpu.memory_space<vmem>>, %arg11: memref<1x32xf32, #tpu.memory_space<vmem>>, %arg12: memref<1x32xf32, #tpu.memory_space<vmem>>, %arg13: memref<1x32xf32, #tpu.memory_space<vmem>>, %arg14: memref<1x32xf32, #tpu.memory_space<vmem>>, %arg15: memref<1xf32, #tpu.memory_space<smem>>, %arg16: memref<400x1xf32, #tpu.memory_space<vmem>>) attributes {dimension_semantics = [#tpu.dimension_semantics<parallel>], iteration_bounds = array<i64: 1>, scalar_prefetch = 0 : i64, scratch_operands = 0 : i64, tpu.core_type = #tpu.core_type<tc>, window_params = [{transform_indices = @transform_0, window_bounds = array<i64: 400, 256>}, {pipeline_mode = #tpu.pipeline_mode<synchronous>, transform_indices = @transform_1, window_bounds = array<i64: 256, 128>}, {pipeline_mode = #tpu.pipeline_mode<synchronous>, transform_indices = @transform_2, window_bounds = array<i64: 1, 128>}, {pipeline_mode = #tpu.pipeline_mode<synchronous>, transform_indices = @transform_3, window_bounds = array<i64: 1, 128>}, {pipeline_mode = #tpu.pipeline_mode<synchronous>, transform_indices = @transform_4, window_bounds = array<i64: 1, 128>}, {pipeline_mode = #tpu.pipeline_mode<synchronous>, transform_indices = @transform_5, window_bounds = array<i64: 128, 64>}, {pipeline_mode = #tpu.pipeline_mode<synchronous>, transform_indices = @transform_6, window_bounds = array<i64: 1, 64>}, {pipeline_mode = #tpu.pipeline_mode<synchronous>, transform_indices = @transform_7, window_bounds = array<i64: 1, 64>}, {pipeline_mode = #tpu.pipeline_mode<synchronous>, transform_indices = @transform_8, window_bounds = array<i64: 1, 64>}, {pipeline_mode = #tpu.pipeline_mode<synchronous>, transform_indices = @transform_9, window_bounds = array<i64: 64, 32>}, {pipeline_mode = #tpu.pipeline_mode<synchronous>, transform_indices = @transform_10, window_bounds = array<i64: 1, 32>}, {pipeline_mode = #tpu.pipeline_mode<synchronous>, transform_indices = @transform_11, window_bounds = array<i64: 1, 32>}, {pipeline_mode = #tpu.pipeline_mode<synchronous>, transform_indices = @transform_12, window_bounds = array<i64: 1, 32>}, {pipeline_mode = #tpu.pipeline_mode<synchronous>, transform_indices = @transform_13, window_bounds = array<i64: 1, 32>}, {transform_indices = @transform_14, window_bounds = array<i64: 1>}, {transform_indices = @transform_15, window_bounds = array<i64: 400, 1>}]} {
    %c0 = arith.constant 0 : index
    %c0_0 = arith.constant 0 : index
    %0 = vector.load %arg1[%c0, %c0_0] : memref<400x256xf32, #tpu.memory_space<vmem>>, vector<400x256xf32>
    %1 = arith.truncf %0 : vector<400x256xf32> to vector<400x256xbf16>
    %c0_1 = arith.constant 0 : index
    %c0_2 = arith.constant 0 : index
    %2 = vector.load %arg2[%c0_1, %c0_2] : memref<256x128xbf16, #tpu.memory_space<vmem>>, vector<256x128xbf16>
    %cst = arith.constant dense<0.000000e+00> : vector<400x128xf32>
    %3 = tpu.matmul %1, %2, %cst {dimension_numbers = #tpu.dot_dimension_numbers<[1], [0], [0], [1], [0, 0, 1, 1], [], []>} : vector<400x256xbf16>, vector<256x128xbf16>, vector<400x128xf32> -> vector<400x128xf32>
    %c0_3 = arith.constant 0 : index
    %c0_4 = arith.constant 0 : index
    %4 = vector.load %arg3[%c0_3, %c0_4] : memref<1x128xf32, #tpu.memory_space<vmem>>, vector<1x128xf32>
    %5 = vector.broadcast %4 : vector<1x128xf32> to vector<400x128xf32>
    %6 = arith.addf %3, %5 : vector<400x128xf32>
    %cst_5 = arith.constant dense<0.000000e+00> : vector<400xf32>
    %7 = vector.multi_reduction <add>, %6, %cst_5 [1] : vector<400x128xf32> to vector<400xf32>
    %8 = vector.shape_cast %7 : vector<400xf32> to vector<400x1xf32>
    %cst_6 = arith.constant 1.280000e+02 : f32
    %9 = vector.broadcast %cst_6 : f32 to vector<400x1xf32>
    %10 = arith.divf %8, %9 : vector<400x1xf32>
    %11 = vector.broadcast %10 : vector<400x1xf32> to vector<400x128xf32>
    %12 = arith.subf %6, %11 : vector<400x128xf32>
    %13 = arith.mulf %12, %12 : vector<400x128xf32>
    %cst_7 = arith.constant dense<0.000000e+00> : vector<400xf32>
    %14 = vector.multi_reduction <add>, %13, %cst_7 [1] : vector<400x128xf32> to vector<400xf32>
    %15 = vector.shape_cast %14 : vector<400xf32> to vector<400x1xf32>
    %cst_8 = arith.constant 1.280000e+02 : f32
    %16 = vector.broadcast %cst_8 : f32 to vector<400x1xf32>
    %17 = arith.divf %15, %16 : vector<400x1xf32>
    %cst_9 = arith.constant 9.99999974E-6 : f32
    %18 = vector.broadcast %cst_9 : f32 to vector<400x1xf32>
    %19 = arith.addf %17, %18 : vector<400x1xf32>
    %20 = math.rsqrt %19 : vector<400x1xf32>
    %21 = vector.broadcast %20 : vector<400x1xf32> to vector<400x128xf32>
    %22 = arith.mulf %12, %21 : vector<400x128xf32>
    %c0_10 = arith.constant 0 : index
    %c0_11 = arith.constant 0 : index
    %23 = vector.load %arg4[%c0_10, %c0_11] : memref<1x128xf32, #tpu.memory_space<vmem>>, vector<1x128xf32>
    %24 = vector.broadcast %23 : vector<1x128xf32> to vector<400x128xf32>
    %25 = arith.mulf %22, %24 : vector<400x128xf32>
    %c0_12 = arith.constant 0 : index
    %c0_13 = arith.constant 0 : index
    %26 = vector.load %arg5[%c0_12, %c0_13] : memref<1x128xf32, #tpu.memory_space<vmem>>, vector<1x128xf32>
    %27 = vector.broadcast %26 : vector<1x128xf32> to vector<400x128xf32>
    %28 = arith.addf %25, %27 : vector<400x128xf32>
    %cst_14 = arith.constant 0.000000e+00 : f32
    %29 = vector.broadcast %cst_14 : f32 to vector<400x128xf32>
    %30 = arith.maximumf %28, %29 : vector<400x128xf32>
    %31 = arith.truncf %30 : vector<400x128xf32> to vector<400x128xbf16>
    %c0_15 = arith.constant 0 : index
    %c0_16 = arith.constant 0 : index
    %32 = vector.load %arg6[%c0_15, %c0_16] : memref<128x64xbf16, #tpu.memory_space<vmem>>, vector<128x64xbf16>
    %cst_17 = arith.constant dense<0.000000e+00> : vector<400x64xf32>
    %33 = tpu.matmul %31, %32, %cst_17 {dimension_numbers = #tpu.dot_dimension_numbers<[1], [0], [0], [1], [0, 0, 1, 1], [], []>} : vector<400x128xbf16>, vector<128x64xbf16>, vector<400x64xf32> -> vector<400x64xf32>
    %c0_18 = arith.constant 0 : index
    %c0_19 = arith.constant 0 : index
    %34 = vector.load %arg7[%c0_18, %c0_19] : memref<1x64xf32, #tpu.memory_space<vmem>>, vector<1x64xf32>
    %35 = vector.broadcast %34 : vector<1x64xf32> to vector<400x64xf32>
    %36 = arith.addf %33, %35 : vector<400x64xf32>
    %cst_20 = arith.constant dense<0.000000e+00> : vector<400xf32>
    %37 = vector.multi_reduction <add>, %36, %cst_20 [1] : vector<400x64xf32> to vector<400xf32>
    %38 = vector.shape_cast %37 : vector<400xf32> to vector<400x1xf32>
    %cst_21 = arith.constant 6.400000e+01 : f32
    %39 = vector.broadcast %cst_21 : f32 to vector<400x1xf32>
    %40 = arith.divf %38, %39 : vector<400x1xf32>
    %41 = vector.broadcast %40 : vector<400x1xf32> to vector<400x64xf32>
    %42 = arith.subf %36, %41 : vector<400x64xf32>
    %43 = arith.mulf %42, %42 : vector<400x64xf32>
    %cst_22 = arith.constant dense<0.000000e+00> : vector<400xf32>
    %44 = vector.multi_reduction <add>, %43, %cst_22 [1] : vector<400x64xf32> to vector<400xf32>
    %45 = vector.shape_cast %44 : vector<400xf32> to vector<400x1xf32>
    %cst_23 = arith.constant 6.400000e+01 : f32
    %46 = vector.broadcast %cst_23 : f32 to vector<400x1xf32>
    %47 = arith.divf %45, %46 : vector<400x1xf32>
    %cst_24 = arith.constant 9.99999974E-6 : f32
    %48 = vector.broadcast %cst_24 : f32 to vector<400x1xf32>
    %49 = arith.addf %47, %48 : vector<400x1xf32>
    %50 = math.rsqrt %49 : vector<400x1xf32>
    %51 = vector.broadcast %50 : vector<400x1xf32> to vector<400x64xf32>
    %52 = arith.mulf %42, %51 : vector<400x64xf32>
    %c0_25 = arith.constant 0 : index
    %c0_26 = arith.constant 0 : index
    %53 = vector.load %arg8[%c0_25, %c0_26] : memref<1x64xf32, #tpu.memory_space<vmem>>, vector<1x64xf32>
    %54 = vector.broadcast %53 : vector<1x64xf32> to vector<400x64xf32>
    %55 = arith.mulf %52, %54 : vector<400x64xf32>
    %c0_27 = arith.constant 0 : index
    %c0_28 = arith.constant 0 : index
    %56 = vector.load %arg9[%c0_27, %c0_28] : memref<1x64xf32, #tpu.memory_space<vmem>>, vector<1x64xf32>
    %57 = vector.broadcast %56 : vector<1x64xf32> to vector<400x64xf32>
    %58 = arith.addf %55, %57 : vector<400x64xf32>
    %cst_29 = arith.constant 0.000000e+00 : f32
    %59 = vector.broadcast %cst_29 : f32 to vector<400x64xf32>
    %60 = arith.maximumf %58, %59 : vector<400x64xf32>
    %61 = arith.truncf %60 : vector<400x64xf32> to vector<400x64xbf16>
    %c0_30 = arith.constant 0 : index
    %c0_31 = arith.constant 0 : index
    %62 = vector.load %arg10[%c0_30, %c0_31] : memref<64x32xbf16, #tpu.memory_space<vmem>>, vector<64x32xbf16>
    %cst_32 = arith.constant dense<0.000000e+00> : vector<400x32xf32>
    %63 = tpu.matmul %61, %62, %cst_32 {dimension_numbers = #tpu.dot_dimension_numbers<[1], [0], [0], [1], [0, 0, 1, 1], [], []>} : vector<400x64xbf16>, vector<64x32xbf16>, vector<400x32xf32> -> vector<400x32xf32>
    %c0_33 = arith.constant 0 : index
    %c0_34 = arith.constant 0 : index
    %64 = vector.load %arg11[%c0_33, %c0_34] : memref<1x32xf32, #tpu.memory_space<vmem>>, vector<1x32xf32>
    %65 = vector.broadcast %64 : vector<1x32xf32> to vector<400x32xf32>
    %66 = arith.addf %63, %65 : vector<400x32xf32>
    %cst_35 = arith.constant dense<0.000000e+00> : vector<400xf32>
    %67 = vector.multi_reduction <add>, %66, %cst_35 [1] : vector<400x32xf32> to vector<400xf32>
    %68 = vector.shape_cast %67 : vector<400xf32> to vector<400x1xf32>
    %cst_36 = arith.constant 3.200000e+01 : f32
    %69 = vector.broadcast %cst_36 : f32 to vector<400x1xf32>
    %70 = arith.divf %68, %69 : vector<400x1xf32>
    %71 = vector.broadcast %70 : vector<400x1xf32> to vector<400x32xf32>
    %72 = arith.subf %66, %71 : vector<400x32xf32>
    %73 = arith.mulf %72, %72 : vector<400x32xf32>
    %cst_37 = arith.constant dense<0.000000e+00> : vector<400xf32>
    %74 = vector.multi_reduction <add>, %73, %cst_37 [1] : vector<400x32xf32> to vector<400xf32>
    %75 = vector.shape_cast %74 : vector<400xf32> to vector<400x1xf32>
    %cst_38 = arith.constant 3.200000e+01 : f32
    %76 = vector.broadcast %cst_38 : f32 to vector<400x1xf32>
    %77 = arith.divf %75, %76 : vector<400x1xf32>
    %cst_39 = arith.constant 9.99999974E-6 : f32
    %78 = vector.broadcast %cst_39 : f32 to vector<400x1xf32>
    %79 = arith.addf %77, %78 : vector<400x1xf32>
    %80 = math.rsqrt %79 : vector<400x1xf32>
    %81 = vector.broadcast %80 : vector<400x1xf32> to vector<400x32xf32>
    %82 = arith.mulf %72, %81 : vector<400x32xf32>
    %c0_40 = arith.constant 0 : index
    %c0_41 = arith.constant 0 : index
    %83 = vector.load %arg12[%c0_40, %c0_41] : memref<1x32xf32, #tpu.memory_space<vmem>>, vector<1x32xf32>
    %84 = vector.broadcast %83 : vector<1x32xf32> to vector<400x32xf32>
    %85 = arith.mulf %82, %84 : vector<400x32xf32>
    %c0_42 = arith.constant 0 : index
    %c0_43 = arith.constant 0 : index
    %86 = vector.load %arg13[%c0_42, %c0_43] : memref<1x32xf32, #tpu.memory_space<vmem>>, vector<1x32xf32>
    %87 = vector.broadcast %86 : vector<1x32xf32> to vector<400x32xf32>
    %88 = arith.addf %85, %87 : vector<400x32xf32>
    %cst_44 = arith.constant 0.000000e+00 : f32
    %89 = vector.broadcast %cst_44 : f32 to vector<400x32xf32>
    %90 = arith.maximumf %88, %89 : vector<400x32xf32>
    %91 = arith.truncf %90 : vector<400x32xf32> to vector<400x32xbf16>
    %92 = arith.extf %91 : vector<400x32xbf16> to vector<400x32xf32>
    %c0_45 = arith.constant 0 : index
    %c0_46 = arith.constant 0 : index
    %93 = vector.load %arg14[%c0_45, %c0_46] : memref<1x32xf32, #tpu.memory_space<vmem>>, vector<1x32xf32>
    %94 = vector.broadcast %93 : vector<1x32xf32> to vector<400x32xf32>
    %95 = arith.mulf %92, %94 : vector<400x32xf32>
    %cst_47 = arith.constant dense<0.000000e+00> : vector<400xf32>
    %96 = vector.multi_reduction <add>, %95, %cst_47 [1] : vector<400x32xf32> to vector<400xf32>
    %97 = vector.shape_cast %96 : vector<400xf32> to vector<400x1xf32>
    %c0_48 = arith.constant 0 : index
    %98 = memref.load %arg15[%c0_48] : memref<1xf32, #tpu.memory_space<smem>>
    %99 = vector.broadcast %98 : f32 to vector<400x1xf32>
    %100 = arith.addf %97, %99 : vector<400x1xf32>
    %c0_49 = arith.constant 0 : index
    %c0_50 = arith.constant 0 : index
    %101 = vector.load %arg16[%c0_49, %c0_50] : memref<400x1xf32, #tpu.memory_space<vmem>>, vector<400x1xf32>
    tpu.vector_store %arg16[%c0_49, %c0_50], %100 {strides = array<i32>} : memref<400x1xf32, #tpu.memory_space<vmem>>, vector<400x1xf32>,
    return
  }
  func.func @transform_0(%arg0: i32) -> (i32, i32) {
    %c0_i32 = arith.constant 0 : i32
    %c0_i32_0 = arith.constant 0 : i32
    return %arg0, %c0_i32 : i32, i32
  }
  func.func @transform_1(%arg0: i32) -> (i32, i32) {
    %c0_i32 = arith.constant 0 : i32
    %c0_i32_0 = arith.constant 0 : i32
    %c0_i32_1 = arith.constant 0 : i32
    return %c0_i32, %c0_i32_0 : i32, i32
  }
  func.func @transform_2(%arg0: i32) -> (i32, i32) {
    %c0_i32 = arith.constant 0 : i32
    %c0_i32_0 = arith.constant 0 : i32
    %c0_i32_1 = arith.constant 0 : i32
    return %c0_i32, %c0_i32_0 : i32, i32
  }
  func.func @transform_3(%arg0: i32) -> (i32, i32) {
    %c0_i32 = arith.constant 0 : i32
    %c0_i32_0 = arith.constant 0 : i32
    %c0_i32_1 = arith.constant 0 : i32
    return %c0_i32, %c0_i32_0 : i32, i32
  }
  func.func @transform_4(%arg0: i32) -> (i32, i32) {
    %c0_i32 = arith.constant 0 : i32
    %c0_i32_0 = arith.constant 0 : i32
    %c0_i32_1 = arith.constant 0 : i32
    return %c0_i32, %c0_i32_0 : i32, i32
  }
  func.func @transform_5(%arg0: i32) -> (i32, i32) {
    %c0_i32 = arith.constant 0 : i32
    %c0_i32_0 = arith.constant 0 : i32
    %c0_i32_1 = arith.constant 0 : i32
    return %c0_i32, %c0_i32_0 : i32, i32
  }
  func.func @transform_6(%arg0: i32) -> (i32, i32) {
    %c0_i32 = arith.constant 0 : i32
    %c0_i32_0 = arith.constant 0 : i32
    %c0_i32_1 = arith.constant 0 : i32
    return %c0_i32, %c0_i32_0 : i32, i32
  }
  func.func @transform_7(%arg0: i32) -> (i32, i32) {
    %c0_i32 = arith.constant 0 : i32
    %c0_i32_0 = arith.constant 0 : i32
    %c0_i32_1 = arith.constant 0 : i32
    return %c0_i32, %c0_i32_0 : i32, i32
  }
  func.func @transform_8(%arg0: i32) -> (i32, i32) {
    %c0_i32 = arith.constant 0 : i32
    %c0_i32_0 = arith.constant 0 : i32
    %c0_i32_1 = arith.constant 0 : i32
    return %c0_i32, %c0_i32_0 : i32, i32
  }
  func.func @transform_9(%arg0: i32) -> (i32, i32) {
    %c0_i32 = arith.constant 0 : i32
    %c0_i32_0 = arith.constant 0 : i32
    %c0_i32_1 = arith.constant 0 : i32
    return %c0_i32, %c0_i32_0 : i32, i32
  }
  func.func @transform_10(%arg0: i32) -> (i32, i32) {
    %c0_i32 = arith.constant 0 : i32
    %c0_i32_0 = arith.constant 0 : i32
    %c0_i32_1 = arith.constant 0 : i32
    return %c0_i32, %c0_i32_0 : i32, i32
  }
  func.func @transform_11(%arg0: i32) -> (i32, i32) {
    %c0_i32 = arith.constant 0 : i32
    %c0_i32_0 = arith.constant 0 : i32
    %c0_i32_1 = arith.constant 0 : i32
    return %c0_i32, %c0_i32_0 : i32, i32
  }
  func.func @transform_12(%arg0: i32) -> (i32, i32) {
    %c0_i32 = arith.constant 0 : i32
    %c0_i32_0 = arith.constant 0 : i32
    %c0_i32_1 = arith.constant 0 : i32
    return %c0_i32, %c0_i32_0 : i32, i32
  }
  func.func @transform_13(%arg0: i32) -> (i32, i32) {
    %c0_i32 = arith.constant 0 : i32
    %c0_i32_0 = arith.constant 0 : i32
    %c0_i32_1 = arith.constant 0 : i32
    return %c0_i32, %c0_i32_0 : i32, i32
  }
  func.func @transform_14(%arg0: i32) -> i32 {
    %c0_i32 = arith.constant 0 : i32
    %c0_i32_0 = arith.constant 0 : i32
    return %c0_i32 : i32
  }
  func.func @transform_15(%arg0: i32) -> (i32, i32) {
    %c0_i32 = arith.constant 0 : i32
    %c0_i32_0 = arith.constant 0 : i32
    return %arg0, %c0_i32 : i32, i32
  }
}

</mosaic_0001>

<bundles_post_ra>
// kernel: tpu_custom_call.1
= control target key start
LH: loop header
LB: loop body
LE: loop exit
PB: predicated region body
PF: predicated region fallthrough
CT: control target
= control target key end

     0   :  { %21 = vsyncpa [#allocation4], 0  ;;  %s4751_s18 = smov [#allocation3]   ;;  %s7613_s0 = inlined_call_operand.hbm [shape: f32[400,256], index: 0, kind: input, shape index: {}]   ;;  %s7614_s1 = inlined_call_operand.vmem [shape: bf16[256,128], index: 1, kind: input, shape index: {}]   ;;  %s7615_s2 = inlined_call_operand.vmem [shape: f32[1,128], index: 2, kind: input, shape index: {}]   ;;  %s7616_s3 = inlined_call_operand.vmem [shape: f32[1,128], index: 3, kind: input, shape index: {}]   ;;  %s7617_s4 = inlined_call_operand.vmem [shape: f32[1,128], index: 4, kind: input, shape index: {}]   ;;  %s7618_s5 = inlined_call_operand.vmem [shape: bf16[128,64], index: 5, kind: input, shape index: {}]   ;;  %s7619_s6 = inlined_call_operand.vmem [shape: f32[1,64], index: 6, kind: input, shape index: {}]   ;;  %s7620_s7 = inlined_call_operand.vmem [shape: f32[1,64], index: 7, kind: input, shape index: {}]   ;;  %s7621_s8 = inlined_call_operand.vmem [shape: f32[1,64], index: 8, kind: input, shape index: {}]   ;;  %s7622_s9 = inlined_call_operand.vmem [shape: bf16[64,32], index: 9, kind: input, shape index: {}]   ;;  %s7623_s10 = inlined_call_operand.vmem [shape: f32[1,32], index: 10, kind: input, shape index: {}]   ;;  %s7624_s11 = inlined_call_operand.vmem [shape: f32[1,32], index: 11, kind: input, shape index: {}]   ;;  %s7625_s12 = inlined_call_operand.vmem [shape: f32[1,32], index: 12, kind: input, shape index: {}]   ;;  %s7626_s13 = inlined_call_operand.vmem [shape: f32[1,32], index: 13, kind: input, shape index: {}]   ;;  %s7627_s14 = inlined_call_operand.<no memory space> [shape: f32[1], index: 14, kind: input, shape index: {}]   ;;  %s7628_s15 = inlined_call_operand.vmem [shape: f32[400,1], index: 15, kind: output, shape index: {}]  }
   0x1   :  { %s27_s19 = sshll.u32 %s4751_s18, 4  ;;  %s28_s19 = int_to_ptr.vmem [resolvable:$true] %s27_s19 }
   0x2   :  { %s4737_s20 = scalar_lea.vmem %s28_s19, 12800  ;;  %p4742_p1 = scmp.lt.s32.totalorder %s28_s19, %s28_s19 }
   0x3   :  { %p4738_p0 = scmp.ne.s32.totalorder %s28_s19, %s4737_s20  ;;  %p4743_p2 = scmp.lt.s32.totalorder %s4737_s20, %s4737_s20 }
   0x5   :  { %p4744_p3 = por %p4743_p2, %p4742_p1 }
   0x7   :  { %p4745_p4 = pnand %p4744_p3, %p4738_p0 }
   0x9   :  { %4748 = shalt.err (!%p4745_p4)
}
   0xa   :  { %s4752_s21 = smov 256   ;;  %s4753_s22 = smov 16  }
   0xb   :  { %33 = dma.hbm_to_vmem [thread:$0]  %s7613_s0, 12800, %s28_s19, [#allocation4], %s4752_s21, %s4752_s21, %s4753_s22  }
   0xc   :  { %4749 = dma.done.wait [#allocation4], 12800  }
   0xd   :  { %4750 = vsyncadd [#allocation4], 4294954496  ;;  %v4754_v0 = vmov 0   ;;  %v4393_v1 = vld [vmem:[%s7614_s1 + $0x38] sm:$0xff]   ;;  %v4394_v2 = vld [vmem:[%s7614_s1 + $0x30] sm:$0xff]   ;;  %vm4756_vm0 = vmmov 0  }
   0xe   :  { %351 = vmatprep.subr.bf16.mxu0 %v4754_v0  ;;  %v4395_v3 = vld [vmem:[%s7614_s1 + $0x28] sm:$0xff]   ;;  %v4396_v4 = vld [vmem:[%s7614_s1 + $0x20] sm:$0xff]   ;;  %v4397_v5 = vld [vmem:[%s7614_s1 + $0x18] sm:$0xff]   ;;  %vm1628_vm1 = vcmask 523264   ;;  %vm2816_vm2 = vcmask 261120   ;;  %vm3966_vm3 = vcmask 7168  }
   0xf   :  { %352 = vmatpush1.bf16.msra.mxu0 %v4393_v1  ;;  %v67_v6 = vld [vmem:[#allocation3 + $0x8] sm:$0xff]  ;;  %v69_v7 = vld [vmem:[#allocation3 + $0x18] sm:$0xff]  ;;  %v4398_v9 = vld [vmem:[%s7614_s1 + $0x10] sm:$0xff]  }
  0x10   :  { %353 = vmatprep.subr.bf16.mxu0 %v4754_v0  ;;  %v167_v8 = vpack.c.bf16 %v69_v7, %v67_v6  ;;  %v4399_v10 = vld [vmem:[%s7614_s1 + $0x8] sm:$0xff]   ;;  %v4400_v11 = vld [vmem:[%s7614_s1] sm:$0xff]   ;;  %v4401_v12 = vld [vmem:[%s7614_s1 + $0x78] sm:$0xff]  }
  0x11   :  { %v4402_v13 = vld [vmem:[%s7614_s1 + $0x70] sm:$0xff]   ;;  %v4403_v14 = vld [vmem:[%s7614_s1 + $0x68] sm:$0xff]   ;;  %v4404_v15 = vld [vmem:[%s7614_s1 + $0x60] sm:$0xff]  }
  0x12   :  { %383 = vmatprep.mubr.bf16.mxu0 %v167_v8  ;;  %v4405_v16 = vld [vmem:[%s7614_s1 + $0x58] sm:$0xff]   ;;  %v4406_v17 = vld [vmem:[%s7614_s1 + $0x50] sm:$0xff]   ;;  %v4407_v18 = vld [vmem:[%s7614_s1 + $0x48] sm:$0xff]  }
  0x13   :  { %354 = vmatpush1.bf16.msra.mxu0 %v4394_v2  ;;  %v4408_v19 = vld [vmem:[%s7614_s1 + $0x40] sm:$0xff]   ;;  %v68_v21 = vld [vmem:[#allocation3 + $0x10] sm:$0xff]  ;;  %v71_v22 = vld [vmem:[#allocation3 + $0x28] sm:$0xff] }
  0x14   :  { %355 = vmatprep.subr.bf16.mxu0 %v4754_v0  ;;  %v66_v20 = vld [vmem:[#allocation3] sm:$0xff]  ;;  %v73_v23 = vld [vmem:[#allocation3 + $0x38] sm:$0xff]  ;;  %v72_v27 = vld [vmem:[#allocation3 + $0x30] sm:$0xff] }
  0x15   :  { %v166_v24 = vpack.c.bf16 %v68_v21, %v66_v20  ;;  %v169_v25 = vpack.c.bf16 %v73_v23, %v71_v22  ;;  %v70_v26 = vld [vmem:[#allocation3 + $0x20] sm:$0xff]  ;;  %v75_v28 = vld [vmem:[#allocation3 + $0x48] sm:$0xff]  ;;  %v77_v29 = vld [vmem:[#allocation3 + $0x58] sm:$0xff] }
  0x16   :  { %v168_v30 = vpack.c.bf16 %v72_v27, %v70_v26  ;;  %v171_v31 = vpack.c.bf16 %v77_v29, %v75_v28  ;;  %v74_v32 = vld [vmem:[#allocation3 + $0x40] sm:$0xff]  ;;  %v76_v33 = vld [vmem:[#allocation3 + $0x50] sm:$0xff]  ;;  %v79_v34 = vld [vmem:[#allocation3 + $0x68] sm:$0xff] }
  0x17   :  { %356 = vmatpush1.bf16.msra.mxu0 %v4395_v3  ;;  %v81_v35 = vld [vmem:[#allocation3 + $0x78] sm:$0xff]  ;;  %v170_v36 = vpack.c.bf16 %v76_v33, %v74_v32  ;;  %v78_v38 = vld [vmem:[#allocation3 + $0x60] sm:$0xff]  ;;  %v80_v39 = vld [vmem:[#allocation3 + $0x70] sm:$0xff] }
  0x18   :  { %357 = vmatprep.subr.bf16.mxu0 %v4754_v0  ;;  %v173_v37 = vpack.c.bf16 %v81_v35, %v79_v34  ;;  %v83_v40 = vld [vmem:[#allocation3 + $0x88] sm:$0xff]  ;;  %v85_v41 = vld [vmem:[#allocation3 + $0x98] sm:$0xff]  ;;  %v172_v42 = vpack.c.bf16 %v80_v39, %v78_v38  ;;  %v82_v44 = vld [vmem:[#allocation3 + $0x80] sm:$0xff] }
  0x19   :  { %v175_v43 = vpack.c.bf16 %v85_v41, %v83_v40  ;;  %v84_v45 = vld [vmem:[#allocation3 + $0x90] sm:$0xff]  ;;  %v87_v46 = vld [vmem:[#allocation3 + $0xa8] sm:$0xff]  ;;  %v89_v47 = vld [vmem:[#allocation3 + $0xb8] sm:$0xff] }
  0x1a   :  { %v174_v48 = vpack.c.bf16 %v84_v45, %v82_v44  ;;  %v177_v49 = vpack.c.bf16 %v89_v47, %v87_v46  ;;  %v86_v50 = vld [vmem:[#allocation3 + $0xa0] sm:$0xff]  ;;  %v88_v51 = vld [vmem:[#allocation3 + $0xb0] sm:$0xff]  ;;  %v91_v52 = vld [vmem:[#allocation3 + $0xc8] sm:$0xff] }
  0x1b   :  { %358 = vmatpush1.bf16.msra.mxu0 %v4396_v4  ;;  %v93_v53 = vld [vmem:[#allocation3 + $0xd8] sm:$0xff]  ;;  %v176_v54 = vpack.c.bf16 %v88_v51, %v86_v50  ;;  %v90_v56 = vld [vmem:[#allocation3 + $0xc0] sm:$0xff]  ;;  %v92_v57 = vld [vmem:[#allocation3 + $0xd0] sm:$0xff] }
  0x1c   :  { %359 = vmatprep.subr.bf16.mxu0 %v4754_v0  ;;  %v179_v55 = vpack.c.bf16 %v93_v53, %v91_v52  ;;  %v95_v58 = vld [vmem:[#allocation3 + $0xe8] sm:$0xff]  ;;  %v97_v59 = vld [vmem:[#allocation3 + $0xf8] sm:$0xff]  ;;  %v178_v60 = vpack.c.bf16 %v92_v57, %v90_v56  ;;  %v94_v62 = vld [vmem:[#allocation3 + $0xe0] sm:$0xff] }
  0x1d   :  { %v181_v61 = vpack.c.bf16 %v97_v59, %v95_v58  ;;  %v96_v63 = vld [vmem:[#allocation3 + $0xf0] sm:$0xff]  ;;  %v101_v1 = vld [vmem:[#allocation3 + $0x118] sm:$0xff]  ;;  %v98_v4 = vld [vmem:[#allocation3 + $0x100] sm:$0xff] }
  0x1e   :  { %v180_v2 = vpack.c.bf16 %v96_v63, %v94_v62  ;;  %v103_v6 = vld [vmem:[#allocation3 + $0x128] sm:$0xff]  ;;  %v105_v7 = vld [vmem:[#allocation3 + $0x138] sm:$0xff]  ;;  %v110_v22 = vld [vmem:[#allocation3 + $0x160] sm:$0xff] }
  0x1f   :  { %360 = vmatpush1.bf16.msra.mxu0 %v4397_v5  ;;  %v100_v5 = vld [vmem:[#allocation3 + $0x110] sm:$0xff]  ;;  %v114_v28 = vld [vmem:[#allocation3 + $0x180] sm:$0xff] }
  0x20   :  { %361 = vmatprep.subr.bf16.mxu0 %v4754_v0  ;;  %v182_v8 = vpack.c.bf16 %v100_v5, %v98_v4  ;;  %v112_v23 = vld [vmem:[#allocation3 + $0x170] sm:$0xff]  ;;  %v118_v34 = vld [vmem:[#allocation3 + $0x1a0] sm:$0xff] }
  0x21   :  { %v188_v26 = vpack.c.bf16 %v112_v23, %v110_v22  ;;  %v116_v29 = vld [vmem:[#allocation3 + $0x190] sm:$0xff]  ;;  %v122_v40 = vld [vmem:[#allocation3 + $0x1c0] sm:$0xff]  ;;  %v155_v22 = vld [vmem:[#allocation3 + $0x2c8] sm:$0xff] }
  0x22   :  { %v190_v32 = vpack.c.bf16 %v116_v29, %v114_v28  ;;  %v120_v35 = vld [vmem:[#allocation3 + $0x1b0] sm:$0xff]  ;;  %v126_v46 = vld [vmem:[#allocation3 + $0x1e0] sm:$0xff]  ;;  %v157_v23 = vld [vmem:[#allocation3 + $0x2d8] sm:$0xff] }
  0x23   :  { %362 = vmatpush1.bf16.msra.mxu0 %v4398_v9  ;;  %v185_v9 = vpack.c.bf16 %v105_v7, %v103_v6  ;;  %v192_v38 = vpack.c.bf16 %v120_v35, %v118_v34  ;;  %v124_v41 = vld [vmem:[#allocation3 + $0x1d0] sm:$0xff]  ;;  %v130_v52 = vld [vmem:[#allocation3 + $0x200] sm:$0xff]  ;;  %v7629_v6 = vmov 0.0   ;;  %v159_v28 = vld [vmem:[#allocation3 + $0x2e8] sm:$0xff] }
  0x24   :  { %363 = vmatprep.subr.bf16.mxu0 %v4754_v0  ;;  %v194_v44 = vpack.c.bf16 %v124_v41, %v122_v40  ;;  %v128_v47 = vld [vmem:[#allocation3 + $0x1f0] sm:$0xff]  ;;  %v134_v58 = vld [vmem:[#allocation3 + $0x220] sm:$0xff]  ;;  %4371 = vmatprep.subr.bf16.mxu1 %v7629_v6  ;;  %v161_v29 = vld [vmem:[#allocation3 + $0x2f8] sm:$0xff] }
  0x25   :  { %v196_v50 = vpack.c.bf16 %v128_v47, %v126_v46  ;;  %v132_v53 = vld [vmem:[#allocation3 + $0x210] sm:$0xff]  ;;  %v142_v7 = vld [vmem:[#allocation3 + $0x260] sm:$0xff]  ;;  %v163_v34 = vld [vmem:[#allocation3 + $0x308] sm:$0xff]  ;;  %4203 = vmatprep.mubr.msk.bf16.mxu1 %vm4756_vm0, %v7629_v6 }
  0x26   :  { %v198_v56 = vpack.c.bf16 %v132_v53, %v130_v52  ;;  %v136_v59 = vld [vmem:[#allocation3 + $0x230] sm:$0xff]  ;;  %v165_v35 = vld [vmem:[#allocation3 + $0x318] sm:$0xff]  ;;  %v4898_v41 = vld [vmem:[%s7615_s2] ss:$0 sm:$0xff] }
  0x27   :  { %364 = vmatpush1.bf16.msra.mxu0 %v4399_v10  ;;  %v102_v10 = vld [vmem:[#allocation3 + $0x120] sm:$0xff]  ;;  %v200_v62 = vpack.c.bf16 %v136_v59, %v134_v58  ;;  %v4410_v53 = vld [vmem:[%s7618_s5 + $0x30] sm:$0xff]  }
  0x28   :  { %365 = vmatprep.subr.bf16.mxu0 %v4754_v0 }
  0x2b   :  { %366 = vmatpush1.bf16.msra.mxu0 %v4400_v11  ;;  %v104_v11 = vld [vmem:[#allocation3 + $0x130] sm:$0xff] }
  0x2c   :  { %367 = vmatprep.subr.bf16.mxu0 %v4754_v0 }
  0x2f   :  { %368 = vmatpush2.bf16.msra.mxu0 %v4401_v12  ;;  %v107_v12 = vld [vmem:[#allocation3 + $0x148] sm:$0xff] }
  0x30   :  { %369 = vmatprep.subr.bf16.mxu0 %v4754_v0 }
  0x33   :  { %370 = vmatpush2.bf16.msra.mxu0 %v4402_v13  ;;  %v109_v13 = vld [vmem:[#allocation3 + $0x158] sm:$0xff] }
  0x34   :  { %371 = vmatprep.subr.bf16.mxu0 %v4754_v0 }
  0x37   :  { %372 = vmatpush2.bf16.msra.mxu0 %v4403_v14  ;;  %v184_v14 = vpack.c.bf16 %v104_v11, %v102_v10  ;;  %v149_v10 = vld [vmem:[#allocation3 + $0x298] sm:$0xff] }
  0x38   :  { %373 = vmatprep.subr.bf16.mxu0 %v4754_v0  ;;  %v4409_v11 = vld [vmem:[%s7618_s5 + $0x38] sm:$0xff]  }
  0x39   :  { %4379 = vmatpush3.bf16.msra.mxu1 %v4409_v11 }
  0x3a   :  { %4372 = vmatprep.subr.bf16.mxu1 %v7629_v6 }
  0x3b   :  { %374 = vmatpush2.bf16.msra.mxu0 %v4404_v15  ;;  %v187_v15 = vpack.c.bf16 %v109_v13, %v107_v12 }
  0x3c   :  { %375 = vmatprep.subr.bf16.mxu0 %v4754_v0 }
  0x3d   :  { %4380 = vmatpush3.bf16.msra.mxu1 %v4410_v53 }
  0x3e   :  { %4373 = vmatprep.subr.bf16.mxu1 %v7629_v6 }
  0x3f   :  { %376 = vmatpush2.bf16.msra.mxu0 %v4405_v16  ;;  %v106_v16 = vld [vmem:[#allocation3 + $0x140] sm:$0xff] }
  0x40   :  { %377 = vmatprep.subr.bf16.mxu0 %v4754_v0 }
  0x43   :  { %378 = vmatpush2.bf16.msra.mxu0 %v4406_v17  ;;  %v108_v17 = vld [vmem:[#allocation3 + $0x150] sm:$0xff] }
  0x44   :  { %379 = vmatprep.subr.bf16.mxu0 %v4754_v0  ;;  %v186_v20 = vpack.c.bf16 %v108_v17, %v106_v16  ;;  %v151_v16 = vld [vmem:[#allocation3 + $0x2a8] sm:$0xff]  ;;  %v153_v17 = vld [vmem:[#allocation3 + $0x2b8] sm:$0xff] }
  0x47   :  { %380 = vmatpush2.bf16.msra.mxu0 %v4407_v18  ;;  %v111_v18 = vld [vmem:[#allocation3 + $0x168] sm:$0xff] }
  0x48   :  { %381 = vmatprep.subr.bf16.mxu0 %v4754_v0  ;;  %v99_v0 = vld [vmem:[#allocation3 + $0x108] sm:$0xff] }
  0x49   :  { %v183_v3 = vpack.c.bf16 %v101_v1, %v99_v0  ;;  %v138_v0 = vld [vmem:[#allocation3 + $0x240] sm:$0xff]  ;;  %v140_v1 = vld [vmem:[#allocation3 + $0x250] sm:$0xff] }
  0x4a   :  { %v202_v4 = vpack.c.bf16 %v140_v1, %v138_v0 }
  0x4b   :  { %382 = vmatpush2.bf16.msra.mxu0 %v4408_v19  ;;  %v113_v19 = vld [vmem:[#allocation3 + $0x178] sm:$0xff] }
  0x4c   :  { %v189_v21 = vpack.c.bf16 %v113_v19, %v111_v18  ;;  %4147 = vmatprep.subr.bf16.mxu0 %v7629_v6  ;;  %v209_v19 = vpack.c.bf16 %v153_v17, %v151_v16 }
  0x4e   :  { %384 = vmatmul.mubr.bf16.vlgmr.msra.gmra.mxu0 %v166_v24  ;;  %v115_v24 = vld [vmem:[#allocation3 + $0x188] sm:$0xff] }
  0x4f   :  { %391 = vmatprep.mubr.bf16.mxu0 %v169_v25  ;;  %v117_v25 = vld [vmem:[#allocation3 + $0x198] sm:$0xff]  ;;  %4148 = vmatpush3.bf16.msra.mxu0 %v4409_v11 }
  0x50   :  { %v191_v27 = vpack.c.bf16 %v117_v25, %v115_v24  ;;  %4149 = vmatprep.subr.bf16.mxu0 %v7629_v6  ;;  %v211_v25 = vpack.c.bf16 %v157_v23, %v155_v22 }
  0x53   :  { %4150 = vmatpush3.bf16.msra.mxu0 %v4410_v53 }
  0x54   :  { %4151 = vmatprep.subr.bf16.mxu0 %v7629_v6 }
  0x56   :  { %392 = vmatmul.mubr.bf16.gmra.mxu0 %v168_v30  ;;  %v119_v30 = vld [vmem:[#allocation3 + $0x1a8] sm:$0xff] }
  0x57   :  { %399 = vmatprep.mubr.bf16.mxu0 %v171_v31  ;;  %v121_v31 = vld [vmem:[#allocation3 + $0x1b8] sm:$0xff] }
  0x58   :  { %v193_v33 = vpack.c.bf16 %v121_v31, %v119_v30  ;;  %v213_v31 = vpack.c.bf16 %v161_v29, %v159_v28  ;;  %v4412_v29 = vld [vmem:[%s7618_s5 + $0x20] sm:$0xff]  }
  0x5e   :  { %400 = vmatmul.mubr.bf16.gmra.mxu0 %v170_v36  ;;  %v123_v36 = vld [vmem:[#allocation3 + $0x1c8] sm:$0xff] }
  0x5f   :  { %407 = vmatprep.mubr.bf16.mxu0 %v173_v37  ;;  %v125_v37 = vld [vmem:[#allocation3 + $0x1d8] sm:$0xff] }
  0x60   :  { %v195_v39 = vpack.c.bf16 %v125_v37, %v123_v36  ;;  %v215_v37 = vpack.c.bf16 %v165_v35, %v163_v34 }
  0x66   :  { %408 = vmatmul.mubr.bf16.gmra.mxu0 %v172_v42  ;;  %v127_v42 = vld [vmem:[#allocation3 + $0x1e8] sm:$0xff] }
  0x67   :  { %415 = vmatprep.mubr.bf16.mxu0 %v175_v43  ;;  %v129_v43 = vld [vmem:[#allocation3 + $0x1f8] sm:$0xff] }
  0x68   :  { %v197_v45 = vpack.c.bf16 %v129_v43, %v127_v42 }
  0x6e   :  { %416 = vmatmul.mubr.bf16.gmra.mxu0 %v174_v48  ;;  %v131_v48 = vld [vmem:[#allocation3 + $0x208] sm:$0xff] }
  0x6f   :  { %423 = vmatprep.mubr.bf16.mxu0 %v177_v49  ;;  %v133_v49 = vld [vmem:[#allocation3 + $0x218] sm:$0xff] }
  0x70   :  { %v199_v51 = vpack.c.bf16 %v133_v49, %v131_v48 }
  0x76   :  { %424 = vmatmul.mubr.bf16.gmra.mxu0 %v176_v54  ;;  %v135_v54 = vld [vmem:[#allocation3 + $0x228] sm:$0xff] }
  0x77   :  { %431 = vmatprep.mubr.bf16.mxu0 %v179_v55  ;;  %v137_v55 = vld [vmem:[#allocation3 + $0x238] sm:$0xff] }
  0x78   :  { %v201_v57 = vpack.c.bf16 %v137_v55, %v135_v54 }
  0x7e   :  { %432 = vmatmul.mubr.bf16.gmra.mxu0 %v178_v60  ;;  %v139_v60 = vld [vmem:[#allocation3 + $0x248] sm:$0xff] }
  0x7f   :  { %439 = vmatprep.mubr.bf16.mxu0 %v181_v61  ;;  %v141_v61 = vld [vmem:[#allocation3 + $0x258] sm:$0xff] }
  0x80   :  { %v203_v63 = vpack.c.bf16 %v141_v61, %v139_v60 }
  0x86   :  { %440 = vmatmul.mubr.bf16.gmra.mxu0 %v180_v2  ;;  %v143_v2 = vld [vmem:[#allocation3 + $0x268] sm:$0xff] }
  0x87   :  { %447 = vmatprep.mubr.bf16.mxu0 %v183_v3  ;;  %v145_v3 = vld [vmem:[#allocation3 + $0x278] sm:$0xff] }
  0x88   :  { %v205_v5 = vpack.c.bf16 %v145_v3, %v143_v2 }
  0x8e   :  { %448 = vmatmul.mubr.bf16.gmra.mxu0 %v182_v8  ;;  %v144_v8 = vld [vmem:[#allocation3 + $0x270] sm:$0xff] }
  0x8f   :  { %455 = vmatprep.mubr.bf16.mxu0 %v185_v9  ;;  %v147_v9 = vld [vmem:[#allocation3 + $0x288] sm:$0xff]  ;;  %v204_v12 = vpack.c.bf16 %v144_v8, %v142_v7 }
  0x90   :  { %v207_v13 = vpack.c.bf16 %v149_v10, %v147_v9  ;;  %v4411_v9 = vld [vmem:[%s7618_s5 + $0x28] sm:$0xff]  }
  0x91   :  { %4152 = vmatpush3.bf16.msra.mxu0 %v4411_v9  ;;  %4381 = vmatpush3.bf16.msra.mxu1 %v4411_v9 }
  0x92   :  { %4153 = vmatprep.subr.bf16.mxu0 %v7629_v6  ;;  %4374 = vmatprep.subr.bf16.mxu1 %v7629_v6 }
  0x95   :  { %4154 = vmatpush3.bf16.msra.mxu0 %v4412_v29  ;;  %4382 = vmatpush3.bf16.msra.mxu1 %v4412_v29 }
  0x96   :  { %456 = vmatmul.mubr.bf16.gmra.mxu0 %v184_v14  ;;  %v146_v14 = vld [vmem:[#allocation3 + $0x280] sm:$0xff]  ;;  %4155 = vmatprep.subr.bf16.mxu0 %v7629_v6 }
  0x97   :  { %463 = vmatprep.mubr.bf16.mxu0 %v187_v15  ;;  %v148_v15 = vld [vmem:[#allocation3 + $0x290] sm:$0xff]  ;;  %4375 = vmatprep.subr.bf16.mxu1 %v7629_v6 }
  0x98   :  { %v206_v18 = vpack.c.bf16 %v148_v15, %v146_v14 }
  0x9e   :  { %464 = vmatmul.mubr.bf16.gmra.mxu0 %v186_v20  ;;  %v150_v20 = vld [vmem:[#allocation3 + $0x2a0] sm:$0xff] }
  0x9f   :  { %471 = vmatprep.mubr.bf16.mxu0 %v189_v21  ;;  %v152_v21 = vld [vmem:[#allocation3 + $0x2b0] sm:$0xff] }
  0xa0   :  { %v208_v24 = vpack.c.bf16 %v152_v21, %v150_v20 }
  0xa6   :  { %472 = vmatmul.mubr.bf16.gmra.mxu0 %v188_v26  ;;  %v154_v26 = vld [vmem:[#allocation3 + $0x2c0] sm:$0xff] }
  0xa7   :  { %479 = vmatprep.mubr.bf16.mxu0 %v191_v27  ;;  %v156_v27 = vld [vmem:[#allocation3 + $0x2d0] sm:$0xff] }
  0xa8   :  { %v210_v30 = vpack.c.bf16 %v156_v27, %v154_v26 }
  0xae   :  { %480 = vmatmul.mubr.bf16.gmra.mxu0 %v190_v32  ;;  %v158_v32 = vld [vmem:[#allocation3 + $0x2e0] sm:$0xff] }
  0xaf   :  { %487 = vmatprep.mubr.bf16.mxu0 %v193_v33  ;;  %v160_v33 = vld [vmem:[#allocation3 + $0x2f0] sm:$0xff] }
  0xb0   :  { %v212_v36 = vpack.c.bf16 %v160_v33, %v158_v32 }
  0xb6   :  { %488 = vmatmul.mubr.bf16.gmra.mxu0 %v192_v38  ;;  %v162_v38 = vld [vmem:[#allocation3 + $0x300] sm:$0xff] }
  0xb7   :  { %495 = vmatprep.mubr.bf16.mxu0 %v195_v39  ;;  %v164_v39 = vld [vmem:[#allocation3 + $0x310] sm:$0xff] }
  0xb8   :  { %v214_v40 = vpack.c.bf16 %v164_v39, %v162_v38 }
  0xbe   :  { %496 = vmatmul.mubr.bf16.gmra.mxu0 %v194_v44 }
  0xbf   :  { %503 = vmatprep.mubr.bf16.mxu0 %v197_v45 }
  0xc6   :  { %504 = vmatmul.mubr.bf16.gmra.mxu0 %v196_v50 }
  0xc7   :  { %511 = vmatprep.mubr.bf16.mxu0 %v199_v51 }
  0xce   :  { %512 = vmatmul.mubr.bf16.gmra.mxu0 %v198_v56 }
  0xcf   :  { %519 = vmatprep.mubr.bf16.mxu0 %v201_v57 }
  0xd6   :  { %520 = vmatmul.mubr.bf16.gmra.mxu0 %v200_v62 }
  0xd7   :  { %527 = vmatprep.mubr.bf16.mxu0 %v203_v63 }
  0xde   :  { %528 = vmatmul.mubr.bf16.gmra.mxu0 %v202_v4 }
  0xdf   :  { %535 = vmatprep.mubr.bf16.mxu0 %v205_v5 }
  0xe6   :  { %536 = vmatmul.mubr.bf16.gmra.mxu0 %v204_v12 }
  0xe7   :  { %543 = vmatprep.mubr.bf16.mxu0 %v207_v13 }
  0xee   :  { %544 = vmatmul.mubr.bf16.gmra.mxu0 %v206_v18 }
  0xef   :  { %551 = vmatprep.mubr.bf16.mxu0 %v209_v19 }
  0xf6   :  { %552 = vmatmul.mubr.bf16.gmra.mxu0 %v208_v24 }
  0xf7   :  { %559 = vmatprep.mubr.bf16.mxu0 %v211_v25 }
  0xfe   :  { %560 = vmatmul.mubr.bf16.gmra.mxu0 %v210_v30 }
  0xff   :  { %567 = vmatprep.mubr.bf16.mxu0 %v213_v31 }
 0x106   :  { %568 = vmatmul.mubr.bf16.gmra.mxu0 %v212_v36 }
 0x107   :  { %575 = vmatprep.mubr.bf16.mxu0 %v215_v37 }
 0x10e   :  { %v385_v42 = vpop.f32.mrf.mxu0  ;;  %576 = vmatmul.mubr.bf16.gmra.mxu0 %v214_v40 }
 0x10f   :  { %v4901_v43 = vadd.f32 %v4898_v41, %v385_v42  ;;  %4163 = vmatprep.mubr.msk.bf16.mxu0 %vm4756_vm0, %v7629_v6 }
 0x110   :  { %v387_v44 = vpop.f32.mrf.mxu0 }
 0x111   :  { %584 = vadd.xlane.f32.xlu0 %v4901_v43 }
 0x112   :  { %v388_v45 = vpop.f32.mrf.mxu0 }
 0x113   :  { %v4905_v46 = vadd.f32 %v4898_v41, %v388_v45 }
 0x114   :  { %v390_v47 = vpop.f32.mrf.mxu0 }
 0x115   :  { %586 = vadd.xlane.f32.xlu0 %v4905_v46 }
 0x116   :  { %v393_v48 = vpop.f32.mrf.mxu0 }
 0x117   :  { %v4909_v49 = vadd.f32 %v4898_v41, %v393_v48 }
 0x118   :  { %v395_v50 = vpop.f32.mrf.mxu0 }
 0x119   :  { %588 = vadd.xlane.f32.xlu1 %v4909_v49 }
 0x11a   :  { %v396_v51 = vpop.f32.mrf.mxu0 }
 0x11b   :  { %v4913_v52 = vadd.f32 %v4898_v41, %v396_v51  ;;  %v4413_v51 = vld [vmem:[%s7618_s5 + $0x18] sm:$0xff]  }
 0x11c   :  { %v398_v54 = vpop.f32.mrf.mxu0  ;;  %4156 = vmatpush3.bf16.msra.mxu0 %v4413_v51  ;;  %4383 = vmatpush3.bf16.msra.mxu1 %v4413_v51 }
 0x11d   :  { %590 = vadd.xlane.f32.xlu1 %v4913_v52  ;;  %4157 = vmatprep.subr.bf16.mxu0 %v7629_v6 }
 0x11e   :  { %v401_v55 = vpop.f32.mrf.mxu0  ;;  %4376 = vmatprep.subr.bf16.mxu1 %v7629_v6 }
 0x11f   :  { %v4921_v56 = vadd.f32 %v4898_v41, %v401_v55 }
 0x120   :  { %v403_v57 = vpop.f32.mrf.mxu0 }
 0x121   :  { %592 = vadd.xlane.f32.xlu0 %v4921_v56 }
 0x122   :  { %v404_v58 = vpop.f32.mrf.mxu0 }
 0x123   :  { %v4926_v59 = vadd.f32 %v4898_v41, %v404_v58 }
 0x124   :  { %v406_v60 = vpop.f32.mrf.mxu0 }
 0x125   :  { %594 = vadd.xlane.f32.xlu1 %v4926_v59  ;;  %v4414_v60 = vld [vmem:[%s7618_s5 + $0x10] sm:$0xff]  }
 0x126   :  { %v409_v61 = vpop.f32.mrf.mxu0  ;;  %4158 = vmatpush3.bf16.msra.mxu0 %v4414_v60  ;;  %4384 = vmatpush3.bf16.msra.mxu1 %v4414_v60 }
 0x127   :  { %v4930_v62 = vadd.f32 %v4898_v41, %v409_v61  ;;  %4159 = vmatprep.subr.bf16.mxu0 %v7629_v6  ;;  %4377 = vmatprep.subr.bf16.mxu1 %v7629_v6 }
 0x128   :  { %v411_v63 = vpop.f32.mrf.mxu0 }
 0x129   :  { %596 = vadd.xlane.f32.xlu0 %v4930_v62  ;;  %v4415_v63 = vld [vmem:[%s7618_s5 + $0x8] sm:$0xff]  }
 0x12a   :  { %v412_v0 = vpop.f32.mrf.mxu0  ;;  %4160 = vmatpush3.bf16.msra.mxu0 %v4415_v63  ;;  %4385 = vmatpush3.bf16.msra.mxu1 %v4415_v63 }
 0x12b   :  { %v4934_v1 = vadd.f32 %v4898_v41, %v412_v0  ;;  %4161 = vmatprep.subr.bf16.mxu0 %v7629_v6  ;;  %4378 = vmatprep.subr.bf16.mxu1 %v7629_v6 }
 0x12c   :  { %v414_v2 = vpop.f32.mrf.mxu0 }
 0x12d   :  { %598 = vadd.xlane.f32.xlu1 %v4934_v1 }
 0x12e   :  { %v417_v3 = vpop.f32.mrf.mxu0 }
 0x12f   :  { %v4938_v4 = vadd.f32 %v4898_v41, %v417_v3 }
 0x130   :  { %v419_v5 = vpop.f32.mrf.mxu0 }
 0x131   :  { %600 = vadd.xlane.f32.xlu0 %v4938_v4 }
 0x132   :  { %v420_v7 = vpop.f32.mrf.mxu0 }
 0x133   :  { %v4942_v8 = vadd.f32 %v4898_v41, %v420_v7 }
 0x134   :  { %v422_v10 = vpop.f32.mrf.mxu0 }
 0x135   :  { %602 = vadd.xlane.f32.xlu1 %v4942_v8 }
 0x136   :  { %v425_v11 = vpop.f32.mrf.mxu0 }
 0x137   :  { %v4950_v12 = vadd.f32 %v4898_v41, %v425_v11 }
 0x138   :  { %v427_v13 = vpop.f32.mrf.mxu0 }
 0x139   :  { %604 = vadd.xlane.f32.xlu0 %v4950_v12 }
 0x13a   :  { %v428_v14 = vpop.f32.mrf.mxu0 }
 0x13b   :  { %v4955_v15 = vadd.f32 %v4898_v41, %v428_v14 }
 0x13c   :  { %v430_v16 = vpop.f32.mrf.mxu0 }
 0x13d   :  { %606 = vadd.xlane.f32.xlu1 %v4955_v15 }
 0x13e   :  { %v433_v17 = vpop.f32.mrf.mxu0 }
 0x13f   :  { %v4959_v18 = vadd.f32 %v4898_v41, %v433_v17 }
 0x140   :  { %v435_v19 = vpop.f32.mrf.mxu0 }
 0x141   :  { %608 = vadd.xlane.f32.xlu0 %v4959_v18 }
 0x142   :  { %v436_v20 = vpop.f32.mrf.mxu0 }
 0x143   :  { %v4963_v21 = vadd.f32 %v4898_v41, %v436_v20 }
 0x144   :  { %v438_v22 = vpop.f32.mrf.mxu0 }
 0x145   :  { %610 = vadd.xlane.f32.xlu1 %v4963_v21 }
 0x146   :  { %v441_v23 = vpop.f32.mrf.mxu0 }
 0x147   :  { %v4967_v24 = vadd.f32 %v4898_v41, %v441_v23 }
 0x148   :  { %v443_v25 = vpop.f32.mrf.mxu0 }
 0x149   :  { %612 = vadd.xlane.f32.xlu0 %v4967_v24 }
 0x14a   :  { %v444_v26 = vpop.f32.mrf.mxu0 }
 0x14b   :  { %v4971_v27 = vadd.f32 %v4898_v41, %v444_v26 }
 0x14c   :  { %v446_v28 = vpop.f32.mrf.mxu0 }
 0x14d   :  { %614 = vadd.xlane.f32.xlu1 %v4971_v27 }
 0x14e   :  { %v449_v30 = vpop.f32.mrf.mxu0 }
 0x14f   :  { %v4978_v31 = vadd.f32 %v4898_v41, %v449_v30 }
 0x150   :  { %v451_v32 = vpop.f32.mrf.mxu0 }
 0x151   :  { %616 = vadd.xlane.f32.xlu0 %v4978_v31 }
 0x152   :  { %v452_v33 = vpop.f32.mrf.mxu0 }
 0x153   :  { %v4984_v34 = vadd.f32 %v4898_v41, %v452_v33 }
 0x154   :  { %v454_v35 = vpop.f32.mrf.mxu0 }
 0x155   :  { %618 = vadd.xlane.f32.xlu1 %v4984_v34 }
 0x156   :  { %v457_v36 = vpop.f32.mrf.mxu0 }
 0x157   :  { %v4988_v37 = vadd.f32 %v4898_v41, %v457_v36 }
 0x158   :  { %v459_v38 = vpop.f32.mrf.mxu0 }
 0x159   :  { %620 = vadd.xlane.f32.xlu0 %v4988_v37 }
 0x15a   :  { %v460_v39 = vpop.f32.mrf.mxu0 }
 0x15b   :  { %v4992_v40 = vadd.f32 %v4898_v41, %v460_v39 }
 0x15c   :  { %v462_v42 = vpop.f32.mrf.mxu0 }
 0x15d   :  { %622 = vadd.xlane.f32.xlu1 %v4992_v40 }
 0x15e   :  { %v465_v44 = vpop.f32.mrf.mxu0 }
 0x160   :  { %v467_v45 = vpop.f32.mrf.mxu0 }
 0x162   :  { %v4995_v47 = vpop.f32.mrf.mxu0 }
 0x164   :  { %v470_v48 = vpop.f32.mrf.mxu0 }
 0x165   :  { %v5048_v48 = vadd.f32 %v4898_v41, %v465_v44 }
 0x166   :  { %v4997_v50 = vpop.f32.mrf.mxu0 }
 0x168   :  { %v475_v53 = vpop.f32.mrf.mxu0 }
 0x16a   :  { %v5002_v54 = vpop.f32.mrf.mxu0 }
 0x16c   :  { %v478_v55 = vpop.f32.mrf.mxu0 }
 0x16e   :  { %v5006_v57 = vpop.f32.mrf.mxu0 }
 0x170   :  { %v483_v58 = vpop.f32.mrf.mxu0 }
 0x172   :  { %v5011_v61 = vpop.f32.mrf.mxu0 }
 0x174   :  { %v486_v0 = vpop.f32.mrf.mxu0 }
 0x176   :  { %v5018_v2 = vpop.f32.mrf.mxu0 }
 0x178   :  { %v491_v3 = vpop.f32.mrf.mxu0 }
 0x17a   :  { %v5022_v5 = vpop.f32.mrf.mxu0 }
 0x17c   :  { %v494_v7 = vpop.f32.mrf.mxu0 }
 0x17e   :  { %v5024_v9 = vpop.f32.mrf.mxu0 }
 0x180   :  { %v499_v10 = vpop.f32.mrf.mxu0 }
 0x182   :  { %v5026_v11 = vpop.f32.mrf.mxu0 }
 0x184   :  { %v502_v13 = vpop.f32.mrf.mxu0 }
 0x185   :  { %v5071_v13 = vadd.f32 %v4898_v41, %v4997_v50 }
 0x186   :  { %v5028_v14 = vpop.f32.mrf.mxu0 }
 0x188   :  { %v507_v16 = vpop.f32.mrf.mxu0 }
 0x18a   :  { %v5030_v17 = vpop.f32.mrf.mxu0 }
 0x18c   :  { %v510_v19 = vpop.f32.mrf.mxu0 }
 0x18e   :  { %v5032_v20 = vpop.f32.mrf.mxu0 }
 0x190   :  { %v515_v22 = vpop.f32.mrf.mxu0 }
 0x192   :  { %v5034_v23 = vpop.f32.mrf.mxu0 }
 0x194   :  { %v518_v25 = vpop.f32.mrf.mxu0 }
 0x196   :  { %v5036_v26 = vpop.f32.mrf.mxu0 }
 0x198   :  { %v523_v28 = vpop.f32.mrf.mxu0 }
 0x19a   :  { %v585_v29 = vpop.xlane.xlu0 %584  ;;  %v5038_v30 = vpop.f32.mrf.mxu0 }
 0x19b   :  { %v685_v32 = vmul.f32 0.0078125, %v585_v29  ;;  %v5087_v29 = vadd.f32 %v4898_v41, %v5002_v54 }
 0x19c   :  { %v526_v33 = vpop.f32.mrf.mxu0 }
 0x19d   :  { %v5041_v35 = vsub.f32 %v4901_v43, %v685_v32  ;;  %v5093_v33 = vadd.f32 %v4898_v41, %v5006_v57 }
 0x19e   :  { %v587_v36 = vpop.xlane.xlu0 %586  ;;  %v5043_v38 = vpop.f32.mrf.mxu0 }
 0x19f   :  { %v686_v39 = vmul.f32 0.0078125, %v587_v36  ;;  %v785_v42 = vmul.f32 %v5041_v35, %v5041_v35 }
 0x1a0   :  { %v531_v45 = vpop.f32.mrf.mxu0 }
 0x1a1   :  { %835 = vadd.xlane.f32.xlu0 %v785_v42  ;;  %v5051_v51 = vsub.f32 %v4905_v46, %v686_v39  ;;  %v5065_v46 = vadd.f32 %v4898_v41, %v4995_v47 }
 0x1a2   :  { %v589_v53 = vpop.xlane.xlu1 %588  ;;  %v5053_v55 = vpop.f32.mrf.mxu0 }
 0x1a3   :  { %v687_v43 = vmul.f32 0.0078125, %v589_v53  ;;  %v786_v58 = vmul.f32 %v5051_v51, %v5051_v51 }
 0x1a4   :  { %v534_v60 = vpop.f32.mrf.mxu0 }
 0x1a5   :  { %624 = vadd.xlane.f32.xlu0 %v5048_v48  ;;  %837 = vadd.xlane.f32.xlu1 %v786_v58  ;;  %v5059_v63 = vsub.f32 %v4909_v49, %v687_v43 }
 0x1a6   :  { %v591_v44 = vpop.xlane.xlu1 %590  ;;  %v5061_v0 = vpop.f32.mrf.mxu0 }
 0x1a7   :  { %v688_v3 = vmul.f32 0.0078125, %v591_v44  ;;  %v787_v7 = vmul.f32 %v5059_v63, %v5059_v63 }
 0x1a8   :  { %v539_v10 = vpop.f32.mrf.mxu0 }
 0x1a9   :  { %839 = vadd.xlane.f32.xlu0 %v787_v7  ;;  %626 = vadd.xlane.f32.xlu1 %v5065_v46  ;;  %v5075_v49 = vsub.f32 %v4913_v52, %v688_v3  ;;  %v5117_v3 = vadd.f32 %v4898_v41, %v5018_v2 }
 0x1aa   :  { %v593_v16 = vpop.xlane.xlu0 %592  ;;  %v5077_v19 = vpop.f32.mrf.mxu0 }
 0x1ab   :  { %v689_v47 = vmul.f32 0.0078125, %v593_v16  ;;  %v788_v22 = vmul.f32 %v5075_v49, %v5075_v49 }
 0x1ac   :  { %v542_v25 = vpop.f32.mrf.mxu0 }
 0x1ad   :  { %628 = vadd.xlane.f32.xlu0 %v5071_v13  ;;  %841 = vadd.xlane.f32.xlu1 %v788_v22  ;;  %v5083_v50 = vsub.f32 %v4921_v56, %v689_v47 }
 0x1ae   :  { %v595_v28 = vpop.xlane.xlu1 %594  ;;  %v5099_v56 = vpop.f32.mrf.mxu0 }
 0x1af   :  { %v690_v52 = vmul.f32 0.0078125, %v595_v28  ;;  %v789_v32 = vmul.f32 %v5083_v50, %v5083_v50 }
 0x1b0   :  { %v547_v45 = vpop.f32.mrf.mxu0 }
 0x1b1   :  { %630 = vadd.xlane.f32.xlu1 %v5087_v29  ;;  %843 = vadd.xlane.f32.xlu0 %v789_v32  ;;  %v5097_v36 = vsub.f32 %v4926_v59, %v690_v52  ;;  %v5111_v59 = vadd.f32 %v4898_v41, %v5011_v61 }
 0x1b2   :  { %v597_v39 = vpop.xlane.xlu0 %596  ;;  %v5107_v53 = vpop.f32.mrf.mxu0 }
 0x1b3   :  { %v691_v42 = vmul.f32 0.0078125, %v597_v39  ;;  %v790_v54 = vmul.f32 %v5097_v36, %v5097_v36  ;;  %v5141_v39 = vadd.f32 %v4898_v41, %v5024_v9 }
 0x1b4   :  { %v550_v44 = vpop.f32.mrf.mxu0 }
 0x1b5   :  { %845 = vadd.xlane.f32.xlu1 %v790_v54  ;;  %632 = vadd.xlane.f32.xlu0 %v5093_v33  ;;  %v5105_v57 = vsub.f32 %v4930_v62, %v691_v42  ;;  %v5163_v44 = vadd.f32 %v4898_v41, %v5026_v11 }
 0x1b6   :  { %v599_v43 = vpop.xlane.xlu1 %598  ;;  %v5123_v7 = vpop.f32.mrf.mxu0 }
 0x1b7   :  { %v692_v58 = vmul.f32 0.0078125, %v599_v43  ;;  %v791_v60 = vmul.f32 %v5105_v57, %v5105_v57 }
 0x1b8   :  { %v555_v47 = vpop.f32.mrf.mxu0 }
 0x1b9   :  { %634 = vadd.xlane.f32.xlu1 %v5111_v59  ;;  %847 = vadd.xlane.f32.xlu0 %v791_v60  ;;  %v5121_v62 = vsub.f32 %v4934_v1, %v692_v58  ;;  %v5135_v1 = vadd.f32 %v4898_v41, %v5022_v5  ;;  %v4416_v5 = vld [vmem:[%s7618_s5] sm:$0xff]   ;;  %v5170_v47 = vadd.f32 %v4898_v41, %v5028_v14 }
 0x1ba   :  { %v601_v10 = vpop.xlane.xlu0 %600  ;;  %v5131_v22 = vpop.f32.mrf.mxu0  ;;  %4162 = vmatpush3.bf16.msra.mxu0 %v4416_v5  ;;  %4386 = vmatpush3.bf16.msra.mxu1 %v4416_v5 }
 0x1bb   :  { %v693_v61 = vmul.f32 0.0078125, %v601_v10  ;;  %v792_v16 = vmul.f32 %v5121_v62, %v5121_v62  ;;  %4263 = vmatprep.subr.bf16.mxu1 %v7629_v6 }
 0x1bc   :  { %v558_v32 = vpop.f32.mrf.mxu0 }
 0x1bd   :  { %849 = vadd.xlane.f32.xlu1 %v792_v16  ;;  %636 = vadd.xlane.f32.xlu0 %v5117_v3  ;;  %v5129_v2 = vsub.f32 %v4938_v4, %v693_v61 }
 0x1be   :  { %v603_v25 = vpop.xlane.xlu1 %602  ;;  %v5150_v42 = vpop.f32.mrf.mxu0 }
 0x1bf   :  { %v694_v28 = vmul.f32 0.0078125, %v603_v25  ;;  %v793_v52 = vmul.f32 %v5129_v2, %v5129_v2 }
 0x1c0   :  { %v563_v9 = vpop.f32.mrf.mxu0 }
 0x1c1   :  { %638 = vadd.xlane.f32.xlu1 %v5135_v1  ;;  %851 = vadd.xlane.f32.xlu0 %v793_v52  ;;  %v5145_v4 = vsub.f32 %v4942_v8, %v694_v28 }
 0x1c2   :  { %v605_v54 = vpop.xlane.xlu0 %604  ;;  %v5159_v58 = vpop.f32.mrf.mxu0 }
 0x1c3   :  { %v695_v45 = vmul.f32 0.0078125, %v605_v54  ;;  %v794_v43 = vmul.f32 %v5145_v4, %v5145_v4 }
 0x1c4   :  { %v566_v16 = vpop.f32.mrf.mxu0 }
 0x1c5   :  { %853 = vadd.xlane.f32.xlu1 %v794_v43  ;;  %640 = vadd.xlane.f32.xlu0 %v5141_v39  ;;  %v5157_v8 = vsub.f32 %v4950_v12, %v695_v45 }
 0x1c6   :  { %v607_v60 = vpop.xlane.xlu1 %606  ;;  %v5175_v25 = vpop.f32.mrf.mxu0 }
 0x1c7   :  { %v696_v10 = vmul.f32 0.0078125, %v607_v60  ;;  %v795_v61 = vmul.f32 %v5157_v8, %v5157_v8  ;;  %v5198_v60 = vadd.f32 %v4898_v41, %v5032_v20 }
 0x1c8   :  { %v571_v32 = vpop.f32.mrf.mxu0 }
 0x1c9   :  { %642 = vadd.xlane.f32.xlu1 %v5163_v44  ;;  %855 = vadd.xlane.f32.xlu0 %v795_v61  ;;  %v5173_v12 = vsub.f32 %v4955_v15, %v696_v10  ;;  %v5186_v15 = vadd.f32 %v4898_v41, %v5030_v17 }
 0x1ca   :  { %v609_v28 = vpop.xlane.xlu0 %608  ;;  %v5191_v54 = vpop.f32.mrf.mxu0 }
 0x1cb   :  { %v697_v11 = vmul.f32 0.0078125, %v609_v28  ;;  %v796_v52 = vmul.f32 %v5173_v12, %v5173_v12  ;;  %v5210_v28 = vadd.f32 %v4898_v41, %v5034_v23 }
 0x1cc   :  { %v574_v9 = vpop.f32.mrf.mxu0 }
 0x1cd   :  { %857 = vadd.xlane.f32.xlu1 %v796_v52  ;;  %644 = vadd.xlane.f32.xlu0 %v5170_v47  ;;  %v5189_v14 = vsub.f32 %v4959_v18, %v697_v11 }
 0x1ce   :  { %v611_v5 = vpop.xlane.xlu1 %610  ;;  %v5205_v16 = vpop.f32.mrf.mxu0 }
 0x1cf   :  { %v698_v45 = vmul.f32 0.0078125, %v611_v5  ;;  %v797_v43 = vmul.f32 %v5189_v14, %v5189_v14 }
 0x1d0   :  { %v579_v11 = vpop.f32.mrf.mxu0 }
 0x1d1   :  { %646 = vadd.xlane.f32.xlu1 %v5186_v15  ;;  %859 = vadd.xlane.f32.xlu0 %v797_v43  ;;  %v5201_v17 = vsub.f32 %v4963_v21, %v698_v45  ;;  %v5222_v45 = vadd.f32 %v4898_v41, %v5036_v26 }
 0x1d2   :  { %v613_v18 = vpop.xlane.xlu0 %612  ;;  %v5217_v5 = vpop.f32.mrf.mxu0 }
 0x1d3   :  { %v699_v10 = vmul.f32 0.0078125, %v613_v18  ;;  %v798_v61 = vmul.f32 %v5201_v17, %v5201_v17 }
 0x1d5   :  { %861 = vadd.xlane.f32.xlu1 %v798_v61  ;;  %648 = vadd.xlane.f32.xlu0 %v5198_v60  ;;  %v5213_v20 = vsub.f32 %v4967_v24, %v699_v10  ;;  %v582_v24 = vpop.f32.mrf.mxu0  ;;  %v5232_v10 = vadd.f32 %v4898_v41, %v5038_v30 }
 0x1d6   :  { %v615_v21 = vpop.xlane.xlu1 %614  ;;  %v5252_v24 = vadd.f32 %v4898_v41, %v5053_v55 }
 0x1d7   :  { %v700_v52 = vmul.f32 0.0078125, %v615_v21  ;;  %v799_v32 = vmul.f32 %v5213_v20, %v5213_v20  ;;  %v5242_v21 = vadd.f32 %v4898_v41, %v5043_v38 }
 0x1d9   :  { %650 = vadd.xlane.f32.xlu1 %v5210_v28  ;;  %863 = vadd.xlane.f32.xlu0 %v799_v32  ;;  %v5225_v23 = vsub.f32 %v4971_v27, %v700_v52 }
 0x1da   :  { %v617_v43 = vpop.xlane.xlu0 %616 }
 0x1db   :  { %v701_v9 = vmul.f32 0.0078125, %v617_v43  ;;  %v800_v18 = vmul.f32 %v5225_v23, %v5225_v23 }
 0x1dd   :  { %865 = vadd.xlane.f32.xlu1 %v800_v18  ;;  %652 = vadd.xlane.f32.xlu0 %v5222_v45  ;;  %v5235_v61 = vsub.f32 %v4978_v31, %v701_v9  ;;  %v5262_v18 = vadd.f32 %v4898_v41, %v5061_v0 }
 0x1de   :  { %v619_v26 = vpop.xlane.xlu1 %618 }
 0x1df   :  { %v702_v11 = vmul.f32 0.0078125, %v619_v26  ;;  %v801_v27 = vmul.f32 %v5235_v61, %v5235_v61 }
 0x1e1   :  { %654 = vadd.xlane.f32.xlu1 %v5232_v10  ;;  %867 = vadd.xlane.f32.xlu0 %v801_v27  ;;  %v5245_v52 = vsub.f32 %v4984_v34, %v702_v11 }
 0x1e2   :  { %v621_v30 = vpop.xlane.xlu0 %620 }
 0x1e3   :  { %v703_v32 = vmul.f32 0.0078125, %v621_v30  ;;  %v802_v31 = vmul.f32 %v5245_v52, %v5245_v52 }
 0x1e5   :  { %869 = vadd.xlane.f32.xlu1 %v802_v31  ;;  %656 = vadd.xlane.f32.xlu0 %v5242_v21  ;;  %v5255_v43 = vsub.f32 %v4988_v37, %v703_v32  ;;  %v5272_v37 = vadd.f32 %v4898_v41, %v5077_v19 }
 0x1e6   :  { %v623_v38 = vpop.xlane.xlu1 %622 }
 0x1e7   :  { %v704_v9 = vmul.f32 0.0078125, %v623_v38  ;;  %v803_v34 = vmul.f32 %v5255_v43, %v5255_v43 }
 0x1e9   :  { %658 = vadd.xlane.f32.xlu1 %v5252_v24  ;;  %871 = vadd.xlane.f32.xlu0 %v803_v34  ;;  %v5265_v26 = vsub.f32 %v4992_v40, %v704_v9 }
 0x1eb   :  { %7647 = vst [vmem:[#allocation6_spill] sm:$0xff] %v5265_v26  ;;  %v804_v55 = vmul.f32 %v5265_v26, %v5265_v26 }
 0x1ed   :  { %873 = vadd.xlane.f32.xlu1 %v804_v55  ;;  %660 = vadd.xlane.f32.xlu0 %v5262_v18 }
 0x1f1   :  { %662 = vadd.xlane.f32.xlu1 %v5272_v37 }
 0x22a   :  { %v836_v11 = vpop.xlane.xlu0 %835 }
 0x22b   :  { %v935_v27 = vmul.f32 0.0078125, %v836_v11  ;;  %v5282_v11 = vadd.f32 %v4898_v41, %v5099_v56 }
 0x22d   :  { %v985_v30 = vadd.f32 1e-05, %v935_v27 }
 0x22e   :  { %v838_v0 = vpop.xlane.xlu1 %837  ;;  %v625_v32 = vpop.xlane.xlu0 %624 }
 0x22f   :  { %4421 = vrsqrt.f32 %v985_v30  ;;  %v936_v40 = vmul.f32 0.0078125, %v838_v0  ;;  %v705_v31 = vmul.f32 0.0078125, %v625_v32 }
 0x231   :  { %v986_v38 = vadd.f32 1e-05, %v936_v40  ;;  %v5276_v9 = vsub.f32 %v5048_v48, %v705_v31 }
 0x232   :  { %v627_v34 = vpop.xlane.xlu1 %626  ;;  %v840_v55 = vpop.xlane.xlu0 %839 }
 0x233   :  { %4423 = vrsqrt.f32 %v986_v38  ;;  %v706_v6 = vmul.f32 0.0078125, %v627_v34  ;;  %v937_v19 = vmul.f32 0.0078125, %v840_v55  ;;  %v805_v26 = vmul.f32 %v5276_v9, %v5276_v9 }
 0x235   :  { %v987_v27 = vadd.f32 1e-05, %v937_v19  ;;  %875 = vadd.xlane.f32.xlu0 %v805_v26  ;;  %v5285_v30 = vsub.f32 %v5065_v46, %v706_v6  ;;  %v5295_v26 = vadd.f32 %v4898_v41, %v5107_v53 }
 0x236   :  { %v842_v0 = vpop.xlane.xlu1 %841  ;;  %v629_v48 = vpop.xlane.xlu0 %628 }
 0x237   :  { %7648 = vst [vmem:[#allocation7_spill] sm:$0xff] %v5285_v30  ;;  %4425 = vrsqrt.f32 %v987_v27  ;;  %v938_v32 = vmul.f32 0.0078125, %v842_v0  ;;  %v707_v40 = vmul.f32 0.0078125, %v629_v48  ;;  %v806_v31 = vmul.f32 %v5285_v30, %v5285_v30 }
 0x238   :  { %v5302_v48 = vadd.f32 %v4898_v41, %v5123_v7 }
 0x239   :  { %v988_v38 = vadd.f32 1e-05, %v938_v32  ;;  %877 = vadd.xlane.f32.xlu1 %v806_v31  ;;  %664 = vadd.xlane.f32.xlu0 %v5282_v11  ;;  %v5291_v56 = vsub.f32 %v5071_v13, %v707_v40  ;;  %v5311_v32 = vld [vmem:[%s7616_s3] ss:$0 sm:$0xff] }
 0x23a   :  { %v631_v6 = vpop.xlane.xlu1 %630  ;;  %v844_v46 = vpop.xlane.xlu0 %843 }
 0x23b   :  { %7649 = vst [vmem:[#allocation8_spill] sm:$0xff] %v5291_v56  ;;  %4427 = vrsqrt.f32 %v988_v38  ;;  %v708_v34 = vmul.f32 0.0078125, %v631_v6  ;;  %v939_v55 = vmul.f32 0.0078125, %v844_v46  ;;  %v807_v19 = vmul.f32 %v5291_v56, %v5291_v56 }
 0x23c   :  { %v4422_v27 = vpop.eup %4421 }
 0x23d   :  { %v1085_v0 = vmul.f32 %v4422_v27, %v5041_v35  ;;  %v989_v13 = vadd.f32 1e-05, %v939_v55  ;;  %666 = vadd.xlane.f32.xlu1 %v5295_v26  ;;  %879 = vadd.xlane.f32.xlu0 %v807_v19  ;;  %v5306_v53 = vsub.f32 %v5087_v29, %v708_v34  ;;  %v5324_v19 = vld [vmem:[%s7617_s4] ss:$0 sm:$0xff]  ;;  %v5328_v27 = vadd.f32 %v4898_v41, %v5131_v22 }
 0x23e   :  { %v846_v40 = vpop.xlane.xlu1 %845  ;;  %v633_v31 = vpop.xlane.xlu0 %632 }
 0x23f   :  { %7650 = vst [vmem:[#allocation9_spill] sm:$0xff] %v5306_v53  ;;  %4429 = vrsqrt.f32 %v989_v13  ;;  %v940_v35 = vmul.f32 0.0078125, %v846_v40  ;;  %v709_v38 = vmul.f32 0.0078125, %v633_v31  ;;  %v808_v7 = vmul.f32 %v5306_v53, %v5306_v53 }
 0x240   :  { %v4424_v6 = vpop.eup %4423  ;;  %v1142_v46 = vmul.f32 %v5311_v32, %v1085_v0 }
 0x241   :  { %v1086_v55 = vmul.f32 %v4424_v6, %v5051_v51  ;;  %v990_v29 = vadd.f32 1e-05, %v940_v35  ;;  %881 = vadd.xlane.f32.xlu1 %v808_v7  ;;  %668 = vadd.xlane.f32.xlu0 %v5302_v48  ;;  %v5319_v34 = vsub.f32 %v5093_v33, %v709_v38  ;;  %v5336_v7 = vadd.f32 %v4898_v41, %v5150_v42 }
 0x242   :  { %v635_v13 = vpop.xlane.xlu1 %634  ;;  %v848_v0 = vpop.xlane.xlu0 %847  ;;  %v1199_v38 = vadd.f32 %v5324_v19, %v1142_v46 }
 0x243   :  { %7651 = vst [vmem:[#allocation10_spill] sm:$0xff] %v5319_v34  ;;  %4431 = vrsqrt.f32 %v990_v29  ;;  %v710_v51 = vmul.f32 0.0078125, %v635_v13  ;;  %v941_v40 = vmul.f32 0.0078125, %v848_v0  ;;  %v809_v31 = vmul.f32 %v5319_v34, %v5319_v34 }
 0x244   :  { %v4426_v35 = vpop.eup %4425  ;;  %v1143_v33 = vmul.f32 %v5311_v32, %v1086_v55 }
 0x245   :  { %v991_v6 = vadd.f32 1e-05, %v941_v40  ;;  %670 = vadd.xlane.f32.xlu1 %v5328_v27  ;;  %883 = vadd.xlane.f32.xlu0 %v809_v31  ;;  %v5340_v22 = vsub.f32 %v5111_v59, %v710_v51  ;;  %v1087_v29 = vmul.f32 %v4426_v35, %v5059_v63  ;;  %v1249_v40 = vmax.f32 %v1199_v38, 0.0 }
 0x246   :  { %v850_v13 = vpop.xlane.xlu1 %849  ;;  %v637_v0 = vpop.xlane.xlu0 %636  ;;  %v1200_v34 = vadd.f32 %v5324_v19, %v1143_v33  ;;  %v5354_v51 = vadd.f32 %v4898_v41, %v5159_v58 }
 0x247   :  { %4433 = vrsqrt.f32 %v991_v6  ;;  %v942_v55 = vmul.f32 0.0078125, %v850_v13  ;;  %v711_v46 = vmul.f32 0.0078125, %v637_v0  ;;  %v810_v42 = vmul.f32 %v5340_v22, %v5340_v22 }
 0x248   :  { %v4428_v53 = vpop.eup %4427  ;;  %v1250_v56 = vmax.f32 %v1200_v34, 0.0  ;;  %v1144_v31 = vmul.f32 %v5311_v32, %v1087_v29 }
 0x249   :  { %v992_v30 = vadd.f32 1e-05, %v942_v55  ;;  %885 = vadd.xlane.f32.xlu1 %v810_v42  ;;  %672 = vadd.xlane.f32.xlu0 %v5336_v7  ;;  %v5349_v63 = vsub.f32 %v5117_v3, %v711_v46  ;;  %v1088_v59 = vmul.f32 %v4428_v53, %v5075_v49  ;;  %v5362_v49 = vadd.f32 %v4898_v41, %v5175_v25 }
 0x24a   :  { %v639_v35 = vpop.xlane.xlu1 %638  ;;  %v852_v33 = vpop.xlane.xlu0 %851  ;;  %v1299_v6 = vpack.c.bf16 %v1250_v56, %v1249_v40  ;;  %v1201_v0 = vadd.f32 %v5324_v19, %v1144_v31  ;;  %v7652_v46 = vmov 0.0  }
 0x24b   :  { %4435 = vrsqrt.f32 %v992_v30  ;;  %v712_v34 = vmul.f32 0.0078125, %v639_v35  ;;  %v943_v38 = vmul.f32 0.0078125, %v852_v33  ;;  %v811_v29 = vmul.f32 %v5349_v63, %v5349_v63 }
 0x24c   :  { %v4430_v13 = vpop.eup %4429  ;;  %4164 = vmatmul.mubr.bf16.vlgmr.msra.gmra.mxu0 %v1299_v6  ;;  %v1145_v3 = vmul.f32 %v5311_v32, %v1088_v59  ;;  %v1251_v35 = vmax.f32 %v1201_v0, 0.0 }
 0x24d   :  { %v993_v58 = vadd.f32 1e-05, %v943_v38  ;;  %674 = vadd.xlane.f32.xlu1 %v5354_v51  ;;  %887 = vadd.xlane.f32.xlu0 %v811_v29  ;;  %v5366_v30 = vsub.f32 %v5135_v1, %v712_v34  ;;  %v1089_v56 = vmul.f32 %v4430_v13, %v5083_v50  ;;  %v5382_v38 = vadd.f32 %v4898_v41, %v5191_v54 }
 0x24e   :  { %v854_v53 = vpop.xlane.xlu1 %853  ;;  %v641_v55 = vpop.xlane.xlu0 %640  ;;  %4167 = vmatprep.mubr.msk.bf16.mxu0 %vm4756_vm0, %v7652_v46  ;;  %v1202_v42 = vadd.f32 %v5324_v19, %v1145_v3 }
 0x24f   :  { %4437 = vrsqrt.f32 %v993_v58  ;;  %v944_v40 = vmul.f32 0.0078125, %v854_v53  ;;  %v713_v25 = vmul.f32 0.0078125, %v641_v55  ;;  %v812_v31 = vmul.f32 %v5366_v30, %v5366_v30 }
 0x250   :  { %v4432_v59 = vpop.eup %4431  ;;  %v1252_v33 = vmax.f32 %v1202_v42, 0.0  ;;  %v1146_v1 = vmul.f32 %v5311_v32, %v1089_v56 }
 0x251   :  { %v994_v6 = vadd.f32 1e-05, %v944_v40  ;;  %889 = vadd.xlane.f32.xlu1 %v812_v31  ;;  %676 = vadd.xlane.f32.xlu0 %v5362_v49  ;;  %v5377_v50 = vsub.f32 %v5141_v39, %v713_v25  ;;  %v1090_v34 = vmul.f32 %v4432_v59, %v5097_v36  ;;  %v5390_v36 = vadd.f32 %v4898_v41, %v5205_v16 }
 0x252   :  { %v643_v29 = vpop.xlane.xlu1 %642  ;;  %v856_v13 = vpop.xlane.xlu0 %855  ;;  %v1300_v3 = vpack.c.bf16 %v1252_v33, %v1251_v35  ;;  %v1203_v55 = vadd.f32 %v5324_v19, %v1146_v1 }
 0x253   :  { %4439 = vrsqrt.f32 %v994_v6  ;;  %v714_v0 = vmul.f32 0.0078125, %v643_v29  ;;  %v945_v58 = vmul.f32 0.0078125, %v856_v13  ;;  %v813_v56 = vmul.f32 %v5377_v50, %v5377_v50 }
 0x254   :  { %v4434_v53 = vpop.eup %4433  ;;  %4168 = vmatmul.mubr.bf16.gmra.mxu0 %v1300_v3  ;;  %v1147_v39 = vmul.f32 %v5311_v32, %v1090_v34  ;;  %v1253_v6 = vmax.f32 %v1203_v55, 0.0  ;;  %v5410_v3 = vadd.f32 %v4898_v41, %v5217_v5 }
 0x255   :  { %v995_v54 = vadd.f32 1e-05, %v945_v58  ;;  %678 = vadd.xlane.f32.xlu1 %v5382_v38  ;;  %891 = vadd.xlane.f32.xlu0 %v813_v56  ;;  %v5394_v42 = vsub.f32 %v5163_v44, %v714_v0  ;;  %v1091_v40 = vmul.f32 %v4434_v53, %v5105_v57 }
 0x256   :  { %v858_v25 = vpop.xlane.xlu1 %857  ;;  %v645_v31 = vpop.xlane.xlu0 %644  ;;  %4171 = vmatprep.mubr.msk.bf16.mxu0 %vm4756_vm0, %v7652_v46  ;;  %v1204_v59 = vadd.f32 %v5324_v19, %v1147_v39 }
 0x257   :  { %4441 = vrsqrt.f32 %v995_v54  ;;  %v946_v35 = vmul.f32 0.0078125, %v858_v25  ;;  %v715_v16 = vmul.f32 0.0078125, %v645_v31  ;;  %v814_v33 = vmul.f32 %v5394_v42, %v5394_v42 }
 0x258   :  { %v4436_v1 = vpop.eup %4435  ;;  %v1254_v34 = vmax.f32 %v1204_v59, 0.0  ;;  %v1148_v44 = vmul.f32 %v5311_v32, %v1091_v40 }
 0x259   :  { %v996_v29 = vadd.f32 1e-05, %v946_v35  ;;  %893 = vadd.xlane.f32.xlu1 %v814_v33  ;;  %680 = vadd.xlane.f32.xlu0 %v5390_v36  ;;  %v5405_v57 = vsub.f32 %v5170_v47, %v715_v16  ;;  %v1092_v13 = vmul.f32 %v4436_v1, %v5121_v62 }
 0x25a   :  { %v647_v0 = vpop.xlane.xlu1 %646  ;;  %v860_v58 = vpop.xlane.xlu0 %859  ;;  %v1301_v56 = vpack.c.bf16 %v1254_v34, %v1253_v6  ;;  %v1205_v40 = vadd.f32 %v5324_v19, %v1148_v44 }
 0x25b   :  { %4443 = vrsqrt.f32 %v996_v29  ;;  %v716_v53 = vmul.f32 0.0078125, %v647_v0  ;;  %v947_v39 = vmul.f32 0.0078125, %v860_v58  ;;  %v815_v55 = vmul.f32 %v5405_v57, %v5405_v57 }
 0x25c   :  { %v4438_v54 = vpop.eup %4437  ;;  %4172 = vmatmul.mubr.bf16.gmra.mxu0 %v1301_v56  ;;  %v1149_v47 = vmul.f32 %v5311_v32, %v1092_v13  ;;  %v1255_v6 = vmax.f32 %v1205_v40, 0.0 }
 0x25d   :  { %v997_v62 = vadd.f32 1e-05, %v947_v39  ;;  %682 = vadd.xlane.f32.xlu1 %v5410_v3  ;;  %895 = vadd.xlane.f32.xlu0 %v815_v55  ;;  %v5418_v41 = vsub.f32 %v5186_v15, %v716_v53  ;;  %v1093_v5 = vmul.f32 %v4438_v54, %v5129_v2 }
 0x25e   :  { %v862_v25 = vpop.xlane.xlu1 %861  ;;  %v649_v31 = vpop.xlane.xlu0 %648  ;;  %4175 = vmatprep.mubr.msk.bf16.mxu0 %vm4756_vm0, %v7652_v46  ;;  %v1206_v59 = vadd.f32 %v5324_v19, %v1149_v47 }
 0x25f   :  { %4445 = vrsqrt.f32 %v997_v62  ;;  %v948_v35 = vmul.f32 0.0078125, %v862_v25  ;;  %v717_v16 = vmul.f32 0.0078125, %v649_v31  ;;  %v816_v33 = vmul.f32 %v5418_v41, %v5418_v41 }
 0x260   :  { %v4440_v1 = vpop.eup %4439  ;;  %v1256_v34 = vmax.f32 %v1206_v59, 0.0  ;;  %v1150_v15 = vmul.f32 %v5311_v32, %v1093_v5 }
 0x261   :  { %v998_v44 = vadd.f32 1e-05, %v948_v35  ;;  %897 = vadd.xlane.f32.xlu1 %v816_v33  ;;  %v5428_v2 = vsub.f32 %v5198_v60, %v717_v16  ;;  %v1094_v29 = vmul.f32 %v4440_v1, %v5145_v4 }
 0x262   :  { %v651_v13 = vpop.xlane.xlu1 %650  ;;  %v864_v0 = vpop.xlane.xlu0 %863  ;;  %v1302_v58 = vpack.c.bf16 %v1256_v34, %v1255_v6  ;;  %v1207_v47 = vadd.f32 %v5324_v19, %v1150_v15 }
 0x263   :  { %4447 = vrsqrt.f32 %v998_v44  ;;  %v718_v56 = vmul.f32 0.0078125, %v651_v13  ;;  %v949_v53 = vmul.f32 0.0078125, %v864_v0  ;;  %v817_v39 = vmul.f32 %v5428_v2, %v5428_v2 }
 0x264   :  { %v4442_v55 = vpop.eup %4441  ;;  %4176 = vmatmul.mubr.bf16.gmra.mxu0 %v1302_v58  ;;  %v1151_v54 = vmul.f32 %v5311_v32, %v1094_v29  ;;  %v1257_v33 = vmax.f32 %v1207_v47, 0.0 }
 0x265   :  { %v999_v40 = vadd.f32 1e-05, %v949_v53  ;;  %899 = vadd.xlane.f32.xlu0 %v817_v39  ;;  %v5436_v60 = vsub.f32 %v5210_v28, %v718_v56  ;;  %4179 = vmatprep.mubr.msk.bf16.mxu0 %vm4756_vm0, %v7652_v46  ;;  %v1095_v4 = vmul.f32 %v4442_v55, %v5157_v8 }
 0x266   :  { %v866_v62 = vpop.xlane.xlu1 %865  ;;  %v653_v5 = vpop.xlane.xlu0 %652  ;;  %v1208_v25 = vadd.f32 %v5324_v19, %v1151_v54 }
 0x267   :  { %4449 = vrsqrt.f32 %v999_v40  ;;  %v950_v31 = vmul.f32 0.0078125, %v866_v62  ;;  %v719_v59 = vmul.f32 0.0078125, %v653_v5  ;;  %v818_v35 = vmul.f32 %v5436_v60, %v5436_v60 }
 0x268   :  { %v4444_v16 = vpop.eup %4443  ;;  %v1258_v1 = vmax.f32 %v1208_v25, 0.0  ;;  %v1152_v28 = vmul.f32 %v5311_v32, %v1095_v4 }
 0x269   :  { %v1000_v6 = vadd.f32 1e-05, %v950_v31  ;;  %901 = vadd.xlane.f32.xlu1 %v818_v35  ;;  %v5446_v34 = vsub.f32 %v5222_v45, %v719_v59  ;;  %v1096_v8 = vmul.f32 %v4444_v16, %v5173_v12 }
 0x26a   :  { %v655_v15 = vpop.xlane.xlu1 %654  ;;  %v868_v44 = vpop.xlane.xlu0 %867  ;;  %v1303_v29 = vpack.c.bf16 %v1258_v1, %v1257_v33  ;;  %v1209_v39 = vadd.f32 %v5324_v19, %v1152_v28 }
 0x26b   :  { %4451 = vrsqrt.f32 %v1000_v6  ;;  %v720_v13 = vmul.f32 0.0078125, %v655_v15  ;;  %v951_v0 = vmul.f32 0.0078125, %v868_v44  ;;  %v819_v58 = vmul.f32 %v5446_v34, %v5446_v34 }
 0x26c   :  { %v4446_v56 = vpop.eup %4445  ;;  %4180 = vmatmul.mubr.bf16.gmra.mxu0 %v1303_v29  ;;  %v1153_v53 = vmul.f32 %v5311_v32, %v1096_v8  ;;  %v1259_v31 = vmax.f32 %v1209_v39, 0.0 }
 0x26d   :  { %v1001_v55 = vadd.f32 1e-05, %v951_v0  ;;  %903 = vadd.xlane.f32.xlu0 %v819_v58  ;;  %v5454_v45 = vsub.f32 %v5232_v10, %v720_v13  ;;  %4183 = vmatprep.mubr.msk.bf16.mxu0 %vm4756_vm0, %v7652_v46  ;;  %v1097_v12 = vmul.f32 %v4446_v56, %v5189_v14 }
 0x26e   :  { %v870_v54 = vpop.xlane.xlu1 %869  ;;  %v657_v47 = vpop.xlane.xlu0 %656  ;;  %v1210_v40 = vadd.f32 %v5324_v19, %v1153_v53 }
 0x26f   :  { %4453 = vrsqrt.f32 %v1001_v55  ;;  %v952_v4 = vmul.f32 0.0078125, %v870_v54  ;;  %v721_v62 = vmul.f32 0.0078125, %v657_v47  ;;  %v820_v5 = vmul.f32 %v5454_v45, %v5454_v45 }
 0x270   :  { %v4448_v25 = vpop.eup %4447  ;;  %v1260_v59 = vmax.f32 %v1210_v40, 0.0  ;;  %v1154_v10 = vmul.f32 %v5311_v32, %v1097_v12 }
 0x271   :  { %v1002_v35 = vadd.f32 1e-05, %v952_v4  ;;  %905 = vadd.xlane.f32.xlu1 %v820_v5  ;;  %v5464_v16 = vsub.f32 %v5242_v21, %v721_v62  ;;  %v1098_v14 = vmul.f32 %v4448_v25, %v5201_v17 }
 0x272   :  { %v659_v33 = vpop.xlane.xlu1 %658  ;;  %v872_v1 = vpop.xlane.xlu0 %871  ;;  %v1304_v28 = vpack.c.bf16 %v1260_v59, %v1259_v31  ;;  %v1211_v13 = vadd.f32 %v5324_v19, %v1154_v10 }
 0x273   :  { %4455 = vrsqrt.f32 %v1002_v35  ;;  %v722_v6 = vmul.f32 0.0078125, %v659_v33  ;;  %v953_v8 = vmul.f32 0.0078125, %v872_v1  ;;  %v821_v15 = vmul.f32 %v5464_v16, %v5464_v16 }
 0x274   :  { %v4450_v44 = vpop.eup %4449  ;;  %4184 = vmatmul.mubr.bf16.gmra.mxu0 %v1304_v28  ;;  %v1155_v29 = vmul.f32 %v5311_v32, %v1098_v14  ;;  %v1261_v47 = vmax.f32 %v1211_v13, 0.0 }
 0x275   :  { %v1003_v0 = vadd.f32 1e-05, %v953_v8  ;;  %907 = vadd.xlane.f32.xlu0 %v821_v15  ;;  %v5472_v21 = vsub.f32 %v5252_v24, %v722_v6  ;;  %4187 = vmatprep.mubr.msk.bf16.mxu0 %vm4756_vm0, %v7652_v46  ;;  %v1099_v17 = vmul.f32 %v4450_v44, %v5213_v20 }
 0x276   :  { %v874_v58 = vpop.xlane.xlu1 %873  ;;  %v661_v56 = vpop.xlane.xlu0 %660  ;;  %v1212_v53 = vadd.f32 %v5324_v19, %v1155_v29 }
 0x277   :  { %4457 = vrsqrt.f32 %v1003_v0  ;;  %v954_v39 = vmul.f32 0.0078125, %v874_v58  ;;  %v723_v55 = vmul.f32 0.0078125, %v661_v56  ;;  %v822_v12 = vmul.f32 %v5472_v21, %v5472_v21 }
 0x278   :  { %v4452_v54 = vpop.eup %4451  ;;  %v1262_v40 = vmax.f32 %v1212_v53, 0.0  ;;  %v1156_v24 = vmul.f32 %v5311_v32, %v1099_v17 }
 0x279   :  { %v1004_v4 = vadd.f32 1e-05, %v954_v39  ;;  %909 = vadd.xlane.f32.xlu1 %v822_v12  ;;  %v5482_v62 = vsub.f32 %v5262_v18, %v723_v55  ;;  %v1100_v20 = vmul.f32 %v4452_v54, %v5225_v23 }
 0x27a   :  { %v663_v5 = vpop.xlane.xlu1 %662  ;;  %v1305_v25 = vpack.c.bf16 %v1262_v40, %v1261_v47  ;;  %v1213_v31 = vadd.f32 %v5324_v19, %v1156_v24 }
 0x27b   :  { %4459 = vrsqrt.f32 %v1004_v4  ;;  %v724_v59 = vmul.f32 0.0078125, %v663_v5  ;;  %v823_v10 = vmul.f32 %v5482_v62, %v5482_v62  ;;  %v1157_v35 = vmul.f32 %v5311_v32, %v1100_v20 }
 0x27c   :  { %v4454_v14 = vpop.eup %4453  ;;  %4188 = vmatmul.mubr.bf16.gmra.mxu0 %v1305_v25  ;;  %v1263_v28 = vmax.f32 %v1213_v31, 0.0 }
 0x27d   :  { %911 = vadd.xlane.f32.xlu0 %v823_v10  ;;  %v5490_v33 = vsub.f32 %v5272_v37, %v724_v59  ;;  %4191 = vmatprep.mubr.msk.bf16.mxu0 %vm4756_vm0, %v7652_v46  ;;  %v1214_v23 = vadd.f32 %v5324_v19, %v1157_v35  ;;  %v1101_v18 = vmul.f32 %v4454_v14, %v5235_v61 }
 0x27f   :  { %v824_v1 = vmul.f32 %v5490_v33, %v5490_v33  ;;  %v1264_v6 = vmax.f32 %v1214_v23, 0.0  ;;  %v1158_v8 = vmul.f32 %v5311_v32, %v1101_v18 }
 0x280   :  { %v4456_v15 = vpop.eup %4455 }
 0x281   :  { %913 = vadd.xlane.f32.xlu1 %v824_v1  ;;  %v1306_v44 = vpack.c.bf16 %v1264_v6, %v1263_v28  ;;  %v1102_v37 = vmul.f32 %v4456_v15, %v5245_v52  ;;  %v1215_v13 = vadd.f32 %v5324_v19, %v1158_v8  ;;  %v7653_v52 = vld [vmem:[#allocation6_spill] sm:$0xff] }
 0x283   :  { %v1159_v29 = vmul.f32 %v5311_v32, %v1102_v37  ;;  %v1265_v58 = vmax.f32 %v1215_v13, 0.0 }
 0x284   :  { %v4458_v0 = vpop.eup %4457  ;;  %4192 = vmatmul.mubr.bf16.gmra.mxu0 %v1306_v44 }
 0x285   :  { %4195 = vmatprep.mubr.msk.bf16.mxu0 %vm4756_vm0, %v7652_v46  ;;  %v1216_v61 = vadd.f32 %v5324_v19, %v1159_v29  ;;  %v1103_v17 = vmul.f32 %v4458_v0, %v5255_v43 }
 0x287   :  { %v1266_v56 = vmax.f32 %v1216_v61, 0.0  ;;  %v1160_v53 = vmul.f32 %v5311_v32, %v1103_v17 }
 0x288   :  { %v4460_v39 = vpop.eup %4459 }
 0x289   :  { %v1307_v55 = vpack.c.bf16 %v1266_v56, %v1265_v58  ;;  %v1104_v12 = vmul.f32 %v4460_v39, %v7653_v52  ;;  %v1217_v47 = vadd.f32 %v5324_v19, %v1160_v53 }
 0x28b   :  { %v1161_v54 = vmul.f32 %v5311_v32, %v1104_v12  ;;  %v1267_v24 = vmax.f32 %v1217_v47, 0.0 }
 0x28c   :  { %4196 = vmatmul.mubr.bf16.gmra.mxu0 %v1307_v55 }
 0x28d   :  { %4199 = vmatprep.mubr.msk.bf16.mxu0 %vm4756_vm0, %v7652_v46  ;;  %v1218_v40 = vadd.f32 %v5324_v19, %v1161_v54 }
 0x28f   :  { %v1268_v43 = vmax.f32 %v1218_v40, 0.0 }
 0x291   :  { %v1308_v4 = vpack.c.bf16 %v1268_v43, %v1267_v24 }
 0x294   :  { %4200 = vmatmul.mubr.bf16.gmra.mxu0 %v1308_v4 }
 0x2be   :  { %v876_v20 = vpop.xlane.xlu0 %875 }
 0x2bf   :  { %v955_v5 = vmul.f32 0.0078125, %v876_v20 }
 0x2c1   :  { %v1005_v25 = vadd.f32 1e-05, %v955_v5 }
 0x2c2   :  { %v878_v31 = vpop.xlane.xlu1 %877  ;;  %v665_v59 = vpop.xlane.xlu0 %664 }
 0x2c3   :  { %4461 = vrsqrt.f32 %v1005_v25  ;;  %v956_v10 = vmul.f32 0.0078125, %v878_v31  ;;  %v725_v35 = vmul.f32 0.0078125, %v665_v59 }
 0x2c5   :  { %v1006_v14 = vadd.f32 1e-05, %v956_v10  ;;  %v5514_v23 = vsub.f32 %v5282_v11, %v725_v35 }
 0x2c6   :  { %v667_v18 = vpop.xlane.xlu1 %666  ;;  %v880_v1 = vpop.xlane.xlu0 %879 }
 0x2c7   :  { %4463 = vrsqrt.f32 %v1006_v14  ;;  %v726_v28 = vmul.f32 0.0078125, %v667_v18  ;;  %v957_v6 = vmul.f32 0.0078125, %v880_v1  ;;  %v825_v8 = vmul.f32 %v5514_v23, %v5514_v23 }
 0x2c9   :  { %v1007_v15 = vadd.f32 1e-05, %v957_v6  ;;  %915 = vadd.xlane.f32.xlu0 %v825_v8  ;;  %v5519_v44 = vsub.f32 %v5295_v26, %v726_v28  ;;  %v7655_v8 = vld [vmem:[#allocation8_spill] sm:$0xff] }
 0x2ca   :  { %v882_v37 = vpop.xlane.xlu1 %881  ;;  %v669_v29 = vpop.xlane.xlu0 %668 }
 0x2cb   :  { %4465 = vrsqrt.f32 %v1007_v15  ;;  %v958_v13 = vmul.f32 0.0078125, %v882_v37  ;;  %v727_v0 = vmul.f32 0.0078125, %v669_v29  ;;  %v826_v11 = vmul.f32 %v5519_v44, %v5519_v44 }
 0x2cd   :  { %v1008_v61 = vadd.f32 1e-05, %v958_v13  ;;  %917 = vadd.xlane.f32.xlu1 %v826_v11  ;;  %v5524_v17 = vsub.f32 %v5302_v48, %v727_v0 }
 0x2ce   :  { %v671_v58 = vpop.xlane.xlu1 %670  ;;  %v884_v56 = vpop.xlane.xlu0 %883 }
 0x2cf   :  { %4467 = vrsqrt.f32 %v1008_v61  ;;  %v728_v53 = vmul.f32 0.0078125, %v671_v58  ;;  %v959_v39 = vmul.f32 0.0078125, %v884_v56  ;;  %v827_v26 = vmul.f32 %v5524_v17, %v5524_v17 }
 0x2d0   :  { %v4462_v55 = vpop.eup %4461 }
 0x2d1   :  { %v1009_v52 = vadd.f32 1e-05, %v959_v39  ;;  %919 = vadd.xlane.f32.xlu0 %v827_v26  ;;  %v5529_v12 = vsub.f32 %v5328_v27, %v728_v53  ;;  %v1105_v54 = vmul.f32 %v4462_v55, %v5276_v9  ;;  %v7654_v27 = vld [vmem:[#allocation7_spill] sm:$0xff]  ;;  %v7656_v55 = vld [vmem:[#allocation9_spill] sm:$0xff] }
 0x2d2   :  { %v886_v47 = vpop.xlane.xlu1 %885  ;;  %v673_v40 = vpop.xlane.xlu0 %672 }
 0x2d3   :  { %4469 = vrsqrt.f32 %v1009_v52  ;;  %v960_v48 = vmul.f32 0.0078125, %v886_v47  ;;  %v729_v24 = vmul.f32 0.0078125, %v673_v40  ;;  %v828_v43 = vmul.f32 %v5529_v12, %v5529_v12 }
 0x2d4   :  { %v4464_v4 = vpop.eup %4463  ;;  %v1162_v20 = vmul.f32 %v5311_v32, %v1105_v54 }
 0x2d5   :  { %v1010_v5 = vadd.f32 1e-05, %v960_v48  ;;  %921 = vadd.xlane.f32.xlu1 %v828_v43  ;;  %v5536_v25 = vsub.f32 %v5336_v7, %v729_v24  ;;  %v1106_v31 = vmul.f32 %v4464_v4, %v7654_v27 }
 0x2d6   :  { %v675_v59 = vpop.xlane.xlu1 %674  ;;  %v888_v9 = vpop.xlane.xlu0 %887  ;;  %v1219_v28 = vadd.f32 %v5324_v19, %v1162_v20 }
 0x2d7   :  { %4471 = vrsqrt.f32 %v1010_v5  ;;  %v730_v10 = vmul.f32 0.0078125, %v675_v59  ;;  %v961_v35 = vmul.f32 0.0078125, %v888_v9  ;;  %v829_v14 = vmul.f32 %v5536_v25, %v5536_v25 }
 0x2d8   :  { %v4466_v18 = vpop.eup %4465  ;;  %v1163_v1 = vmul.f32 %v5311_v32, %v1106_v31  ;;  %v1269_v56 = vmax.f32 %v1219_v28, 0.0  ;;  %v7657_v31 = vld [vmem:[#allocation10_spill] sm:$0xff] }
 0x2d9   :  { %v1011_v6 = vadd.f32 1e-05, %v961_v35  ;;  %923 = vadd.xlane.f32.xlu0 %v829_v14  ;;  %v5544_v7 = vsub.f32 %v5354_v51, %v730_v10  ;;  %v1107_v15 = vmul.f32 %v4466_v18, %v7655_v8 }
 0x2da   :  { %v890_v37 = vpop.xlane.xlu1 %889  ;;  %v677_v29 = vpop.xlane.xlu0 %676  ;;  %v1220_v13 = vadd.f32 %v5324_v19, %v1163_v1 }
 0x2db   :  { %4473 = vrsqrt.f32 %v1011_v6  ;;  %v962_v0 = vmul.f32 0.0078125, %v890_v37  ;;  %v731_v11 = vmul.f32 0.0078125, %v677_v29  ;;  %v830_v61 = vmul.f32 %v5544_v7, %v5544_v7 }
 0x2dc   :  { %v4468_v58 = vpop.eup %4467  ;;  %v1270_v53 = vmax.f32 %v1220_v13, 0.0  ;;  %v1164_v39 = vmul.f32 %v5311_v32, %v1107_v15 }
 0x2dd   :  { %v1012_v26 = vadd.f32 1e-05, %v962_v0  ;;  %925 = vadd.xlane.f32.xlu1 %v830_v61  ;;  %v5552_v51 = vsub.f32 %v5362_v49, %v731_v11  ;;  %v1108_v52 = vmul.f32 %v4468_v58, %v7656_v55 }
 0x2de   :  { %v679_v54 = vpop.xlane.xlu1 %678  ;;  %v892_v47 = vpop.xlane.xlu0 %891  ;;  %v1309_v40 = vpack.c.bf16 %v1270_v53, %v1269_v56  ;;  %v1221_v5 = vadd.f32 %v5324_v19, %v1164_v39 }
 0x2df   :  { %4475 = vrsqrt.f32 %v1012_v26  ;;  %v732_v48 = vmul.f32 0.0078125, %v679_v54  ;;  %v963_v24 = vmul.f32 0.0078125, %v892_v47  ;;  %v831_v43 = vmul.f32 %v5552_v51, %v5552_v51 }
 0x2e0   :  { %v4470_v4 = vpop.eup %4469  ;;  %4204 = vmatmul.mubr.bf16.vlgmr.msra.gmra.mxu1 %v1309_v40  ;;  %v1165_v20 = vmul.f32 %v5311_v32, %v1108_v52  ;;  %v1271_v6 = vmax.f32 %v1221_v5, 0.0 }
 0x2e1   :  { %v1013_v27 = vadd.f32 1e-05, %v963_v24  ;;  %927 = vadd.xlane.f32.xlu0 %v831_v43  ;;  %v5560_v49 = vsub.f32 %v5382_v38, %v732_v48  ;;  %4207 = vmatprep.mubr.msk.bf16.mxu1 %vm4756_vm0, %v7652_v46  ;;  %v1109_v59 = vmul.f32 %v4470_v4, %v7657_v31 }
 0x2e2   :  { %v894_v9 = vpop.xlane.xlu1 %893  ;;  %v681_v10 = vpop.xlane.xlu0 %680  ;;  %v1222_v35 = vadd.f32 %v5324_v19, %v1165_v20 }
 0x2e3   :  { %4477 = vrsqrt.f32 %v1013_v27  ;;  %v964_v14 = vmul.f32 0.0078125, %v894_v9  ;;  %v733_v18 = vmul.f32 0.0078125, %v681_v10  ;;  %v832_v1 = vmul.f32 %v5560_v49, %v5560_v49 }
 0x2e4   :  { %v4472_v28 = vpop.eup %4471  ;;  %v1272_v8 = vmax.f32 %v1222_v35, 0.0  ;;  %v1166_v38 = vmul.f32 %v5311_v32, %v1109_v59 }
 0x2e5   :  { %v1014_v15 = vadd.f32 1e-05, %v964_v14  ;;  %v5570_v37 = vsub.f32 %v5390_v36, %v733_v18  ;;  %929 = vadd.xlane.f32.xlu1 %v832_v1  ;;  %v1110_v29 = vmul.f32 %v4472_v28, %v5340_v22 }
 0x2e6   :  { %v683_v13 = vpop.xlane.xlu1 %682  ;;  %v896_v0 = vpop.xlane.xlu0 %895  ;;  %v1310_v11 = vpack.c.bf16 %v1272_v8, %v1271_v6  ;;  %v1223_v26 = vadd.f32 %v5324_v19, %v1166_v38 }
 0x2e7   :  { %4479 = vrsqrt.f32 %v1014_v15  ;;  %v734_v61 = vmul.f32 0.0078125, %v683_v13  ;;  %v965_v58 = vmul.f32 0.0078125, %v896_v0  ;;  %v833_v56 = vmul.f32 %v5570_v37, %v5570_v37 }
 0x2e8   :  { %v4474_v53 = vpop.eup %4473  ;;  %4208 = vmatmul.mubr.bf16.gmra.mxu1 %v1310_v11  ;;  %v1167_v39 = vmul.f32 %v5311_v32, %v1110_v29 }
 0x2e9   :  { %v5578_v36 = vsub.f32 %v5410_v3, %v734_v61  ;;  %v1015_v55 = vadd.f32 1e-05, %v965_v58  ;;  %931 = vadd.xlane.f32.xlu0 %v833_v56  ;;  %4211 = vmatprep.mubr.msk.bf16.mxu1 %vm4756_vm0, %v7652_v46  ;;  %v1111_v22 = vmul.f32 %v4474_v53, %v5349_v63  ;;  %v1273_v3 = vmax.f32 %v1223_v26, 0.0 }
 0x2ea   :  { %v898_v52 = vpop.xlane.xlu1 %897  ;;  %v1224_v54 = vadd.f32 %v5324_v19, %v1167_v39 }
 0x2eb   :  { %4481 = vrsqrt.f32 %v1015_v55  ;;  %v966_v47 = vmul.f32 0.0078125, %v898_v52  ;;  %v834_v40 = vmul.f32 %v5578_v36, %v5578_v36  ;;  %v1168_v48 = vmul.f32 %v5311_v32, %v1111_v22 }
 0x2ec   :  { %v4476_v24 = vpop.eup %4475  ;;  %v1274_v43 = vmax.f32 %v1224_v54, 0.0 }
 0x2ed   :  { %v1016_v4 = vadd.f32 1e-05, %v966_v47  ;;  %933 = vadd.xlane.f32.xlu1 %v834_v40  ;;  %v1112_v20 = vmul.f32 %v4476_v24, %v5366_v30  ;;  %v1225_v63 = vadd.f32 %v5324_v19, %v1168_v48 }
 0x2ee   :  { %v900_v5 = vpop.xlane.xlu0 %899  ;;  %v1311_v27 = vpack.c.bf16 %v1274_v43, %v1273_v3 }
 0x2ef   :  { %4483 = vrsqrt.f32 %v1016_v4  ;;  %v967_v31 = vmul.f32 0.0078125, %v900_v5  ;;  %v1169_v59 = vmul.f32 %v5311_v32, %v1112_v20  ;;  %v1275_v30 = vmax.f32 %v1225_v63, 0.0 }
 0x2f0   :  { %v4478_v9 = vpop.eup %4477  ;;  %4212 = vmatmul.mubr.bf16.gmra.mxu1 %v1311_v27 }
 0x2f1   :  { %v1017_v10 = vadd.f32 1e-05, %v967_v31  ;;  %4215 = vmatprep.mubr.msk.bf16.mxu1 %vm4756_vm0, %v7652_v46  ;;  %v1226_v35 = vadd.f32 %v5324_v19, %v1169_v59  ;;  %v1113_v14 = vmul.f32 %v4478_v9, %v5377_v50 }
 0x2f2   :  { %v902_v18 = vpop.xlane.xlu1 %901 }
 0x2f3   :  { %4485 = vrsqrt.f32 %v1017_v10  ;;  %v968_v1 = vmul.f32 0.0078125, %v902_v18  ;;  %v1276_v28 = vmax.f32 %v1226_v35, 0.0  ;;  %v1170_v6 = vmul.f32 %v5311_v32, %v1113_v14 }
 0x2f4   :  { %v4480_v8 = vpop.eup %4479 }
 0x2f5   :  { %v1018_v38 = vadd.f32 1e-05, %v968_v1  ;;  %v1312_v15 = vpack.c.bf16 %v1276_v28, %v1275_v30  ;;  %v1114_v29 = vmul.f32 %v4480_v8, %v5394_v42  ;;  %v1227_v0 = vadd.f32 %v5324_v19, %v1170_v6 }
 0x2f6   :  { %v904_v13 = vpop.xlane.xlu0 %903 }
 0x2f7   :  { %4487 = vrsqrt.f32 %v1018_v38  ;;  %v969_v11 = vmul.f32 0.0078125, %v904_v13  ;;  %v1171_v61 = vmul.f32 %v5311_v32, %v1114_v29  ;;  %v1277_v26 = vmax.f32 %v1227_v0, 0.0 }
 0x2f8   :  { %v4482_v50 = vpop.eup %4481  ;;  %4216 = vmatmul.mubr.bf16.gmra.mxu1 %v1312_v15 }
 0x2f9   :  { %v1019_v58 = vadd.f32 1e-05, %v969_v11  ;;  %4219 = vmatprep.mubr.msk.bf16.mxu1 %vm4756_vm0, %v7652_v46  ;;  %v1228_v56 = vadd.f32 %v5324_v19, %v1171_v61  ;;  %v1115_v53 = vmul.f32 %v4482_v50, %v5405_v57 }
 0x2fa   :  { %v906_v39 = vpop.xlane.xlu1 %905 }
 0x2fb   :  { %4489 = vrsqrt.f32 %v1019_v58  ;;  %v970_v42 = vmul.f32 0.0078125, %v906_v39  ;;  %v1278_v55 = vmax.f32 %v1228_v56, 0.0  ;;  %v1172_v22 = vmul.f32 %v5311_v32, %v1115_v53 }
 0x2fc   :  { %v4484_v52 = vpop.eup %4483 }
 0x2fd   :  { %v1020_v54 = vadd.f32 1e-05, %v970_v42  ;;  %v1313_v47 = vpack.c.bf16 %v1278_v55, %v1277_v26  ;;  %v1116_v40 = vmul.f32 %v4484_v52, %v5418_v41  ;;  %v1229_v24 = vadd.f32 %v5324_v19, %v1172_v22  ;;  %v5633_v42 = vld [vmem:[%s7616_s3] ss:$0 sm:$0xff] }
 0x2fe   :  { %v908_v48 = vpop.xlane.xlu0 %907 }
 0x2ff   :  { %4491 = vrsqrt.f32 %v1020_v54  ;;  %v971_v3 = vmul.f32 0.0078125, %v908_v48  ;;  %v1173_v43 = vmul.f32 %v5311_v32, %v1116_v40  ;;  %v1279_v63 = vmax.f32 %v1229_v24, 0.0 }
 0x300   :  { %v4486_v57 = vpop.eup %4485  ;;  %4220 = vmatmul.mubr.bf16.gmra.mxu1 %v1313_v47 }
 0x301   :  { %v1021_v4 = vadd.f32 1e-05, %v971_v3  ;;  %4223 = vmatprep.mubr.msk.bf16.mxu1 %vm4756_vm0, %v7652_v46  ;;  %v1230_v20 = vadd.f32 %v5324_v19, %v1173_v43  ;;  %v1117_v5 = vmul.f32 %v4486_v57, %v5428_v2 }
 0x302   :  { %v910_v27 = vpop.xlane.xlu1 %909 }
 0x303   :  { %4493 = vrsqrt.f32 %v1021_v4  ;;  %v972_v41 = vmul.f32 0.0078125, %v910_v27  ;;  %v1280_v31 = vmax.f32 %v1230_v20, 0.0  ;;  %v1174_v59 = vmul.f32 %v5311_v32, %v1117_v5 }
 0x304   :  { %v4488_v9 = vpop.eup %4487 }
 0x305   :  { %v1022_v10 = vadd.f32 1e-05, %v972_v41  ;;  %v1314_v35 = vpack.c.bf16 %v1280_v31, %v1279_v63  ;;  %v1118_v14 = vmul.f32 %v4488_v9, %v5436_v60  ;;  %v1231_v30 = vadd.f32 %v5324_v19, %v1174_v59  ;;  %v5621_v60 = vld [vmem:[%s7619_s6] ss:$0 sm:$0xff] }
 0x306   :  { %v912_v18 = vpop.xlane.xlu0 %911  ;;  %v5657_v41 = vld [vmem:[%s7617_s4] ss:$0 sm:$0xff] }
 0x307   :  { %4495 = vrsqrt.f32 %v1022_v10  ;;  %v973_v1 = vmul.f32 0.0078125, %v912_v18  ;;  %v1175_v28 = vmul.f32 %v5311_v32, %v1118_v14  ;;  %v1281_v29 = vmax.f32 %v1231_v30, 0.0 }
 0x308   :  { %v4490_v2 = vpop.eup %4489  ;;  %4224 = vmatmul.mubr.bf16.gmra.mxu1 %v1314_v35 }
 0x309   :  { %v1023_v6 = vadd.f32 1e-05, %v973_v1  ;;  %4227 = vmatprep.mubr.msk.bf16.mxu1 %vm4756_vm0, %v7652_v46  ;;  %v1232_v8 = vadd.f32 %v5324_v19, %v1175_v28  ;;  %v1119_v38 = vmul.f32 %v4490_v2, %v5446_v34 }
 0x30a   :  { %v914_v15 = vpop.xlane.xlu1 %913 }
 0x30b   :  { %4497 = vrsqrt.f32 %v1023_v6  ;;  %v974_v13 = vmul.f32 0.0078125, %v914_v15  ;;  %v1282_v0 = vmax.f32 %v1232_v8, 0.0  ;;  %v1176_v11 = vmul.f32 %v5311_v32, %v1119_v38 }
 0x30c   :  { %v4492_v61 = vpop.eup %4491  ;;  %v1429_v50 = vpop.f32.mrf.mxu0 }
 0x30d   :  { %v1024_v58 = vadd.f32 1e-05, %v974_v13  ;;  %v5625_v56 = vadd.f32 %v5621_v60, %v1429_v50  ;;  %v1315_v34 = vpack.c.bf16 %v1282_v0, %v1281_v29  ;;  %v1120_v53 = vmul.f32 %v4492_v61, %v5454_v45 }
 0x30e   :  { %v4165_v39 = vpop.f32.mrf.mxu0  ;;  %v1233_v55 = vadd.f32 %v5324_v19, %v1176_v11 }
 0x30f   :  { %4499 = vrsqrt.f32 %v1024_v58  ;;  %v1629_v26 = vsel %vm1628_vm1, %v5625_v56, 0.0  ;;  %v1177_v32 = vmul.f32 %v5633_v42, %v1120_v53 }
 0x310   :  { %v4494_v22 = vpop.eup %4493  ;;  %v1432_v52 = vpop.f32.mrf.mxu0  ;;  %1630 = vadd.xlane.f32.xlu0 %v1629_v26  ;;  %4228 = vmatmul.mubr.bf16.gmra.mxu1 %v1315_v34  ;;  %v1283_v24 = vmax.f32 %v1233_v55, 0.0 }
 0x311   :  { %v5638_v45 = vadd.f32 %v5621_v60, %v1432_v52  ;;  %4231 = vmatprep.mubr.msk.bf16.mxu1 %vm4756_vm0, %v7652_v46  ;;  %v1234_v54 = vadd.f32 %v5324_v19, %v1177_v32  ;;  %v1121_v47 = vmul.f32 %v4494_v22, %v5464_v16 }
 0x312   :  { %v4166_v40 = vpop.f32.mrf.mxu0 }
 0x313   :  { %v1632_v48 = vsel %vm1628_vm1, %v5638_v45, 0.0  ;;  %v1284_v3 = vmax.f32 %v1234_v54, 0.0  ;;  %v1178_v43 = vmul.f32 %v5633_v42, %v1121_v47 }
 0x314   :  { %v4496_v57 = vpop.eup %4495  ;;  %1633 = vadd.xlane.f32.xlu1 %v1632_v48  ;;  %v1437_v4 = vpop.f32.mrf.mxu0 }
 0x315   :  { %v5648_v20 = vadd.f32 %v5621_v60, %v1437_v4  ;;  %v1316_v5 = vpack.c.bf16 %v1284_v3, %v1283_v24  ;;  %v1122_v27 = vmul.f32 %v4496_v57, %v5472_v21  ;;  %v1235_v31 = vadd.f32 %v5657_v41, %v1178_v43 }
 0x316   :  { %v4169_v19 = vpop.f32.mrf.mxu0 }
 0x317   :  { %v1635_v16 = vsel %vm1628_vm1, %v5648_v20, 0.0  ;;  %v1179_v63 = vmul.f32 %v5633_v42, %v1122_v27  ;;  %v1285_v30 = vmax.f32 %v1235_v31, 0.0 }
 0x318   :  { %v4498_v59 = vpop.eup %4497  ;;  %v1440_v9 = vpop.f32.mrf.mxu0  ;;  %1636 = vadd.xlane.f32.xlu0 %v1635_v16  ;;  %4232 = vmatmul.mubr.bf16.gmra.mxu1 %v1316_v5 }
 0x319   :  { %v5661_v10 = vadd.f32 %v5621_v60, %v1440_v9  ;;  %4235 = vmatprep.mubr.msk.bf16.mxu1 %vm4756_vm0, %v7652_v46  ;;  %v1236_v21 = vadd.f32 %v5657_v41, %v1179_v63  ;;  %v1123_v35 = vmul.f32 %v4498_v59, %v5482_v62 }
 0x31a   :  { %v4170_v14 = vpop.f32.mrf.mxu0 }
 0x31b   :  { %v1638_v18 = vsel %vm1628_vm1, %v5661_v10, 0.0  ;;  %v1286_v1 = vmax.f32 %v1236_v21, 0.0  ;;  %v1180_v28 = vmul.f32 %v5633_v42, %v1123_v35 }
 0x31c   :  { %v4500_v2 = vpop.eup %4499  ;;  %1639 = vadd.xlane.f32.xlu1 %v1638_v18  ;;  %v1445_v6 = vpop.f32.mrf.mxu0 }
 0x31d   :  { %v5671_v8 = vadd.f32 %v5621_v60, %v1445_v6  ;;  %v1317_v38 = vpack.c.bf16 %v1286_v1, %v1285_v30  ;;  %v1124_v15 = vmul.f32 %v4500_v2, %v5490_v33  ;;  %v1237_v0 = vadd.f32 %v5657_v41, %v1180_v28 }
 0x31e   :  { %v4173_v29 = vpop.f32.mrf.mxu0 }
 0x31f   :  { %v1641_v62 = vsel %vm1628_vm1, %v5671_v8, 0.0  ;;  %v1181_v13 = vmul.f32 %v5633_v42, %v1124_v15  ;;  %v1287_v34 = vmax.f32 %v1237_v0, 0.0 }
 0x320   :  { %v1448_v11 = vpop.f32.mrf.mxu0  ;;  %1642 = vadd.xlane.f32.xlu0 %v1641_v62  ;;  %4236 = vmatmul.mubr.bf16.gmra.mxu1 %v1317_v38 }
 0x321   :  { %v5679_v61 = vadd.f32 %v5621_v60, %v1448_v11  ;;  %4239 = vmatprep.mubr.msk.bf16.mxu1 %vm4756_vm0, %v7652_v46  ;;  %v1238_v50 = vadd.f32 %v5657_v41, %v1181_v13 }
 0x322   :  { %v4174_v33 = vpop.f32.mrf.mxu0 }
 0x323   :  { %v1644_v58 = vsel %vm1628_vm1, %v5679_v61, 0.0  ;;  %v1288_v53 = vmax.f32 %v1238_v50, 0.0 }
 0x324   :  { %1645 = vadd.xlane.f32.xlu1 %v1644_v58  ;;  %v1453_v39 = vpop.f32.mrf.mxu0 }
 0x325   :  { %v5687_v26 = vadd.f32 %v5621_v60, %v1453_v39  ;;  %v1318_v32 = vpack.c.bf16 %v1288_v53, %v1287_v34 }
 0x326   :  { %v4177_v55 = vpop.f32.mrf.mxu0 }
 0x327   :  { %v1647_v22 = vsel %vm1628_vm1, %v5687_v26, 0.0 }
 0x328   :  { %v1456_v52 = vpop.f32.mrf.mxu0  ;;  %1648 = vadd.xlane.f32.xlu0 %v1647_v22  ;;  %4240 = vmatmul.mubr.bf16.gmra.mxu1 %v1318_v32 }
 0x329   :  { %v5692_v54 = vadd.f32 %v5621_v60, %v1456_v52  ;;  %4243 = vmatprep.mubr.msk.bf16.mxu1 %vm4756_vm0, %v7652_v46 }
 0x32a   :  { %v4178_v47 = vpop.f32.mrf.mxu0 }
 0x32b   :  { %v1650_v40 = vsel %vm1628_vm1, %v5692_v54, 0.0 }
 0x32c   :  { %1651 = vadd.xlane.f32.xlu1 %v1650_v40  ;;  %v1461_v48 = vpop.f32.mrf.mxu0 }
 0x32d   :  { %v5699_v24 = vadd.f32 %v5621_v60, %v1461_v48 }
 0x32e   :  { %v4181_v3 = vpop.f32.mrf.mxu0 }
 0x32f   :  { %v1653_v43 = vsel %vm1628_vm1, %v5699_v24, 0.0 }
 0x330   :  { %v1464_v57 = vpop.f32.mrf.mxu0  ;;  %1654 = vadd.xlane.f32.xlu0 %v1653_v43 }
 0x331   :  { %v5704_v4 = vadd.f32 %v5621_v60, %v1464_v57 }
 0x332   :  { %v4182_v5 = vpop.f32.mrf.mxu0 }
 0x333   :  { %v1656_v27 = vsel %vm1628_vm1, %v5704_v4, 0.0 }
 0x334   :  { %1657 = vadd.xlane.f32.xlu1 %v1656_v27  ;;  %v1469_v19 = vpop.f32.mrf.mxu0 }
 0x335   :  { %v5709_v16 = vadd.f32 %v5621_v60, %v1469_v19 }
 0x336   :  { %v4185_v63 = vpop.f32.mrf.mxu0 }
 0x337   :  { %v1659_v31 = vsel %vm1628_vm1, %v5709_v16, 0.0 }
 0x338   :  { %v1472_v59 = vpop.f32.mrf.mxu0  ;;  %1660 = vadd.xlane.f32.xlu0 %v1659_v31 }
 0x339   :  { %v5714_v9 = vadd.f32 %v5621_v60, %v1472_v59 }
 0x33a   :  { %v4186_v21 = vpop.f32.mrf.mxu0 }
 0x33b   :  { %v1662_v35 = vsel %vm1628_vm1, %v5714_v9, 0.0 }
 0x33c   :  { %1663 = vadd.xlane.f32.xlu1 %v1662_v35  ;;  %v1477_v14 = vpop.f32.mrf.mxu0 }
 0x33d   :  { %v5719_v18 = vadd.f32 %v5621_v60, %v1477_v14 }
 0x33e   :  { %v4189_v30 = vpop.f32.mrf.mxu0 }
 0x33f   :  { %v1665_v1 = vsel %vm1628_vm1, %v5719_v18, 0.0 }
 0x340   :  { %v1480_v28 = vpop.f32.mrf.mxu0  ;;  %1666 = vadd.xlane.f32.xlu0 %v1665_v1 }
 0x341   :  { %v5724_v2 = vadd.f32 %v5621_v60, %v1480_v28 }
 0x342   :  { %v4190_v6 = vpop.f32.mrf.mxu0 }
 0x343   :  { %v1668_v38 = vsel %vm1628_vm1, %v5724_v2, 0.0 }
 0x344   :  { %1669 = vadd.xlane.f32.xlu1 %v1668_v38  ;;  %v1485_v15 = vpop.f32.mrf.mxu0 }
 0x345   :  { %v5729_v29 = vadd.f32 %v5621_v60, %v1485_v15 }
 0x346   :  { %v4193_v62 = vpop.f32.mrf.mxu0 }
 0x347   :  { %v1671_v13 = vsel %vm1628_vm1, %v5729_v29, 0.0 }
 0x348   :  { %v1488_v0 = vpop.f32.mrf.mxu0  ;;  %1672 = vadd.xlane.f32.xlu0 %v1671_v13 }
 0x349   :  { %v5734_v11 = vadd.f32 %v5621_v60, %v1488_v0 }
 0x34a   :  { %v4194_v50 = vpop.f32.mrf.mxu0 }
 0x34b   :  { %v1674_v33 = vsel %vm1628_vm1, %v5734_v11, 0.0 }
 0x34c   :  { %1675 = vadd.xlane.f32.xlu1 %v1674_v33  ;;  %v1493_v58 = vpop.f32.mrf.mxu0 }
 0x34d   :  { %v5739_v34 = vadd.f32 %v5621_v60, %v1493_v58 }
 0x34e   :  { %v4197_v53 = vpop.f32.mrf.mxu0 }
 0x34f   :  { %v1677_v39 = vsel %vm1628_vm1, %v5739_v34, 0.0 }
 0x350   :  { %v1496_v32 = vpop.f32.mrf.mxu0  ;;  %1678 = vadd.xlane.f32.xlu0 %v1677_v39 }
 0x351   :  { %v5744_v55 = vadd.f32 %v5621_v60, %v1496_v32 }
 0x352   :  { %v4198_v22 = vpop.f32.mrf.mxu0  ;;  %v916_v52 = vpop.xlane.xlu0 %915 }
 0x353   :  { %v975_v47 = vmul.f32 0.0078125, %v916_v52  ;;  %v1680_v40 = vsel %vm1628_vm1, %v5744_v55, 0.0 }
 0x354   :  { %1681 = vadd.xlane.f32.xlu1 %v1680_v40  ;;  %v1501_v48 = vpop.f32.mrf.mxu0 }
 0x355   :  { %v1025_v3 = vadd.f32 1e-05, %v975_v47  ;;  %v5749_v43 = vadd.f32 %v5621_v60, %v1501_v48 }
 0x356   :  { %v4201_v57 = vpop.f32.mrf.mxu0  ;;  %v918_v5 = vpop.xlane.xlu1 %917 }
 0x357   :  { %4501 = vrsqrt.f32 %v1025_v3  ;;  %v976_v27 = vmul.f32 0.0078125, %v918_v5  ;;  %v1683_v19 = vsel %vm1628_vm1, %v5749_v43, 0.0 }
 0x358   :  { %v1504_v63 = vpop.f32.mrf.mxu0  ;;  %1684 = vadd.xlane.f32.xlu0 %v1683_v19 }
 0x359   :  { %v1026_v31 = vadd.f32 1e-05, %v976_v27  ;;  %v5754_v59 = vadd.f32 %v5621_v60, %v1504_v63 }
 0x35a   :  { %v4202_v21 = vpop.f32.mrf.mxu0  ;;  %v920_v35 = vpop.xlane.xlu0 %919 }
 0x35b   :  { %4503 = vrsqrt.f32 %v1026_v31  ;;  %v977_v14 = vmul.f32 0.0078125, %v920_v35  ;;  %v1686_v30 = vsel %vm1628_vm1, %v5754_v59, 0.0 }
 0x35c   :  { %1687 = vadd.xlane.f32.xlu1 %v1686_v30 }
 0x35d   :  { %v1027_v1 = vadd.f32 1e-05, %v977_v14 }
 0x35e   :  { %v922_v28 = vpop.xlane.xlu1 %921 }
 0x35f   :  { %4505 = vrsqrt.f32 %v1027_v1  ;;  %v978_v6 = vmul.f32 0.0078125, %v922_v28 }
 0x361   :  { %v1028_v38 = vadd.f32 1e-05, %v978_v6 }
 0x362   :  { %v924_v15 = vpop.xlane.xlu0 %923 }
 0x363   :  { %4507 = vrsqrt.f32 %v1028_v38  ;;  %v979_v62 = vmul.f32 0.0078125, %v924_v15 }
 0x364   :  { %v4502_v13 = vpop.eup %4501 }
 0x365   :  { %v1029_v0 = vadd.f32 1e-05, %v979_v62  ;;  %v1125_v50 = vmul.f32 %v4502_v13, %v5514_v23 }
 0x366   :  { %v926_v33 = vpop.xlane.xlu1 %925 }
 0x367   :  { %4509 = vrsqrt.f32 %v1029_v0  ;;  %v980_v58 = vmul.f32 0.0078125, %v926_v33  ;;  %v1182_v53 = vmul.f32 %v5633_v42, %v1125_v50 }
 0x368   :  { %v4504_v39 = vpop.eup %4503 }
 0x369   :  { %v1030_v32 = vadd.f32 1e-05, %v980_v58  ;;  %v1126_v22 = vmul.f32 %v4504_v39, %v5519_v44  ;;  %v1239_v47 = vadd.f32 %v5657_v41, %v1182_v53 }
 0x36a   :  { %v928_v52 = vpop.xlane.xlu0 %927 }
 0x36b   :  { %4511 = vrsqrt.f32 %v1030_v32  ;;  %v981_v40 = vmul.f32 0.0078125, %v928_v52  ;;  %v1183_v48 = vmul.f32 %v5633_v42, %v1126_v22  ;;  %v1289_v19 = vmax.f32 %v1239_v47, 0.0 }
 0x36c   :  { %v4506_v3 = vpop.eup %4505 }
 0x36d   :  { %v1031_v57 = vadd.f32 1e-05, %v981_v40  ;;  %v1240_v23 = vadd.f32 %v5657_v41, %v1183_v48  ;;  %v1127_v5 = vmul.f32 %v4506_v3, %v5524_v17 }
 0x36e   :  { %v930_v27 = vpop.xlane.xlu1 %929 }
 0x36f   :  { %4513 = vrsqrt.f32 %v1031_v57  ;;  %v982_v63 = vmul.f32 0.0078125, %v930_v27  ;;  %v1290_v31 = vmax.f32 %v1240_v23, 0.0  ;;  %v1184_v44 = vmul.f32 %v5633_v42, %v1127_v5 }
 0x370   :  { %v4508_v21 = vpop.eup %4507 }
 0x371   :  { %v1032_v35 = vadd.f32 1e-05, %v982_v63  ;;  %v1319_v14 = vpack.c.bf16 %v1290_v31, %v1289_v19  ;;  %v1128_v30 = vmul.f32 %v4508_v21, %v5529_v12  ;;  %v1241_v28 = vadd.f32 %v5657_v41, %v1184_v44 }
 0x372   :  { %v932_v1 = vpop.xlane.xlu0 %931 }
 0x373   :  { %4515 = vrsqrt.f32 %v1032_v35  ;;  %v983_v6 = vmul.f32 0.0078125, %v932_v1  ;;  %4244 = vmatmul.mubr.bf16.gmra.mxu1 %v1319_v14  ;;  %v1185_v17 = vmul.f32 %v5633_v42, %v1128_v30  ;;  %v1291_v50 = vmax.f32 %v1241_v28, 0.0 }
 0x374   :  { %v4510_v38 = vpop.eup %4509  ;;  %4247 = vmatprep.mubr.msk.bf16.mxu1 %vm4756_vm0, %v7652_v46 }
 0x375   :  { %v1033_v15 = vadd.f32 1e-05, %v983_v6  ;;  %v1242_v62 = vadd.f32 %v5657_v41, %v1185_v17  ;;  %v1129_v13 = vmul.f32 %v4510_v38, %v5536_v25 }
 0x376   :  { %v934_v0 = vpop.xlane.xlu1 %933 }
 0x377   :  { %4517 = vrsqrt.f32 %v1033_v15  ;;  %v984_v12 = vmul.f32 0.0078125, %v934_v0  ;;  %v1292_v33 = vmax.f32 %v1242_v62, 0.0  ;;  %v1186_v58 = vmul.f32 %v5633_v42, %v1129_v13 }
 0x378   :  { %v4512_v53 = vpop.eup %4511 }
 0x379   :  { %v1034_v39 = vadd.f32 1e-05, %v984_v12  ;;  %v1320_v32 = vpack.c.bf16 %v1292_v33, %v1291_v50  ;;  %v1130_v22 = vmul.f32 %v4512_v53, %v5544_v7  ;;  %v1243_v47 = vadd.f32 %v5657_v41, %v1186_v58 }
 0x37b   :  { %4519 = vrsqrt.f32 %v1034_v39  ;;  %4248 = vmatmul.mubr.bf16.gmra.mxu1 %v1320_v32  ;;  %v1187_v52 = vmul.f32 %v5633_v42, %v1130_v22  ;;  %v1293_v3 = vmax.f32 %v1243_v47, 0.0 }
 0x37c   :  { %v4514_v40 = vpop.eup %4513  ;;  %4251 = vmatprep.mubr.msk.bf16.mxu1 %vm4756_vm0, %v7652_v46 }
 0x37d   :  { %v1244_v25 = vadd.f32 %v5657_v41, %v1187_v52  ;;  %v1131_v48 = vmul.f32 %v4514_v40, %v5552_v51 }
 0x37f   :  { %v1294_v57 = vmax.f32 %v1244_v25, 0.0  ;;  %v1188_v23 = vmul.f32 %v5633_v42, %v1131_v48 }
 0x380   :  { %v4516_v5 = vpop.eup %4515 }
 0x381   :  { %v1321_v7 = vpack.c.bf16 %v1294_v57, %v1293_v3  ;;  %v1132_v27 = vmul.f32 %v4516_v5, %v5560_v49  ;;  %v1245_v63 = vadd.f32 %v5657_v41, %v1188_v23 }
 0x383   :  { %4252 = vmatmul.mubr.bf16.gmra.mxu1 %v1321_v7  ;;  %v1189_v19 = vmul.f32 %v5633_v42, %v1132_v27  ;;  %v1295_v21 = vmax.f32 %v1245_v63, 0.0 }
 0x384   :  { %v4518_v31 = vpop.eup %4517  ;;  %4255 = vmatprep.mubr.msk.bf16.mxu1 %vm4756_vm0, %v7652_v46 }
 0x385   :  { %v1246_v44 = vadd.f32 %v5657_v41, %v1189_v19  ;;  %v1133_v51 = vmul.f32 %v4518_v31, %v5570_v37 }
 0x387   :  { %v1296_v35 = vmax.f32 %v1246_v44, 0.0  ;;  %v1190_v14 = vmul.f32 %v5633_v42, %v1133_v51 }
 0x388   :  { %v4520_v30 = vpop.eup %4519 }
 0x389   :  { %v1322_v1 = vpack.c.bf16 %v1296_v35, %v1295_v21  ;;  %v1134_v49 = vmul.f32 %v4520_v30, %v5578_v36  ;;  %v1247_v6 = vadd.f32 %v5657_v41, %v1190_v14 }
 0x38b   :  { %4256 = vmatmul.mubr.bf16.gmra.mxu1 %v1322_v1  ;;  %v1191_v28 = vmul.f32 %v5633_v42, %v1134_v49  ;;  %v1297_v38 = vmax.f32 %v1247_v6, 0.0 }
 0x38c   :  { %4259 = vmatprep.mubr.msk.bf16.mxu1 %vm4756_vm0, %v7652_v46 }
 0x38d   :  { %v1248_v17 = vadd.f32 %v5657_v41, %v1191_v28 }
 0x38f   :  { %v1298_v37 = vmax.f32 %v1248_v17, 0.0 }
 0x391   :  { %v1323_v15 = vpack.c.bf16 %v1298_v37, %v1297_v38 }
 0x393   :  { %4260 = vmatmul.mubr.bf16.gmra.mxu1 %v1323_v15 }
 0x394   :  { %4271 = vmatprep.mubr.msk.bf16.mxu1 %vm4756_vm0, %v7652_v46 }
 0x399   :  { %v1631_v62 = vpop.xlane.xlu0 %1630 }
 0x39a   :  { %v1780_v13 = vmul.f32 0.015625, %v1631_v62 }
 0x39c   :  { %v5799_v36 = vsub.f32 %v5625_v56, %v1780_v13 }
 0x39d   :  { %v1634_v42 = vpop.xlane.xlu1 %1633 }
 0x39e   :  { %v1781_v0 = vmul.f32 0.015625, %v1634_v42  ;;  %v1880_v50 = vmul.f32 %v5799_v36, %v5799_v36 }
 0x3a0   :  { %v5804_v12 = vsub.f32 %v5638_v45, %v1781_v0  ;;  %v1509_v41 = vpop.f32.mrf.mxu1  ;;  %v1930_v33 = vsel %vm1628_vm1, %v1880_v50, 0.0 }
 0x3a1   :  { %v5808_v58 = vadd.f32 %v5621_v60, %v1509_v41  ;;  %1931 = vadd.xlane.f32.xlu0 %v1930_v33  ;;  %v1637_v53 = vpop.xlane.xlu0 %1636 }
 0x3a2   :  { %v1782_v39 = vmul.f32 0.015625, %v1637_v53  ;;  %v4205_v32 = vpop.f32.mrf.mxu1  ;;  %v1881_v56 = vmul.f32 %v5804_v12, %v5804_v12 }
 0x3a3   :  { %v1689_v22 = vsel %vm1628_vm1, %v5808_v58, 0.0 }
 0x3a4   :  { %v5815_v52 = vsub.f32 %v5648_v20, %v1782_v39  ;;  %v1512_v45 = vpop.f32.mrf.mxu1  ;;  %v1933_v47 = vsel %vm1628_vm1, %v1881_v56, 0.0 }
 0x3a5   :  { %v5819_v40 = vadd.f32 %v5621_v60, %v1512_v45  ;;  %v1640_v25 = vpop.xlane.xlu1 %1639  ;;  %1934 = vadd.xlane.f32.xlu1 %v1933_v47  ;;  %1690 = vadd.xlane.f32.xlu0 %v1689_v22 }
 0x3a6   :  { %v1783_v48 = vmul.f32 0.015625, %v1640_v25  ;;  %v4206_v3 = vpop.f32.mrf.mxu1  ;;  %v1882_v57 = vmul.f32 %v5815_v52, %v5815_v52 }
 0x3a7   :  { %v1692_v23 = vsel %vm1628_vm1, %v5819_v40, 0.0 }
 0x3a8   :  { %v5826_v20 = vsub.f32 %v5661_v10, %v1783_v48  ;;  %v1517_v5 = vpop.f32.mrf.mxu1  ;;  %v1936_v7 = vsel %vm1628_vm1, %v1882_v57, 0.0 }
 0x3a9   :  { %v5830_v27 = vadd.f32 %v5621_v60, %v1517_v5  ;;  %1693 = vadd.xlane.f32.xlu1 %v1692_v23  ;;  %1937 = vadd.xlane.f32.xlu0 %v1936_v7  ;;  %v1643_v19 = vpop.xlane.xlu0 %1642  ;;  %v4417_v5 = vld [vmem:[%s7622_s9 + $0x18] sm:$0xff]  }
 0x3aa   :  { %v1784_v63 = vmul.f32 0.015625, %v1643_v19  ;;  %v4209_v31 = vpop.f32.mrf.mxu1  ;;  %v1883_v44 = vmul.f32 %v5826_v20, %v5826_v20  ;;  %4264 = vmatpush3.bf16.msra.mxu1 %v4417_v5 }
 0x3ab   :  { %v1695_v51 = vsel %vm1628_vm1, %v5830_v27, 0.0  ;;  %4265 = vmatprep.subr.bf16.mxu1 %v7652_v46 }
 0x3ac   :  { %v5837_v10 = vsub.f32 %v5671_v8, %v1784_v63  ;;  %v1520_v21 = vpop.f32.mrf.mxu1  ;;  %v1939_v35 = vsel %vm1628_vm1, %v1883_v44, 0.0 }
 0x3ad   :  { %v5841_v14 = vadd.f32 %v5621_v60, %v1520_v21  ;;  %v1646_v30 = vpop.xlane.xlu1 %1645  ;;  %1940 = vadd.xlane.f32.xlu1 %v1939_v35  ;;  %1696 = vadd.xlane.f32.xlu0 %v1695_v51 }
 0x3ae   :  { %v1785_v1 = vmul.f32 0.015625, %v1646_v30  ;;  %v4210_v49 = vpop.f32.mrf.mxu1  ;;  %v1884_v28 = vmul.f32 %v5837_v10, %v5837_v10 }
 0x3af   :  { %v1698_v6 = vsel %vm1628_vm1, %v5841_v14, 0.0 }
 0x3b0   :  { %v5848_v8 = vsub.f32 %v5679_v61, %v1785_v1  ;;  %v1525_v17 = vpop.f32.mrf.mxu1  ;;  %v1942_v38 = vsel %vm1628_vm1, %v1884_v28, 0.0 }
 0x3b1   :  { %v5852_v37 = vadd.f32 %v5621_v60, %v1525_v17  ;;  %1699 = vadd.xlane.f32.xlu1 %v1698_v6  ;;  %1943 = vadd.xlane.f32.xlu0 %v1942_v38  ;;  %v1649_v15 = vpop.xlane.xlu0 %1648 }
 0x3b2   :  { %v1786_v62 = vmul.f32 0.015625, %v1649_v15  ;;  %v4213_v13 = vpop.f32.mrf.mxu1  ;;  %v1885_v42 = vmul.f32 %v5848_v8, %v5848_v8 }
 0x3b3   :  { %v1701_v0 = vsel %vm1628_vm1, %v5852_v37, 0.0  ;;  %v4419_v13 = vld [vmem:[%s7622_s9 + $0x8] sm:$0xff]  }
 0x3b4   :  { %v5859_v61 = vsub.f32 %v5687_v26, %v1786_v62  ;;  %v1528_v50 = vpop.f32.mrf.mxu1  ;;  %v1945_v41 = vsel %vm1628_vm1, %v1885_v42, 0.0 }
 0x3b5   :  { %v5863_v33 = vadd.f32 %v5621_v60, %v1528_v50  ;;  %v1652_v53 = vpop.xlane.xlu1 %1651  ;;  %1946 = vadd.xlane.f32.xlu1 %v1945_v41  ;;  %1702 = vadd.xlane.f32.xlu0 %v1701_v0 }
 0x3b6   :  { %v1787_v39 = vmul.f32 0.015625, %v1652_v53  ;;  %v4214_v32 = vpop.f32.mrf.mxu1  ;;  %v1886_v56 = vmul.f32 %v5859_v61, %v5859_v61 }
 0x3b7   :  { %v1704_v22 = vsel %vm1628_vm1, %v5863_v33, 0.0 }
 0x3b8   :  { %v5870_v26 = vsub.f32 %v5692_v54, %v1787_v39  ;;  %v1533_v45 = vpop.f32.mrf.mxu1  ;;  %v1948_v47 = vsel %vm1628_vm1, %v1886_v56, 0.0 }
 0x3b9   :  { %v5874_v25 = vadd.f32 %v5621_v60, %v1533_v45  ;;  %1705 = vadd.xlane.f32.xlu1 %v1704_v22  ;;  %1949 = vadd.xlane.f32.xlu0 %v1948_v47  ;;  %v1655_v48 = vpop.xlane.xlu0 %1654 }
 0x3ba   :  { %v1788_v3 = vmul.f32 0.015625, %v1655_v48  ;;  %v4217_v57 = vpop.f32.mrf.mxu1  ;;  %v1887_v23 = vmul.f32 %v5870_v26, %v5870_v26 }
 0x3bb   :  { %v1707_v54 = vsel %vm1628_vm1, %v5874_v25, 0.0 }
 0x3bc   :  { %v5884_v7 = vsub.f32 %v5699_v24, %v1788_v3  ;;  %v1536_v19 = vpop.f32.mrf.mxu1  ;;  %v1951_v63 = vsel %vm1628_vm1, %v1887_v23, 0.0  ;;  %v4418_v24 = vld [vmem:[%s7622_s9 + $0x10] sm:$0xff]  }
 0x3bd   :  { %v5888_v31 = vadd.f32 %v5621_v60, %v1536_v19  ;;  %v1658_v44 = vpop.xlane.xlu1 %1657  ;;  %1952 = vadd.xlane.f32.xlu1 %v1951_v63  ;;  %1708 = vadd.xlane.f32.xlu0 %v1707_v54 }
 0x3be   :  { %v1789_v51 = vmul.f32 0.015625, %v1658_v44  ;;  %v4218_v21 = vpop.f32.mrf.mxu1  ;;  %v1888_v35 = vmul.f32 %v5884_v7, %v5884_v7  ;;  %4266 = vmatpush3.bf16.msra.mxu1 %v4418_v24 }
 0x3bf   :  { %v1710_v30 = vsel %vm1628_vm1, %v5888_v31, 0.0  ;;  %4267 = vmatprep.subr.bf16.mxu1 %v7652_v46 }
 0x3c0   :  { %v5899_v1 = vsub.f32 %v5704_v4, %v1789_v51  ;;  %v1541_v49 = vpop.f32.mrf.mxu1  ;;  %v1954_v28 = vsel %vm1628_vm1, %v1888_v35, 0.0 }
 0x3c1   :  { %v5903_v6 = vadd.f32 %v5621_v60, %v1541_v49  ;;  %1711 = vadd.xlane.f32.xlu1 %v1710_v30  ;;  %1955 = vadd.xlane.f32.xlu0 %v1954_v28  ;;  %v1661_v17 = vpop.xlane.xlu0 %1660 }
 0x3c2   :  { %v1790_v38 = vmul.f32 0.015625, %v1661_v17  ;;  %v4221_v15 = vpop.f32.mrf.mxu1  ;;  %v1889_v62 = vmul.f32 %v5899_v1, %v5899_v1  ;;  %4268 = vmatpush3.bf16.msra.mxu1 %v4419_v13 }
 0x3c3   :  { %v1713_v4 = vsel %vm1628_vm1, %v5903_v6, 0.0  ;;  %4269 = vmatprep.subr.bf16.mxu1 %v7652_v46 }
 0x3c4   :  { %v5914_v42 = vsub.f32 %v5709_v16, %v1790_v38  ;;  %v1544_v0 = vpop.f32.mrf.mxu1  ;;  %v1957_v50 = vsel %vm1628_vm1, %v1889_v62, 0.0  ;;  %v4420_v16 = vld [vmem:[%s7622_s9] sm:$0xff]  }
 0x3c5   :  { %v5918_v41 = vadd.f32 %v5621_v60, %v1544_v0  ;;  %v1664_v53 = vpop.xlane.xlu1 %1663  ;;  %1958 = vadd.xlane.f32.xlu1 %v1957_v50  ;;  %1714 = vadd.xlane.f32.xlu0 %v1713_v4 }
 0x3c6   :  { %v1791_v39 = vmul.f32 0.015625, %v1664_v53  ;;  %v4222_v32 = vpop.f32.mrf.mxu1  ;;  %v1890_v56 = vmul.f32 %v5914_v42, %v5914_v42  ;;  %4270 = vmatpush3.bf16.msra.mxu1 %v4420_v16 }
 0x3c7   :  { %v1716_v22 = vsel %vm1628_vm1, %v5918_v41, 0.0 }
 0x3c8   :  { %v5929_v45 = vsub.f32 %v5714_v9, %v1791_v39  ;;  %v1549_v47 = vpop.f32.mrf.mxu1  ;;  %v1960_v48 = vsel %vm1628_vm1, %v1890_v56, 0.0 }
 0x3c9   :  { %v5933_v3 = vadd.f32 %v5621_v60, %v1549_v47  ;;  %1717 = vadd.xlane.f32.xlu1 %v1716_v22  ;;  %1961 = vadd.xlane.f32.xlu0 %v1960_v48  ;;  %v1667_v57 = vpop.xlane.xlu0 %1666 }
 0x3ca   :  { %v1792_v23 = vmul.f32 0.015625, %v1667_v57  ;;  %v4225_v5 = vpop.f32.mrf.mxu1  ;;  %v1891_v54 = vmul.f32 %v5929_v45, %v5929_v45 }
 0x3cb   :  { %v1719_v19 = vsel %vm1628_vm1, %v5933_v3, 0.0 }
 0x3cc   :  { %v5940_v9 = vsub.f32 %v5719_v18, %v1792_v23  ;;  %v1552_v63 = vpop.f32.mrf.mxu1  ;;  %v1963_v44 = vsel %vm1628_vm1, %v1891_v54, 0.0 }
 0x3cd   :  { %v5944_v51 = vadd.f32 %v5621_v60, %v1552_v63  ;;  %v1670_v21 = vpop.xlane.xlu1 %1669  ;;  %1964 = vadd.xlane.f32.xlu1 %v1963_v44  ;;  %1720 = vadd.xlane.f32.xlu0 %v1719_v19 }
 0x3ce   :  { %v1793_v35 = vmul.f32 0.015625, %v1670_v21  ;;  %v4226_v24 = vpop.f32.mrf.mxu1  ;;  %v1892_v30 = vmul.f32 %v5940_v9, %v5940_v9 }
 0x3cf   :  { %v1722_v49 = vsel %vm1628_vm1, %v5944_v51, 0.0 }
 0x3d0   :  { %v5951_v18 = vsub.f32 %v5724_v2, %v1793_v35  ;;  %v1557_v28 = vpop.f32.mrf.mxu1  ;;  %v1966_v17 = vsel %vm1628_vm1, %v1892_v30, 0.0 }
 0x3d1   :  { %v5955_v38 = vadd.f32 %v5621_v60, %v1557_v28  ;;  %1723 = vadd.xlane.f32.xlu1 %v1722_v49  ;;  %1967 = vadd.xlane.f32.xlu0 %v1966_v17  ;;  %v1673_v15 = vpop.xlane.xlu0 %1672 }
 0x3d2   :  { %v1794_v62 = vmul.f32 0.015625, %v1673_v15  ;;  %v4229_v4 = vpop.f32.mrf.mxu1  ;;  %v1893_v13 = vmul.f32 %v5951_v18, %v5951_v18 }
 0x3d3   :  { %v1725_v0 = vsel %vm1628_vm1, %v5955_v38, 0.0 }
 0x3d4   :  { %v5962_v2 = vsub.f32 %v5729_v29, %v1794_v62  ;;  %v1560_v50 = vpop.f32.mrf.mxu1  ;;  %v1969_v53 = vsel %vm1628_vm1, %v1893_v13, 0.0 }
 0x3d5   :  { %v5966_v39 = vadd.f32 %v5621_v60, %v1560_v50  ;;  %v1676_v32 = vpop.xlane.xlu1 %1675  ;;  %1970 = vadd.xlane.f32.xlu1 %v1969_v53  ;;  %1726 = vadd.xlane.f32.xlu0 %v1725_v0 }
 0x3d6   :  { %v1795_v56 = vmul.f32 0.015625, %v1676_v32  ;;  %v4230_v22 = vpop.f32.mrf.mxu1  ;;  %v1894_v16 = vmul.f32 %v5962_v2, %v5962_v2 }
 0x3d7   :  { %v1728_v47 = vsel %vm1628_vm1, %v5966_v39, 0.0 }
 0x3d8   :  { %v5973_v29 = vsub.f32 %v5734_v11, %v1795_v56  ;;  %v1565_v48 = vpop.f32.mrf.mxu1  ;;  %v1972_v57 = vsel %vm1628_vm1, %v1894_v16, 0.0 }
 0x3d9   :  { %v5977_v23 = vadd.f32 %v5621_v60, %v1565_v48  ;;  %1729 = vadd.xlane.f32.xlu1 %v1728_v47  ;;  %1973 = vadd.xlane.f32.xlu0 %v1972_v57  ;;  %v1679_v5 = vpop.xlane.xlu0 %1678 }
 0x3da   :  { %v1796_v54 = vmul.f32 0.015625, %v1679_v5  ;;  %v4233_v19 = vpop.f32.mrf.mxu1  ;;  %v1895_v63 = vmul.f32 %v5973_v29, %v5973_v29 }
 0x3db   :  { %v1731_v44 = vsel %vm1628_vm1, %v5977_v23, 0.0 }
 0x3dc   :  { %v5984_v11 = vsub.f32 %v5739_v34, %v1796_v54  ;;  %v1568_v21 = vpop.f32.mrf.mxu1  ;;  %v1975_v35 = vsel %vm1628_vm1, %v1895_v63, 0.0 }
 0x3dd   :  { %v5988_v24 = vadd.f32 %v5621_v60, %v1568_v21  ;;  %v1682_v30 = vpop.xlane.xlu1 %1681  ;;  %1976 = vadd.xlane.f32.xlu1 %v1975_v35  ;;  %1732 = vadd.xlane.f32.xlu0 %v1731_v44 }
 0x3de   :  { %v1797_v49 = vmul.f32 0.015625, %v1682_v30  ;;  %v4234_v28 = vpop.f32.mrf.mxu1  ;;  %v1896_v17 = vmul.f32 %v5984_v11, %v5984_v11 }
 0x3df   :  { %v1734_v15 = vsel %vm1628_vm1, %v5988_v24, 0.0 }
 0x3e0   :  { %v5995_v34 = vsub.f32 %v5744_v55, %v1797_v49  ;;  %v1573_v62 = vpop.f32.mrf.mxu1  ;;  %v1978_v4 = vsel %vm1628_vm1, %v1896_v17, 0.0 }
 0x3e1   :  { %v5999_v13 = vadd.f32 %v5621_v60, %v1573_v62  ;;  %1735 = vadd.xlane.f32.xlu1 %v1734_v15  ;;  %1979 = vadd.xlane.f32.xlu0 %v1978_v4  ;;  %v1685_v0 = vpop.xlane.xlu0 %1684 }
 0x3e2   :  { %v1798_v50 = vmul.f32 0.015625, %v1685_v0  ;;  %v4237_v53 = vpop.f32.mrf.mxu1  ;;  %v1897_v32 = vmul.f32 %v5995_v34, %v5995_v34 }
 0x3e3   :  { %v1737_v56 = vsel %vm1628_vm1, %v5999_v13, 0.0 }
 0x3e4   :  { %v6006_v55 = vsub.f32 %v5749_v43, %v1798_v50  ;;  %v1576_v22 = vpop.f32.mrf.mxu1  ;;  %v1981_v16 = vsel %vm1628_vm1, %v1897_v32, 0.0 }
 0x3e5   :  { %v6010_v47 = vadd.f32 %v5621_v60, %v1576_v22  ;;  %v1688_v48 = vpop.xlane.xlu1 %1687  ;;  %1982 = vadd.xlane.f32.xlu1 %v1981_v16  ;;  %1738 = vadd.xlane.f32.xlu0 %v1737_v56 }
 0x3e6   :  { %v1799_v57 = vmul.f32 0.015625, %v1688_v48  ;;  %v4238_v5 = vpop.f32.mrf.mxu1  ;;  %v1898_v54 = vmul.f32 %v6006_v55, %v6006_v55 }
 0x3e7   :  { %v1740_v19 = vsel %vm1628_vm1, %v6010_v47, 0.0 }
 0x3e8   :  { %v6017_v43 = vsub.f32 %v5754_v59, %v1799_v57  ;;  %v1581_v63 = vpop.f32.mrf.mxu1  ;;  %v1984_v44 = vsel %vm1628_vm1, %v1898_v54, 0.0 }
 0x3e9   :  { %v6021_v21 = vadd.f32 %v5621_v60, %v1581_v63  ;;  %1741 = vadd.xlane.f32.xlu1 %v1740_v19  ;;  %1985 = vadd.xlane.f32.xlu0 %v1984_v44 }
 0x3ea   :  { %v4241_v35 = vpop.f32.mrf.mxu1  ;;  %v1899_v30 = vmul.f32 %v6017_v43, %v6017_v43 }
 0x3eb   :  { %v1743_v49 = vsel %vm1628_vm1, %v6021_v21, 0.0 }
 0x3ec   :  { %v1584_v28 = vpop.f32.mrf.mxu1  ;;  %v1987_v17 = vsel %vm1628_vm1, %v1899_v30, 0.0 }
 0x3ed   :  { %v6029_v59 = vadd.f32 %v5621_v60, %v1584_v28  ;;  %1988 = vadd.xlane.f32.xlu1 %v1987_v17  ;;  %1744 = vadd.xlane.f32.xlu0 %v1743_v49 }
 0x3ee   :  { %v4242_v15 = vpop.f32.mrf.mxu1 }
 0x3ef   :  { %v1746_v62 = vsel %vm1628_vm1, %v6029_v59, 0.0 }
 0x3f1   :  { %1747 = vadd.xlane.f32.xlu1 %v1746_v62 }
 0x42a   :  { %v1932_v4 = vpop.xlane.xlu0 %1931 }
 0x42b   :  { %v2080_v0 = vmul.f32 0.015625, %v1932_v4 }
 0x42d   :  { %v2130_v50 = vadd.f32 1e-05, %v2080_v0 }
 0x42e   :  { %v1935_v53 = vpop.xlane.xlu1 %1934  ;;  %v1691_v32 = vpop.xlane.xlu0 %1690 }
 0x42f   :  { %4521 = vrsqrt.f32 %v2130_v50  ;;  %v2081_v56 = vmul.f32 0.015625, %v1935_v53  ;;  %v1800_v22 = vmul.f32 0.015625, %v1691_v32 }
 0x431   :  { %v2131_v16 = vadd.f32 1e-05, %v2081_v56  ;;  %v6034_v48 = vsub.f32 %v5808_v58, %v1800_v22 }
 0x432   :  { %v1694_v57 = vpop.xlane.xlu1 %1693  ;;  %v1938_v5 = vpop.xlane.xlu0 %1937 }
 0x433   :  { %4523 = vrsqrt.f32 %v2131_v16  ;;  %v1801_v54 = vmul.f32 0.015625, %v1694_v57  ;;  %v2082_v19 = vmul.f32 0.015625, %v1938_v5  ;;  %v1589_v63 = vpop.f32.mrf.mxu1  ;;  %v1900_v44 = vmul.f32 %v6034_v48, %v6034_v48 }
 0x434   :  { %v6042_v49 = vadd.f32 %v5621_v60, %v1589_v63 }
 0x435   :  { %v6039_v35 = vsub.f32 %v5819_v40, %v1801_v54  ;;  %v2132_v30 = vadd.f32 1e-05, %v2082_v19  ;;  %v4245_v28 = vpop.f32.mrf.mxu1  ;;  %v1990_v58 = vsel %vm1628_vm1, %v1900_v44, 0.0  ;;  %v6050_v40 = vld [vmem:[%s7619_s6] ss:$0 sm:$0xff] }
 0x436   :  { %v1941_v17 = vpop.xlane.xlu1 %1940  ;;  %1991 = vadd.xlane.f32.xlu0 %v1990_v58  ;;  %v1697_v15 = vpop.xlane.xlu0 %1696  ;;  %v1749_v16 = vsel %vm1628_vm1, %v6042_v49, 0.0  ;;  %v6071_v58 = vld [vmem:[%s7620_s7] ss:$0 sm:$0xff] }
 0x437   :  { %4525 = vrsqrt.f32 %v2132_v30  ;;  %v2083_v62 = vmul.f32 0.015625, %v1941_v17  ;;  %v1802_v4 = vmul.f32 0.015625, %v1697_v15  ;;  %v1592_v0 = vpop.f32.mrf.mxu1  ;;  %v1901_v50 = vmul.f32 %v6039_v35, %v6039_v35 }
 0x438   :  { %v6053_v60 = vadd.f32 %v6050_v40, %v1592_v0 }
 0x439   :  { %v2133_v53 = vadd.f32 1e-05, %v2083_v62  ;;  %v6056_v32 = vsub.f32 %v5830_v27, %v1802_v4  ;;  %v1993_v56 = vsel %vm1628_vm1, %v1901_v50, 0.0  ;;  %v4246_v22 = vpop.f32.mrf.mxu1 }
 0x43a   :  { %v1700_v57 = vpop.xlane.xlu1 %1699  ;;  %1994 = vadd.xlane.f32.xlu1 %v1993_v56  ;;  %1750 = vadd.xlane.f32.xlu0 %v1749_v16  ;;  %v1944_v5 = vpop.xlane.xlu0 %1943  ;;  %v1752_v28 = vsel %vm1628_vm1, %v6053_v60, 0.0 }
 0x43b   :  { %4527 = vrsqrt.f32 %v2133_v53  ;;  %v1803_v54 = vmul.f32 0.015625, %v1700_v57  ;;  %v2084_v19 = vmul.f32 0.015625, %v1944_v5  ;;  %v1597_v63 = vpop.f32.mrf.mxu1  ;;  %v1902_v44 = vmul.f32 %v6056_v32, %v6056_v32 }
 0x43c   :  { %v4522_v30 = vpop.eup %4521  ;;  %v6064_v27 = vadd.f32 %v6050_v40, %v1597_v63 }
 0x43d   :  { %v2230_v17 = vmul.f32 %v4522_v30, %v5799_v36  ;;  %v6075_v15 = vsub.f32 %v5841_v14, %v1803_v54  ;;  %v2134_v62 = vadd.f32 1e-05, %v2084_v19  ;;  %v4249_v4 = vpop.f32.mrf.mxu1  ;;  %v1996_v0 = vsel %vm1628_vm1, %v1902_v44, 0.0  ;;  %v6090_v30 = vld [vmem:[%s7621_s8] ss:$0 sm:$0xff] }
 0x43e   :  { %v1947_v50 = vpop.xlane.xlu1 %1946  ;;  %1753 = vadd.xlane.f32.xlu1 %v1752_v28  ;;  %1997 = vadd.xlane.f32.xlu0 %v1996_v0  ;;  %v1703_v53 = vpop.xlane.xlu0 %1702  ;;  %v1755_v44 = vsel %vm1628_vm1, %v6064_v27, 0.0 }
 0x43f   :  { %4529 = vrsqrt.f32 %v2134_v62  ;;  %v2085_v56 = vmul.f32 0.015625, %v1947_v50  ;;  %v1804_v22 = vmul.f32 0.015625, %v1703_v53  ;;  %v1600_v16 = vpop.f32.mrf.mxu1  ;;  %v2287_v5 = vmul.f32 %v6071_v58, %v2230_v17 }
 0x440   :  { %v4524_v57 = vpop.eup %4523  ;;  %v1903_v36 = vmul.f32 %v6075_v15, %v6075_v15  ;;  %v6093_v28 = vadd.f32 %v6050_v40, %v1600_v16 }
 0x441   :  { %v2231_v14 = vmul.f32 %v4524_v57, %v5804_v12  ;;  %v2135_v54 = vadd.f32 1e-05, %v2085_v56  ;;  %v6083_v19 = vsub.f32 %v5852_v37, %v1804_v22  ;;  %v4250_v63 = vpop.f32.mrf.mxu1  ;;  %v2344_v22 = vadd.f32 %v6090_v30, %v2287_v5 }
 0x442   :  { %v1706_v17 = vpop.xlane.xlu1 %1705  ;;  %v1999_v62 = vsel %vm1628_vm1, %v1903_v36, 0.0  ;;  %1756 = vadd.xlane.f32.xlu0 %v1755_v44  ;;  %v1950_v12 = vpop.xlane.xlu0 %1949 }
 0x443   :  { %7658 = vst [vmem:[#allocation6_spill] sm:$0xff] %v6083_v19  ;;  %v2288_v37 = vmul.f32 %v6071_v58, %v2231_v14  ;;  %4531 = vrsqrt.f32 %v2135_v54  ;;  %v1805_v4 = vmul.f32 0.015625, %v1706_v17  ;;  %2000 = vadd.xlane.f32.xlu1 %v1999_v62  ;;  %v2086_v0 = vmul.f32 0.015625, %v1950_v12  ;;  %v1605_v50 = vpop.f32.mrf.mxu1 }
 0x444   :  { %v4526_v53 = vpop.eup %4525  ;;  %v1904_v56 = vmul.f32 %v6083_v19, %v6083_v19  ;;  %v6106_v54 = vadd.f32 %v6050_v40, %v1605_v50  ;;  %v1758_v17 = vsel %vm1628_vm1, %v6093_v28, 0.0 }
 0x445   :  { %v6101_v16 = vsub.f32 %v5863_v33, %v1805_v4  ;;  %v2136_v57 = vadd.f32 1e-05, %v2086_v0  ;;  %v4253_v36 = vpop.f32.mrf.mxu1  ;;  %v2345_v63 = vadd.f32 %v6090_v30, %v2288_v37  ;;  %v2232_v14 = vmul.f32 %v4526_v53, %v5815_v52 }
 0x446   :  { %v1953_v44 = vpop.xlane.xlu1 %1952  ;;  %v2002_v62 = vsel %vm1628_vm1, %v1904_v56, 0.0  ;;  %v1709_v12 = vpop.xlane.xlu0 %1708  ;;  %v2394_v0 = vmax.f32 %v2344_v22, 0.0 }
 0x447   :  { %4533 = vrsqrt.f32 %v2136_v57  ;;  %v2087_v5 = vmul.f32 0.015625, %v1953_v44  ;;  %1759 = vadd.xlane.f32.xlu1 %v1758_v17  ;;  %2003 = vadd.xlane.f32.xlu0 %v2002_v62  ;;  %v1806_v33 = vmul.f32 0.015625, %v1709_v12  ;;  %v1608_v4 = vpop.f32.mrf.mxu1  ;;  %v1905_v37 = vmul.f32 %v6101_v16, %v6101_v16 }
 0x448   :  { %v4528_v52 = vpop.eup %4527  ;;  %v2395_v50 = vmax.f32 %v2345_v63, 0.0  ;;  %v2289_v53 = vmul.f32 %v6071_v58, %v2232_v14  ;;  %v6120_v17 = vadd.f32 %v6050_v40, %v1608_v4  ;;  %v1761_v12 = vsel %vm1628_vm1, %v6106_v54, 0.0 }
 0x449   :  { %v2137_v36 = vadd.f32 1e-05, %v2087_v5  ;;  %v6115_v19 = vsub.f32 %v5874_v25, %v1806_v33  ;;  %v2005_v56 = vsel %vm1628_vm1, %v1905_v37, 0.0  ;;  %v4254_v57 = vpop.f32.mrf.mxu1  ;;  %v2233_v44 = vmul.f32 %v4528_v52, %v5826_v20 }
 0x44a   :  { %v1712_v62 = vpop.xlane.xlu1 %1711  ;;  %v1956_v22 = vpop.xlane.xlu0 %1955  ;;  %v2444_v63 = vpack.c.bf16 %v2395_v50, %v2394_v0  ;;  %v2346_v4 = vadd.f32 %v6090_v30, %v2289_v53 }
 0x44b   :  { %4535 = vrsqrt.f32 %v2137_v36  ;;  %v1807_v14 = vmul.f32 0.015625, %v1712_v62  ;;  %2006 = vadd.xlane.f32.xlu1 %v2005_v56  ;;  %1762 = vadd.xlane.f32.xlu0 %v1761_v12  ;;  %v2088_v25 = vmul.f32 0.015625, %v1956_v22  ;;  %v1613_v5 = vpop.f32.mrf.mxu1  ;;  %v1906_v33 = vmul.f32 %v6115_v19, %v6115_v19 }
 0x44c   :  { %v4530_v37 = vpop.eup %4529  ;;  %4272 = vmatmul.mubr.msk.bf16.vlgmr.msra.gmra.mxu1 %vm1628_vm1, %v2444_v63  ;;  %v2290_v20 = vmul.f32 %v6071_v58, %v2233_v44  ;;  %v6137_v57 = vadd.f32 %v6050_v40, %v1613_v5  ;;  %v1764_v44 = vsel %vm1628_vm1, %v6120_v17, 0.0 }
 0x44d   :  { %v6130_v52 = vsub.f32 %v5888_v31, %v1807_v14  ;;  %v2138_v0 = vadd.f32 1e-05, %v2088_v25  ;;  %v4257_v50 = vpop.f32.mrf.mxu1  ;;  %v2008_v36 = vsel %vm1628_vm1, %v1906_v33, 0.0  ;;  %4275 = vmatprep.mubr.msk.bf16.mxu1 %vm4756_vm0, %v7652_v46  ;;  %v2234_v56 = vmul.f32 %v4530_v37, %v5837_v10 }
 0x44e   :  { %v1959_v62 = vpop.xlane.xlu1 %1958  ;;  %v1715_v53 = vpop.xlane.xlu0 %1714  ;;  %v2347_v31 = vadd.f32 %v6090_v30, %v2290_v20  ;;  %v2396_v25 = vmax.f32 %v2346_v4, 0.0 }
 0x44f   :  { %4537 = vrsqrt.f32 %v2138_v0  ;;  %v2089_v12 = vmul.f32 0.015625, %v1959_v62  ;;  %1765 = vadd.xlane.f32.xlu1 %v1764_v44  ;;  %2009 = vadd.xlane.f32.xlu0 %v2008_v36  ;;  %v1808_v22 = vmul.f32 0.015625, %v1715_v53  ;;  %v1616_v63 = vpop.f32.mrf.mxu1  ;;  %v1907_v14 = vmul.f32 %v6130_v52, %v6130_v52 }
 0x450   :  { %v4532_v10 = vpop.eup %4531  ;;  %v2397_v5 = vmax.f32 %v2347_v31, 0.0  ;;  %v2291_v33 = vmul.f32 %v6071_v58, %v2234_v56  ;;  %v6151_v36 = vadd.f32 %v6050_v40, %v1616_v63  ;;  %v1767_v53 = vsel %vm1628_vm1, %v6137_v57, 0.0 }
 0x451   :  { %v2139_v37 = vadd.f32 1e-05, %v2089_v12  ;;  %v6146_v50 = vsub.f32 %v5903_v6, %v1808_v22  ;;  %v2011_v20 = vsel %vm1628_vm1, %v1907_v14, 0.0  ;;  %v4258_v0 = vpop.f32.mrf.mxu1  ;;  %v2235_v62 = vmul.f32 %v4532_v10, %v5848_v8 }
 0x452   :  { %v1718_v44 = vpop.xlane.xlu1 %1717  ;;  %v1962_v4 = vpop.xlane.xlu0 %1961  ;;  %v2445_v31 = vpack.c.bf16 %v2397_v5, %v2396_v25  ;;  %v2348_v63 = vadd.f32 %v6090_v30, %v2291_v33 }
 0x453   :  { %4539 = vrsqrt.f32 %v2139_v37  ;;  %v1809_v56 = vmul.f32 0.015625, %v1718_v44  ;;  %2012 = vadd.xlane.f32.xlu1 %v2011_v20  ;;  %1768 = vadd.xlane.f32.xlu0 %v1767_v53  ;;  %v2090_v6 = vmul.f32 0.015625, %v1962_v4  ;;  %v1621_v12 = vpop.f32.mrf.mxu1  ;;  %v1908_v22 = vmul.f32 %v6146_v50, %v6146_v50 }
 0x454   :  { %v4534_v14 = vpop.eup %4533  ;;  %4276 = vmatmul.mubr.msk.bf16.gmra.mxu1 %vm1628_vm1, %v2445_v31  ;;  %v2292_v8 = vmul.f32 %v6071_v58, %v2235_v62  ;;  %v6168_v0 = vadd.f32 %v6050_v40, %v1621_v12  ;;  %v1770_v62 = vsel %vm1628_vm1, %v6151_v36, 0.0 }
 0x455   :  { %v6161_v10 = vsub.f32 %v5918_v41, %v1809_v56  ;;  %v2140_v25 = vadd.f32 1e-05, %v2090_v6  ;;  %v4261_v5 = vpop.f32.mrf.mxu1  ;;  %v2014_v37 = vsel %vm1628_vm1, %v1908_v22, 0.0  ;;  %4279 = vmatprep.mubr.msk.bf16.mxu1 %vm4756_vm0, %v7652_v46  ;;  %v2236_v20 = vmul.f32 %v4534_v14, %v5859_v61 }
 0x456   :  { %v1965_v44 = vpop.xlane.xlu1 %1964  ;;  %v1721_v33 = vpop.xlane.xlu0 %1720  ;;  %v2349_v41 = vadd.f32 %v6090_v30, %v2292_v8  ;;  %v2398_v6 = vmax.f32 %v2348_v63, 0.0 }
 0x457   :  { %4541 = vrsqrt.f32 %v2140_v25  ;;  %v2091_v53 = vmul.f32 0.015625, %v1965_v44  ;;  %1771 = vadd.xlane.f32.xlu1 %v1770_v62  ;;  %2015 = vadd.xlane.f32.xlu0 %v2014_v37  ;;  %v1810_v4 = vmul.f32 0.015625, %v1721_v33  ;;  %v1624_v31 = vpop.f32.mrf.mxu1  ;;  %v1909_v56 = vmul.f32 %v6161_v10, %v6161_v10 }
 0x458   :  { %v4536_v61 = vpop.eup %4535  ;;  %v2399_v12 = vmax.f32 %v2349_v41, 0.0  ;;  %v2293_v22 = vmul.f32 %v6071_v58, %v2236_v20  ;;  %v6182_v37 = vadd.f32 %v6050_v40, %v1624_v31  ;;  %v1773_v33 = vsel %vm1628_vm1, %v6168_v0, 0.0 }
 0x459   :  { %v2141_v14 = vadd.f32 1e-05, %v2091_v53  ;;  %v6177_v5 = vsub.f32 %v5933_v3, %v1810_v4  ;;  %v2017_v8 = vsel %vm1628_vm1, %v1909_v56, 0.0  ;;  %v4262_v25 = vpop.f32.mrf.mxu1  ;;  %v2237_v44 = vmul.f32 %v4536_v61, %v5870_v26 }
 0x45a   :  { %v1724_v62 = vpop.xlane.xlu1 %1723  ;;  %v1968_v63 = vpop.xlane.xlu0 %1967  ;;  %v2446_v41 = vpack.c.bf16 %v2399_v12, %v2398_v6  ;;  %v2350_v40 = vadd.f32 %v6090_v30, %v2293_v22 }
 0x45b   :  { %4543 = vrsqrt.f32 %v2141_v14  ;;  %v1811_v20 = vmul.f32 0.015625, %v1724_v62  ;;  %2018 = vadd.xlane.f32.xlu1 %v2017_v8  ;;  %1774 = vadd.xlane.f32.xlu0 %v1773_v33  ;;  %v2092_v3 = vmul.f32 0.015625, %v1968_v63  ;;  %v1910_v53 = vmul.f32 %v6177_v5, %v6177_v5 }
 0x45c   :  { %v4538_v4 = vpop.eup %4537  ;;  %4280 = vmatmul.mubr.msk.bf16.gmra.mxu1 %vm1628_vm1, %v2446_v41  ;;  %v2294_v26 = vmul.f32 %v6071_v58, %v2237_v44  ;;  %v1776_v14 = vsel %vm1628_vm1, %v6182_v37, 0.0  ;;  %v2400_v33 = vmax.f32 %v2350_v40, 0.0 }
 0x45d   :  { %v6192_v31 = vsub.f32 %v5944_v51, %v1811_v20  ;;  %v2142_v56 = vadd.f32 1e-05, %v2092_v3  ;;  %v2020_v61 = vsel %vm1628_vm1, %v1910_v53, 0.0  ;;  %4283 = vmatprep.mubr.msk.bf16.mxu1 %vm4756_vm0, %v7652_v46  ;;  %v2238_v6 = vmul.f32 %v4538_v4, %v5884_v7 }
 0x45e   :  { %v1971_v12 = vpop.xlane.xlu1 %1970  ;;  %v1727_v8 = vpop.xlane.xlu0 %1726  ;;  %v2351_v25 = vadd.f32 %v6090_v30, %v2294_v26 }
 0x45f   :  { %4545 = vrsqrt.f32 %v2142_v56  ;;  %v2093_v22 = vmul.f32 0.015625, %v1971_v12  ;;  %1777 = vadd.xlane.f32.xlu1 %v1776_v14  ;;  %2021 = vadd.xlane.f32.xlu0 %v2020_v61  ;;  %v1812_v51 = vmul.f32 0.015625, %v1727_v8  ;;  %v1911_v44 = vmul.f32 %v6192_v31, %v6192_v31 }
 0x460   :  { %v4540_v62 = vpop.eup %4539  ;;  %v2401_v63 = vmax.f32 %v2351_v25, 0.0  ;;  %v2295_v7 = vmul.f32 %v6071_v58, %v2238_v6 }
 0x461   :  { %v2143_v41 = vadd.f32 1e-05, %v2093_v22  ;;  %v6205_v20 = vsub.f32 %v5955_v38, %v1812_v51  ;;  %v2023_v3 = vsel %vm1628_vm1, %v1911_v44, 0.0  ;;  %v2239_v53 = vmul.f32 %v4540_v62, %v5899_v1 }
 0x462   :  { %v1730_v4 = vpop.xlane.xlu1 %1729  ;;  %v1974_v26 = vpop.xlane.xlu0 %1973  ;;  %v2447_v56 = vpack.c.bf16 %v2401_v63, %v2400_v33  ;;  %v2352_v6 = vadd.f32 %v6090_v30, %v2295_v7 }
 0x463   :  { %4547 = vrsqrt.f32 %v2143_v41  ;;  %v1813_v61 = vmul.f32 0.015625, %v1730_v4  ;;  %2024 = vadd.xlane.f32.xlu1 %v2023_v3  ;;  %v2094_v12 = vmul.f32 0.015625, %v1974_v26  ;;  %v1912_v40 = vmul.f32 %v6205_v20, %v6205_v20 }
 0x464   :  { %v4542_v14 = vpop.eup %4541  ;;  %4284 = vmatmul.mubr.msk.bf16.gmra.mxu1 %vm1628_vm1, %v2447_v56  ;;  %v2296_v38 = vmul.f32 %v6071_v58, %v2239_v53  ;;  %v2402_v41 = vmax.f32 %v2352_v6, 0.0 }
 0x465   :  { %v6215_v8 = vsub.f32 %v5966_v39, %v1813_v61  ;;  %v2144_v1 = vadd.f32 1e-05, %v2094_v12  ;;  %v2026_v25 = vsel %vm1628_vm1, %v1912_v40, 0.0  ;;  %4287 = vmatprep.mubr.msk.bf16.mxu1 %vm4756_vm0, %v7652_v46  ;;  %v2240_v22 = vmul.f32 %v4542_v14, %v5914_v42 }
 0x466   :  { %v1977_v51 = vpop.xlane.xlu1 %1976  ;;  %2027 = vadd.xlane.f32.xlu0 %v2026_v25  ;;  %v1733_v44 = vpop.xlane.xlu0 %1732  ;;  %v2353_v62 = vadd.f32 %v6090_v30, %v2296_v38 }
 0x467   :  { %4549 = vrsqrt.f32 %v2144_v1  ;;  %v2095_v33 = vmul.f32 0.015625, %v1977_v51  ;;  %v1814_v63 = vmul.f32 0.015625, %v1733_v44  ;;  %v1913_v39 = vmul.f32 %v6215_v8, %v6215_v8 }
 0x468   :  { %v4544_v7 = vpop.eup %4543  ;;  %v2403_v3 = vmax.f32 %v2353_v62, 0.0  ;;  %v2297_v53 = vmul.f32 %v6071_v58, %v2240_v22 }
 0x469   :  { %v2145_v4 = vadd.f32 1e-05, %v2095_v33  ;;  %v6226_v26 = vsub.f32 %v5977_v23, %v1814_v63  ;;  %v2029_v42 = vsel %vm1628_vm1, %v1913_v39, 0.0  ;;  %v2241_v56 = vmul.f32 %v4544_v7, %v5929_v45 }
 0x46a   :  { %v1736_v61 = vpop.xlane.xlu1 %1735  ;;  %2030 = vadd.xlane.f32.xlu1 %v2029_v42  ;;  %v1980_v12 = vpop.xlane.xlu0 %1979  ;;  %v2448_v40 = vpack.c.bf16 %v2403_v3, %v2402_v41  ;;  %v2354_v25 = vadd.f32 %v6090_v30, %v2297_v53 }
 0x46b   :  { %4551 = vrsqrt.f32 %v2145_v4  ;;  %v1815_v14 = vmul.f32 0.015625, %v1736_v61  ;;  %v2096_v38 = vmul.f32 0.015625, %v1980_v12  ;;  %v1914_v6 = vmul.f32 %v6226_v26, %v6226_v26 }
 0x46c   :  { %v4546_v1 = vpop.eup %4545  ;;  %4288 = vmatmul.mubr.msk.bf16.gmra.mxu1 %vm1628_vm1, %v2448_v40  ;;  %v2298_v23 = vmul.f32 %v6071_v58, %v2241_v56  ;;  %v2404_v3 = vmax.f32 %v2354_v25, 0.0 }
 0x46d   :  { %v6236_v22 = vsub.f32 %v5988_v24, %v1815_v14  ;;  %v2146_v45 = vadd.f32 1e-05, %v2096_v38  ;;  %v2032_v51 = vsel %vm1628_vm1, %v1914_v6, 0.0  ;;  %4291 = vmatprep.mubr.msk.bf16.mxu1 %vm4756_vm0, %v7652_v46  ;;  %v2242_v44 = vmul.f32 %v4546_v1, %v5940_v9 }
 0x46e   :  { %v1983_v62 = vpop.xlane.xlu1 %1982  ;;  %2033 = vadd.xlane.f32.xlu0 %v2032_v51  ;;  %v1739_v33 = vpop.xlane.xlu0 %1738  ;;  %v2355_v63 = vadd.f32 %v6090_v30, %v2298_v23 }
 0x46f   :  { %4553 = vrsqrt.f32 %v2146_v45  ;;  %v2097_v39 = vmul.f32 0.015625, %v1983_v62  ;;  %v1816_v7 = vmul.f32 0.015625, %v1739_v33  ;;  %v1915_v24 = vmul.f32 %v6236_v22, %v6236_v22 }
 0x470   :  { %v4548_v41 = vpop.eup %4547  ;;  %v2405_v53 = vmax.f32 %v2355_v63, 0.0  ;;  %v2299_v4 = vmul.f32 %v6071_v58, %v2242_v44 }
 0x471   :  { %v2147_v42 = vadd.f32 1e-05, %v2097_v39  ;;  %v6247_v56 = vsub.f32 %v5999_v13, %v1816_v7  ;;  %v2035_v9 = vsel %vm1628_vm1, %v1915_v24, 0.0  ;;  %v2243_v61 = vmul.f32 %v4548_v41, %v5951_v18 }
 0x472   :  { %v1742_v12 = vpop.xlane.xlu1 %1741  ;;  %2036 = vadd.xlane.f32.xlu1 %v2035_v9  ;;  %v1986_v40 = vpop.xlane.xlu0 %1985  ;;  %v2449_v14 = vpack.c.bf16 %v2405_v53, %v2404_v3  ;;  %v2356_v25 = vadd.f32 %v6090_v30, %v2299_v4 }
 0x473   :  { %4555 = vrsqrt.f32 %v2147_v42  ;;  %v1817_v38 = vmul.f32 0.015625, %v1742_v12  ;;  %v2098_v6 = vmul.f32 0.015625, %v1986_v40  ;;  %v1916_v1 = vmul.f32 %v6247_v56, %v6247_v56 }
 0x474   :  { %v4550_v23 = vpop.eup %4549  ;;  %4292 = vmatmul.mubr.msk.bf16.gmra.mxu1 %vm1628_vm1, %v2449_v14  ;;  %v2300_v13 = vmul.f32 %v6071_v58, %v2243_v61  ;;  %v2406_v41 = vmax.f32 %v2356_v25, 0.0 }
 0x475   :  { %v6257_v45 = vsub.f32 %v6010_v47, %v1817_v38  ;;  %v2148_v18 = vadd.f32 1e-05, %v2098_v6  ;;  %v2038_v51 = vsel %vm1628_vm1, %v1916_v1, 0.0  ;;  %4295 = vmatprep.mubr.msk.bf16.mxu1 %vm4756_vm0, %v7652_v46  ;;  %v2244_v44 = vmul.f32 %v4550_v23, %v5962_v2 }
 0x476   :  { %v1989_v62 = vpop.xlane.xlu1 %1988  ;;  %2039 = vadd.xlane.f32.xlu0 %v2038_v51  ;;  %v1745_v33 = vpop.xlane.xlu0 %1744  ;;  %v2357_v63 = vadd.f32 %v6090_v30, %v2300_v13 }
 0x477   :  { %4557 = vrsqrt.f32 %v2148_v18  ;;  %v2099_v39 = vmul.f32 0.015625, %v1989_v62  ;;  %v1818_v7 = vmul.f32 0.015625, %v1745_v33  ;;  %v1917_v47 = vmul.f32 %v6257_v45, %v6257_v45 }
 0x478   :  { %v4552_v24 = vpop.eup %4551  ;;  %v2407_v3 = vmax.f32 %v2357_v63, 0.0  ;;  %v2301_v53 = vmul.f32 %v6071_v58, %v2244_v44 }
 0x479   :  { %v2149_v4 = vadd.f32 1e-05, %v2099_v39  ;;  %v6268_v42 = vsub.f32 %v6021_v21, %v1818_v7  ;;  %v2041_v2 = vsel %vm1628_vm1, %v1917_v47, 0.0  ;;  %v2245_v9 = vmul.f32 %v4552_v24, %v5973_v29 }
 0x47a   :  { %v1748_v61 = vpop.xlane.xlu1 %1747  ;;  %2042 = vadd.xlane.f32.xlu1 %v2041_v2  ;;  %v2450_v12 = vpack.c.bf16 %v2407_v3, %v2406_v41  ;;  %v2358_v40 = vadd.f32 %v6090_v30, %v2301_v53 }
 0x47b   :  { %4559 = vrsqrt.f32 %v2149_v4  ;;  %v1819_v14 = vmul.f32 0.015625, %v1748_v61  ;;  %v1918_v38 = vmul.f32 %v6268_v42, %v6268_v42  ;;  %v2302_v6 = vmul.f32 %v6071_v58, %v2245_v9 }
 0x47c   :  { %v4554_v1 = vpop.eup %4553  ;;  %4296 = vmatmul.mubr.msk.bf16.gmra.mxu1 %vm1628_vm1, %v2450_v12  ;;  %v2408_v18 = vmax.f32 %v2358_v40, 0.0 }
 0x47d   :  { %v6278_v21 = vsub.f32 %v6029_v59, %v1819_v14  ;;  %v2044_v29 = vsel %vm1628_vm1, %v1918_v38, 0.0  ;;  %4299 = vmatprep.mubr.msk.bf16.mxu1 %vm4756_vm0, %v7652_v46  ;;  %v2359_v23 = vadd.f32 %v6090_v30, %v2302_v6  ;;  %v2246_v13 = vmul.f32 %v4554_v1, %v5984_v11 }
 0x47e   :  { %2045 = vadd.xlane.f32.xlu0 %v2044_v29 }
 0x47f   :  { %v1919_v25 = vmul.f32 %v6278_v21, %v6278_v21  ;;  %v2409_v51 = vmax.f32 %v2359_v23, 0.0  ;;  %v2303_v44 = vmul.f32 %v6071_v58, %v2246_v13 }
 0x480   :  { %v4556_v62 = vpop.eup %4555 }
 0x481   :  { %v2047_v59 = vsel %vm1628_vm1, %v1919_v25, 0.0  ;;  %v2451_v33 = vpack.c.bf16 %v2409_v51, %v2408_v18  ;;  %v2247_v63 = vmul.f32 %v4556_v62, %v5995_v34  ;;  %v2360_v7 = vadd.f32 %v6090_v30, %v2303_v44 }
 0x482   :  { %2048 = vadd.xlane.f32.xlu1 %v2047_v59 }
 0x483   :  { %v2304_v39 = vmul.f32 %v6071_v58, %v2247_v63  ;;  %v2410_v41 = vmax.f32 %v2360_v7, 0.0 }
 0x484   :  { %v4558_v11 = vpop.eup %4557  ;;  %4300 = vmatmul.mubr.msk.bf16.gmra.mxu1 %vm1628_vm1, %v2451_v33 }
 0x485   :  { %4303 = vmatprep.mubr.msk.bf16.mxu1 %vm4756_vm0, %v7652_v46  ;;  %v2361_v47 = vadd.f32 %v6090_v30, %v2304_v39  ;;  %v2248_v24 = vmul.f32 %v4558_v11, %v6006_v55 }
 0x487   :  { %v2411_v3 = vmax.f32 %v2361_v47, 0.0  ;;  %v2305_v53 = vmul.f32 %v6071_v58, %v2248_v24 }
 0x488   :  { %v4560_v34 = vpop.eup %4559 }
 0x489   :  { %v2452_v4 = vpack.c.bf16 %v2411_v3, %v2410_v41  ;;  %v2249_v2 = vmul.f32 %v4560_v34, %v6017_v43  ;;  %v2362_v61 = vadd.f32 %v6090_v30, %v2305_v53 }
 0x48b   :  { %v2306_v9 = vmul.f32 %v6071_v58, %v2249_v2  ;;  %v2412_v55 = vmax.f32 %v2362_v61, 0.0 }
 0x48c   :  { %4304 = vmatmul.mubr.msk.bf16.gmra.mxu1 %vm1628_vm1, %v2452_v4 }
 0x48d   :  { %4307 = vmatprep.mubr.msk.bf16.mxu1 %vm4756_vm0, %v7652_v46  ;;  %v2363_v12 = vadd.f32 %v6090_v30, %v2306_v9 }
 0x48f   :  { %v2413_v40 = vmax.f32 %v2363_v12, 0.0 }
 0x491   :  { %v2453_v14 = vpack.c.bf16 %v2413_v40, %v2412_v55 }
 0x494   :  { %4308 = vmatmul.mubr.msk.bf16.gmra.mxu1 %vm1628_vm1, %v2453_v14 }
 0x495   :  { %4311 = vmatprep.mubr.msk.bf16.mxu1 %vm4756_vm0, %v7652_v46 }
 0x4bf   :  { %v1992_v43 = vpop.xlane.xlu0 %1991 }
 0x4c0   :  { %v2100_v38 = vmul.f32 0.015625, %v1992_v43 }
 0x4c2   :  { %v2150_v6 = vadd.f32 1e-05, %v2100_v38 }
 0x4c3   :  { %v1995_v1 = vpop.xlane.xlu1 %1994  ;;  %v1751_v29 = vpop.xlane.xlu0 %1750 }
 0x4c4   :  { %4561 = vrsqrt.f32 %v2150_v6  ;;  %v2101_v23 = vmul.f32 0.015625, %v1995_v1  ;;  %v1820_v13 = vmul.f32 0.015625, %v1751_v29 }
 0x4c6   :  { %v2151_v25 = vadd.f32 1e-05, %v2101_v23  ;;  %v6309_v18 = vsub.f32 %v6042_v49, %v1820_v13 }
 0x4c7   :  { %v1754_v51 = vpop.xlane.xlu1 %1753  ;;  %v1998_v44 = vpop.xlane.xlu0 %1997 }
 0x4c8   :  { %4563 = vrsqrt.f32 %v2151_v25  ;;  %v1821_v62 = vmul.f32 0.015625, %v1754_v51  ;;  %v2102_v59 = vmul.f32 0.015625, %v1998_v44  ;;  %v1920_v33 = vmul.f32 %v6309_v18, %v6309_v18 }
 0x4ca   :  { %v6314_v63 = vsub.f32 %v6053_v60, %v1821_v62  ;;  %v2152_v39 = vadd.f32 1e-05, %v2102_v59  ;;  %v2050_v7 = vsel %vm1628_vm1, %v1920_v33, 0.0 }
 0x4cb   :  { %2051 = vadd.xlane.f32.xlu0 %v2050_v7  ;;  %v1757_v11 = vpop.xlane.xlu0 %1756 }
 0x4cc   :  { %4565 = vrsqrt.f32 %v2152_v39  ;;  %v2001_v47 = vpop.xlane.xlu1 %2000  ;;  %v1822_v49 = vmul.f32 0.015625, %v1757_v11  ;;  %v1921_v24 = vmul.f32 %v6314_v63, %v6314_v63 }
 0x4cd   :  { %v2103_v41 = vmul.f32 0.015625, %v2001_v47 }
 0x4ce   :  { %v6320_v3 = vsub.f32 %v6064_v27, %v1822_v49  ;;  %v2053_v53 = vsel %vm1628_vm1, %v1921_v24, 0.0 }
 0x4cf   :  { %v2153_v34 = vadd.f32 1e-05, %v2103_v41  ;;  %2054 = vadd.xlane.f32.xlu1 %v2053_v53 }
 0x4d0   :  { %v1760_v60 = vpop.xlane.xlu1 %1759  ;;  %v2004_v4 = vpop.xlane.xlu0 %2003  ;;  %v1922_v2 = vmul.f32 %v6320_v3, %v6320_v3 }
 0x4d1   :  { %v4562_v9 = vpop.eup %4561  ;;  %4567 = vrsqrt.f32 %v2153_v34  ;;  %v1823_v61 = vmul.f32 0.015625, %v1760_v60  ;;  %v2104_v12 = vmul.f32 0.015625, %v2004_v4 }
 0x4d2   :  { %v2056_v55 = vsel %vm1628_vm1, %v1922_v2, 0.0  ;;  %v2250_v40 = vmul.f32 %v4562_v9, %v6034_v48 }
 0x4d3   :  { %v6328_v27 = vsub.f32 %v6093_v28, %v1823_v61  ;;  %v2154_v14 = vadd.f32 1e-05, %v2104_v12  ;;  %2057 = vadd.xlane.f32.xlu0 %v2056_v55 }
 0x4d4   :  { %v2007_v43 = vpop.xlane.xlu1 %2006  ;;  %v1763_v38 = vpop.xlane.xlu0 %1762  ;;  %v2307_v6 = vmul.f32 %v6071_v58, %v2250_v40 }
 0x4d5   :  { %v4564_v1 = vpop.eup %4563  ;;  %4569 = vrsqrt.f32 %v2154_v14  ;;  %v2105_v29 = vmul.f32 0.015625, %v2007_v43  ;;  %v1824_v23 = vmul.f32 0.015625, %v1763_v38  ;;  %v1923_v13 = vmul.f32 %v6328_v27, %v6328_v27 }
 0x4d6   :  { %v2251_v25 = vmul.f32 %v4564_v1, %v6039_v35  ;;  %v2364_v33 = vadd.f32 %v6090_v30, %v2307_v6 }
 0x4d7   :  { %v2155_v51 = vadd.f32 1e-05, %v2105_v29  ;;  %v6335_v48 = vsub.f32 %v6106_v54, %v1824_v23  ;;  %v2059_v28 = vsel %vm1628_vm1, %v1923_v13, 0.0 }
 0x4d8   :  { %v1766_v44 = vpop.xlane.xlu1 %1765  ;;  %2060 = vadd.xlane.f32.xlu1 %v2059_v28  ;;  %v2010_v62 = vpop.xlane.xlu0 %2009  ;;  %v2308_v59 = vmul.f32 %v6071_v58, %v2251_v25  ;;  %v2414_v60 = vmax.f32 %v2364_v33, 0.0 }
 0x4d9   :  { %v4566_v39 = vpop.eup %4565  ;;  %4571 = vrsqrt.f32 %v2155_v51  ;;  %v1825_v7 = vmul.f32 0.015625, %v1766_v44  ;;  %v2106_v11 = vmul.f32 0.015625, %v2010_v62  ;;  %v1924_v35 = vmul.f32 %v6335_v48, %v6335_v48  ;;  %v7659_v44 = vld [vmem:[#allocation6_spill] sm:$0xff] }
 0x4da   :  { %v2365_v47 = vadd.f32 %v6090_v30, %v2308_v59  ;;  %v2252_v54 = vmul.f32 %v4566_v39, %v6056_v32 }
 0x4db   :  { %v6345_v49 = vsub.f32 %v6120_v17, %v1825_v7  ;;  %v2156_v24 = vadd.f32 1e-05, %v2106_v11  ;;  %v2062_v41 = vsel %vm1628_vm1, %v1924_v35, 0.0 }
 0x4dc   :  { %v2013_v53 = vpop.xlane.xlu1 %2012  ;;  %2063 = vadd.xlane.f32.xlu0 %v2062_v41  ;;  %v1769_v34 = vpop.xlane.xlu0 %1768  ;;  %v2415_v4 = vmax.f32 %v2365_v47, 0.0  ;;  %v2309_v32 = vmul.f32 %v6071_v58, %v2252_v54 }
 0x4dd   :  { %4573 = vrsqrt.f32 %v2156_v24  ;;  %v2107_v2 = vmul.f32 0.015625, %v2013_v53  ;;  %v1826_v9 = vmul.f32 0.015625, %v1769_v34  ;;  %v1925_v61 = vmul.f32 %v6345_v49, %v6345_v49 }
 0x4de   :  { %v4568_v12 = vpop.eup %4567  ;;  %v2454_v55 = vpack.c.bf16 %v2415_v4, %v2414_v60  ;;  %v2366_v25 = vadd.f32 %v6090_v30, %v2309_v32 }
 0x4df   :  { %v2157_v17 = vadd.f32 1e-05, %v2107_v2  ;;  %v6352_v40 = vsub.f32 %v6137_v57, %v1826_v9  ;;  %v2065_v14 = vsel %vm1628_vm1, %v1925_v61, 0.0  ;;  %v2253_v43 = vmul.f32 %v4568_v12, %v6075_v15 }
 0x4e0   :  { %v1772_v38 = vpop.xlane.xlu1 %1771  ;;  %2066 = vadd.xlane.f32.xlu1 %v2065_v14  ;;  %v2016_v6 = vpop.xlane.xlu0 %2015  ;;  %4312 = vmatmul.mubr.msk.bf16.gmra.mxu1 %vm1628_vm1, %v2454_v55  ;;  %v2416_v54 = vmax.f32 %v2366_v25, 0.0 }
 0x4e1   :  { %4575 = vrsqrt.f32 %v2157_v17  ;;  %v1827_v1 = vmul.f32 0.015625, %v1772_v38  ;;  %v2108_v29 = vmul.f32 0.015625, %v2016_v6  ;;  %v1926_v23 = vmul.f32 %v6352_v40, %v6352_v40  ;;  %4315 = vmatprep.mubr.msk.bf16.mxu1 %vm4756_vm0, %v7652_v46 }
 0x4e2   :  { %v4570_v57 = vpop.eup %4569  ;;  %v2310_v13 = vmul.f32 %v6071_v58, %v2253_v43 }
 0x4e3   :  { %v6364_v15 = vsub.f32 %v6151_v36, %v1827_v1  ;;  %v2158_v51 = vadd.f32 1e-05, %v2108_v29  ;;  %v2068_v28 = vsel %vm1628_vm1, %v1926_v23, 0.0  ;;  %v2254_v62 = vmul.f32 %v4570_v57, %v7659_v44 }
 0x4e4   :  { %v2019_v59 = vpop.xlane.xlu1 %2018  ;;  %2069 = vadd.xlane.f32.xlu0 %v2068_v28  ;;  %v1775_v33 = vpop.xlane.xlu0 %1774  ;;  %v2367_v39 = vadd.f32 %v6090_v30, %v2310_v13 }
 0x4e5   :  { %4577 = vrsqrt.f32 %v2158_v51  ;;  %v2109_v7 = vmul.f32 0.015625, %v2019_v59  ;;  %v1828_v11 = vmul.f32 0.015625, %v1775_v33  ;;  %v1927_v35 = vmul.f32 %v6364_v15, %v6364_v15 }
 0x4e6   :  { %v4572_v47 = vpop.eup %4571  ;;  %v2417_v36 = vmax.f32 %v2367_v39, 0.0  ;;  %v2311_v24 = vmul.f32 %v6071_v58, %v2254_v62 }
 0x4e7   :  { %v2159_v41 = vadd.f32 1e-05, %v2109_v7  ;;  %v6373_v53 = vsub.f32 %v6168_v0, %v1828_v11  ;;  %v2071_v34 = vsel %vm1628_vm1, %v1927_v35, 0.0  ;;  %v2255_v60 = vmul.f32 %v4572_v47, %v6101_v16 }
 0x4e8   :  { %2072 = vadd.xlane.f32.xlu1 %v2071_v34  ;;  %v1778_v4 = vpop.xlane.xlu1 %1777  ;;  %v2022_v2 = vpop.xlane.xlu0 %2021  ;;  %v2455_v9 = vpack.c.bf16 %v2417_v36, %v2416_v54  ;;  %v2368_v17 = vadd.f32 %v6090_v30, %v2311_v24 }
 0x4e9   :  { %4579 = vrsqrt.f32 %v2159_v41  ;;  %v1829_v61 = vmul.f32 0.015625, %v1778_v4  ;;  %v2110_v12 = vmul.f32 0.015625, %v2022_v2  ;;  %v1928_v55 = vmul.f32 %v6373_v53, %v6373_v53 }
 0x4ea   :  { %v4574_v32 = vpop.eup %4573  ;;  %4316 = vmatmul.mubr.msk.bf16.gmra.mxu1 %vm1628_vm1, %v2455_v9  ;;  %v2312_v0 = vmul.f32 %v6071_v58, %v2255_v60 }
 0x4eb   :  { %v2256_v14 = vmul.f32 %v4574_v32, %v6115_v19  ;;  %v6384_v16 = vsub.f32 %v6182_v37, %v1829_v61  ;;  %v2160_v43 = vadd.f32 1e-05, %v2110_v12  ;;  %v2074_v38 = vsel %vm1628_vm1, %v1928_v55, 0.0  ;;  %4319 = vmatprep.mubr.msk.bf16.mxu1 %vm4756_vm0, %v7652_v46 }
 0x4ec   :  { %v2025_v6 = vpop.xlane.xlu1 %2024  ;;  %2075 = vadd.xlane.f32.xlu0 %v2074_v38  ;;  %v2369_v1 = vadd.f32 %v6090_v30, %v2312_v0  ;;  %v2418_v37 = vmax.f32 %v2368_v17, 0.0 }
 0x4ed   :  { %4581 = vrsqrt.f32 %v2160_v43  ;;  %v2111_v29 = vmul.f32 0.015625, %v2025_v6  ;;  %v1929_v23 = vmul.f32 %v6384_v16, %v6384_v16  ;;  %v2313_v19 = vmul.f32 %v6071_v58, %v2256_v14 }
 0x4ee   :  { %v4576_v57 = vpop.eup %4575  ;;  %v2419_v13 = vmax.f32 %v2369_v1, 0.0 }
 0x4ef   :  { %v2257_v25 = vmul.f32 %v4576_v57, %v6130_v52  ;;  %v2161_v51 = vadd.f32 1e-05, %v2111_v29  ;;  %v2077_v28 = vsel %vm1628_vm1, %v1929_v23, 0.0  ;;  %v2028_v44 = vpop.xlane.xlu0 %2027  ;;  %v2370_v39 = vadd.f32 %v6090_v30, %v2313_v19 }
 0x4f0   :  { %2078 = vadd.xlane.f32.xlu1 %v2077_v28  ;;  %v2112_v62 = vmul.f32 0.015625, %v2028_v44  ;;  %v2456_v59 = vpack.c.bf16 %v2419_v13, %v2418_v37 }
 0x4f1   :  { %4583 = vrsqrt.f32 %v2161_v51  ;;  %v2314_v33 = vmul.f32 %v6071_v58, %v2257_v25  ;;  %v2420_v36 = vmax.f32 %v2370_v39, 0.0 }
 0x4f2   :  { %v4578_v7 = vpop.eup %4577  ;;  %v2162_v11 = vadd.f32 1e-05, %v2112_v62  ;;  %4320 = vmatmul.mubr.msk.bf16.gmra.mxu1 %vm1628_vm1, %v2456_v59 }
 0x4f3   :  { %v2258_v35 = vmul.f32 %v4578_v7, %v6146_v50  ;;  %v2031_v47 = vpop.xlane.xlu1 %2030  ;;  %4323 = vmatprep.mubr.msk.bf16.mxu1 %vm4756_vm0, %v7652_v46  ;;  %v2371_v52 = vadd.f32 %v6090_v30, %v2314_v33 }
 0x4f4   :  { %4585 = vrsqrt.f32 %v2162_v11  ;;  %v2113_v54 = vmul.f32 0.015625, %v2031_v47 }
 0x4f5   :  { %v2421_v24 = vmax.f32 %v2371_v52, 0.0  ;;  %v2315_v41 = vmul.f32 %v6071_v58, %v2258_v35 }
 0x4f6   :  { %v4580_v34 = vpop.eup %4579  ;;  %v2163_v60 = vadd.f32 1e-05, %v2113_v54 }
 0x4f7   :  { %v2259_v4 = vmul.f32 %v4580_v34, %v6161_v10  ;;  %v2034_v2 = vpop.xlane.xlu0 %2033  ;;  %v2457_v9 = vpack.c.bf16 %v2421_v24, %v2420_v36  ;;  %v2372_v12 = vadd.f32 %v6090_v30, %v2315_v41 }
 0x4f8   :  { %4587 = vrsqrt.f32 %v2163_v60  ;;  %v2114_v50 = vmul.f32 0.015625, %v2034_v2  ;;  %v6439_v60 = vld [vmem:[%s7623_s10] ss:$0 sm:$0xff] }
 0x4f9   :  { %v2316_v61 = vmul.f32 %v6071_v58, %v2259_v4  ;;  %v2422_v43 = vmax.f32 %v2372_v12, 0.0  ;;  %v6414_v58 = vld [vmem:[%s7620_s7] ss:$0 sm:$0xff] }
 0x4fa   :  { %v4582_v55 = vpop.eup %4581  ;;  %v2164_v32 = vadd.f32 1e-05, %v2114_v50  ;;  %4324 = vmatmul.mubr.msk.bf16.gmra.mxu1 %vm1628_vm1, %v2457_v9 }
 0x4fb   :  { %v2260_v0 = vmul.f32 %v4582_v55, %v6177_v5  ;;  %v2037_v17 = vpop.xlane.xlu1 %2036  ;;  %4327 = vmatprep.mubr.msk.bf16.mxu1 %vm4756_vm0, %v7652_v46  ;;  %v2373_v10 = vadd.f32 %v6090_v30, %v2316_v61 }
 0x4fc   :  { %4589 = vrsqrt.f32 %v2164_v32  ;;  %v2115_v14 = vmul.f32 0.015625, %v2037_v17 }
 0x4fd   :  { %v2423_v38 = vmax.f32 %v2373_v10, 0.0  ;;  %v2317_v6 = vmul.f32 %v6414_v58, %v2260_v0 }
 0x4fe   :  { %v4584_v1 = vpop.eup %4583  ;;  %v2165_v29 = vadd.f32 1e-05, %v2115_v14 }
 0x4ff   :  { %v2261_v5 = vmul.f32 %v4584_v1, %v6192_v31  ;;  %v2040_v23 = vpop.xlane.xlu0 %2039  ;;  %v2458_v19 = vpack.c.bf16 %v2423_v38, %v2422_v43  ;;  %v2374_v25 = vadd.f32 %v6090_v30, %v2317_v6  ;;  %v6427_v31 = vld [vmem:[%s7621_s8] ss:$0 sm:$0xff] }
 0x500   :  { %4591 = vrsqrt.f32 %v2165_v29  ;;  %v2116_v57 = vmul.f32 0.015625, %v2040_v23 }
 0x501   :  { %v4586_v37 = vpop.eup %4585  ;;  %v2318_v13 = vmul.f32 %v6414_v58, %v2261_v5 }
 0x502   :  { %v2262_v51 = vmul.f32 %v4586_v37, %v6205_v20  ;;  %v2166_v28 = vadd.f32 1e-05, %v2116_v57  ;;  %4328 = vmatmul.mubr.msk.bf16.gmra.mxu1 %vm1628_vm1, %v2458_v19  ;;  %v2424_v20 = vmax.f32 %v2374_v25, 0.0 }
 0x503   :  { %v2043_v44 = vpop.xlane.xlu1 %2042  ;;  %4331 = vmatprep.mubr.msk.bf16.mxu1 %vm4756_vm0, %v7652_v46  ;;  %v2375_v62 = vadd.f32 %v6427_v31, %v2318_v13 }
 0x504   :  { %4593 = vrsqrt.f32 %v2166_v28  ;;  %v2117_v59 = vmul.f32 0.015625, %v2043_v44  ;;  %v2319_v30 = vmul.f32 %v6414_v58, %v2262_v51 }
 0x505   :  { %v4588_v33 = vpop.eup %4587  ;;  %v2425_v39 = vmax.f32 %v2375_v62, 0.0 }
 0x506   :  { %v2263_v7 = vmul.f32 %v4588_v33, %v6215_v8  ;;  %v2167_v11 = vadd.f32 1e-05, %v2117_v59  ;;  %v2376_v52 = vadd.f32 %v6427_v31, %v2319_v30 }
 0x507   :  { %v2046_v35 = vpop.xlane.xlu0 %2045  ;;  %v2459_v47 = vpack.c.bf16 %v2425_v39, %v2424_v20 }
 0x508   :  { %4595 = vrsqrt.f32 %v2167_v11  ;;  %v2118_v54 = vmul.f32 0.015625, %v2046_v35  ;;  %v2320_v36 = vmul.f32 %v6414_v58, %v2263_v7  ;;  %v2426_v2 = vmax.f32 %v2376_v52, 0.0 }
 0x509   :  { %v4590_v24 = vpop.eup %4589 }
 0x50a   :  { %v2264_v41 = vmul.f32 %v4590_v24, %v6226_v26  ;;  %v2168_v34 = vadd.f32 1e-05, %v2118_v54  ;;  %4332 = vmatmul.mubr.msk.bf16.gmra.mxu1 %vm1628_vm1, %v2459_v47  ;;  %v2377_v8 = vadd.f32 %v6427_v31, %v2320_v36 }
 0x50b   :  { %v2049_v4 = vpop.xlane.xlu1 %2048  ;;  %4335 = vmatprep.mubr.msk.bf16.mxu1 %vm4756_vm0, %v7652_v46 }
 0x50c   :  { %4597 = vrsqrt.f32 %v2168_v34  ;;  %v2119_v9 = vmul.f32 0.015625, %v2049_v4  ;;  %v2617_v50 = vpop.f32.mrf.mxu1  ;;  %v2427_v26 = vmax.f32 %v2377_v8, 0.0  ;;  %v2321_v61 = vmul.f32 %v6414_v58, %v2264_v41 }
 0x50d   :  { %v4592_v12 = vpop.eup %4591  ;;  %v6446_v55 = vadd.f32 %v6439_v60, %v2617_v50 }
 0x50e   :  { %v2265_v32 = vmul.f32 %v4592_v12, %v6236_v22  ;;  %v2169_v0 = vadd.f32 1e-05, %v2119_v9  ;;  %v4273_v17 = vpop.f32.mrf.mxu1  ;;  %v2460_v10 = vpack.c.bf16 %v2427_v26, %v2426_v2  ;;  %v2378_v6 = vadd.f32 %v6427_v31, %v2321_v61 }
 0x50f   :  { %v2817_v14 = vsel %vm2816_vm2, %v6446_v55, 0.0 }
 0x510   :  { %4599 = vrsqrt.f32 %v2169_v0  ;;  %v2620_v43 = vpop.f32.mrf.mxu1  ;;  %2818 = vadd.xlane.f32.xlu0 %v2817_v14  ;;  %v2322_v38 = vmul.f32 %v6414_v58, %v2265_v32  ;;  %v2428_v37 = vmax.f32 %v2378_v6, 0.0 }
 0x511   :  { %v4594_v1 = vpop.eup %4593  ;;  %v6454_v29 = vadd.f32 %v6439_v60, %v2620_v43 }
 0x512   :  { %v2266_v5 = vmul.f32 %v4594_v1, %v6247_v56  ;;  %4336 = vmatmul.mubr.msk.bf16.gmra.mxu1 %vm1628_vm1, %v2460_v10  ;;  %v4274_v22 = vpop.f32.mrf.mxu1  ;;  %v2379_v23 = vadd.f32 %v6427_v31, %v2322_v38 }
 0x513   :  { %v2820_v19 = vsel %vm2816_vm2, %v6454_v29, 0.0  ;;  %4339 = vmatprep.mubr.msk.bf16.mxu1 %vm4756_vm0, %v7652_v46 }
 0x514   :  { %2821 = vadd.xlane.f32.xlu1 %v2820_v19  ;;  %v2625_v57 = vpop.f32.mrf.mxu1  ;;  %v2429_v13 = vmax.f32 %v2379_v23, 0.0  ;;  %v2323_v25 = vmul.f32 %v6414_v58, %v2266_v5 }
 0x515   :  { %v4596_v51 = vpop.eup %4595  ;;  %v6465_v56 = vadd.f32 %v6439_v60, %v2625_v57 }
 0x516   :  { %v2267_v28 = vmul.f32 %v4596_v51, %v6257_v45  ;;  %v4277_v44 = vpop.f32.mrf.mxu1  ;;  %v2461_v62 = vpack.c.bf16 %v2429_v13, %v2428_v37  ;;  %v2380_v20 = vadd.f32 %v6427_v31, %v2323_v25 }
 0x517   :  { %v2823_v59 = vsel %vm2816_vm2, %v6465_v56, 0.0 }
 0x518   :  { %v2628_v30 = vpop.f32.mrf.mxu1  ;;  %2824 = vadd.xlane.f32.xlu0 %v2823_v59  ;;  %v2324_v33 = vmul.f32 %v6414_v58, %v2267_v28  ;;  %v2430_v54 = vmax.f32 %v2380_v20, 0.0 }
 0x519   :  { %v4598_v39 = vpop.eup %4597  ;;  %v6473_v7 = vadd.f32 %v6439_v60, %v2628_v30 }
 0x51a   :  { %v2268_v11 = vmul.f32 %v4598_v39, %v6268_v42  ;;  %4340 = vmatmul.mubr.msk.bf16.gmra.mxu1 %vm1628_vm1, %v2461_v62  ;;  %v4278_v45 = vpop.f32.mrf.mxu1  ;;  %v2381_v35 = vadd.f32 %v6427_v31, %v2324_v33 }
 0x51b   :  { %v2826_v47 = vsel %vm2816_vm2, %v6473_v7, 0.0  ;;  %4343 = vmatprep.mubr.msk.bf16.mxu1 %vm4756_vm0, %v7652_v46 }
 0x51c   :  { %2827 = vadd.xlane.f32.xlu1 %v2826_v47  ;;  %v2633_v52 = vpop.f32.mrf.mxu1  ;;  %v2431_v36 = vmax.f32 %v2381_v35, 0.0  ;;  %v2325_v24 = vmul.f32 %v6414_v58, %v2268_v11 }
 0x51d   :  { %v4600_v41 = vpop.eup %4599  ;;  %v6484_v42 = vadd.f32 %v6439_v60, %v2633_v52 }
 0x51e   :  { %v2269_v34 = vmul.f32 %v4600_v41, %v6278_v21  ;;  %v4281_v8 = vpop.f32.mrf.mxu1  ;;  %v2462_v4 = vpack.c.bf16 %v2431_v36, %v2430_v54  ;;  %v2382_v26 = vadd.f32 %v6427_v31, %v2325_v24 }
 0x51f   :  { %v2829_v2 = vsel %vm2816_vm2, %v6484_v42, 0.0 }
 0x520   :  { %v2636_v9 = vpop.f32.mrf.mxu1  ;;  %2830 = vadd.xlane.f32.xlu0 %v2829_v2  ;;  %v2326_v50 = vmul.f32 %v6414_v58, %v2269_v34  ;;  %v2432_v17 = vmax.f32 %v2382_v26, 0.0 }
 0x521   :  { %v6492_v61 = vadd.f32 %v6439_v60, %v2636_v9 }
 0x522   :  { %4344 = vmatmul.mubr.msk.bf16.gmra.mxu1 %vm1628_vm1, %v2462_v4  ;;  %v4282_v12 = vpop.f32.mrf.mxu1  ;;  %v2383_v32 = vadd.f32 %v6427_v31, %v2326_v50 }
 0x523   :  { %v2832_v21 = vsel %vm2816_vm2, %v6492_v61, 0.0  ;;  %4347 = vmatprep.mubr.msk.bf16.mxu1 %vm4756_vm0, %v7652_v46 }
 0x524   :  { %2833 = vadd.xlane.f32.xlu1 %v2832_v21  ;;  %v2641_v0 = vpop.f32.mrf.mxu1  ;;  %v2433_v10 = vmax.f32 %v2383_v32, 0.0 }
 0x525   :  { %v6501_v14 = vadd.f32 %v6439_v60, %v2641_v0 }
 0x526   :  { %v4285_v43 = vpop.f32.mrf.mxu1  ;;  %v2463_v38 = vpack.c.bf16 %v2433_v10, %v2432_v17 }
 0x527   :  { %v2835_v6 = vsel %vm2816_vm2, %v6501_v14, 0.0 }
 0x528   :  { %v2644_v1 = vpop.f32.mrf.mxu1  ;;  %2836 = vadd.xlane.f32.xlu0 %v2835_v6 }
 0x529   :  { %v6506_v5 = vadd.f32 %v6439_v60, %v2644_v1 }
 0x52a   :  { %4348 = vmatmul.mubr.msk.bf16.gmra.mxu1 %vm1628_vm1, %v2463_v38  ;;  %v4286_v22 = vpop.f32.mrf.mxu1 }
 0x52b   :  { %v2838_v23 = vsel %vm2816_vm2, %v6506_v5, 0.0  ;;  %4351 = vmatprep.mubr.msk.bf16.mxu1 %vm4756_vm0, %v7652_v46 }
 0x52c   :  { %2839 = vadd.xlane.f32.xlu1 %v2838_v23  ;;  %v2649_v19 = vpop.f32.mrf.mxu1 }
 0x52d   :  { %v6514_v57 = vadd.f32 %v6439_v60, %v2649_v19 }
 0x52e   :  { %v4289_v37 = vpop.f32.mrf.mxu1 }
 0x52f   :  { %v2841_v13 = vsel %vm2816_vm2, %v6514_v57, 0.0 }
 0x530   :  { %v2652_v25 = vpop.f32.mrf.mxu1  ;;  %2842 = vadd.xlane.f32.xlu0 %v2841_v13 }
 0x531   :  { %v6519_v51 = vadd.f32 %v6439_v60, %v2652_v25 }
 0x532   :  { %v4290_v28 = vpop.f32.mrf.mxu1 }
 0x533   :  { %v2844_v44 = vsel %vm2816_vm2, %v6519_v51, 0.0 }
 0x534   :  { %2845 = vadd.xlane.f32.xlu1 %v2844_v44  ;;  %v2657_v62 = vpop.f32.mrf.mxu1 }
 0x535   :  { %v6524_v59 = vadd.f32 %v6439_v60, %v2657_v62 }
 0x536   :  { %v4293_v30 = vpop.f32.mrf.mxu1 }
 0x537   :  { %v2847_v33 = vsel %vm2816_vm2, %v6524_v59, 0.0 }
 0x538   :  { %v2660_v20 = vpop.f32.mrf.mxu1  ;;  %2848 = vadd.xlane.f32.xlu0 %v2847_v33 }
 0x539   :  { %v6529_v39 = vadd.f32 %v6439_v60, %v2660_v20 }
 0x53a   :  { %v4294_v11 = vpop.f32.mrf.mxu1 }
 0x53b   :  { %v2850_v45 = vsel %vm2816_vm2, %v6529_v39, 0.0 }
 0x53c   :  { %2851 = vadd.xlane.f32.xlu1 %v2850_v45  ;;  %v2665_v35 = vpop.f32.mrf.mxu1 }
 0x53d   :  { %v6534_v47 = vadd.f32 %v6439_v60, %v2665_v35 }
 0x53e   :  { %v4297_v52 = vpop.f32.mrf.mxu1 }
 0x53f   :  { %v2853_v54 = vsel %vm2816_vm2, %v6534_v47, 0.0 }
 0x540   :  { %v2668_v36 = vpop.f32.mrf.mxu1  ;;  %2854 = vadd.xlane.f32.xlu0 %v2853_v54 }
 0x541   :  { %v6539_v24 = vadd.f32 %v6439_v60, %v2668_v36 }
 0x542   :  { %v4298_v41 = vpop.f32.mrf.mxu1 }
 0x543   :  { %v2856_v34 = vsel %vm2816_vm2, %v6539_v24, 0.0 }
 0x544   :  { %2857 = vadd.xlane.f32.xlu1 %v2856_v34  ;;  %v2673_v8 = vpop.f32.mrf.mxu1 }
 0x545   :  { %v6544_v4 = vadd.f32 %v6439_v60, %v2673_v8 }
 0x546   :  { %v4301_v2 = vpop.f32.mrf.mxu1 }
 0x547   :  { %v2859_v9 = vsel %vm2816_vm2, %v6544_v4, 0.0 }
 0x548   :  { %v2676_v50 = vpop.f32.mrf.mxu1  ;;  %2860 = vadd.xlane.f32.xlu0 %v2859_v9 }
 0x549   :  { %v6549_v26 = vadd.f32 %v6439_v60, %v2676_v50 }
 0x54a   :  { %v4302_v12 = vpop.f32.mrf.mxu1 }
 0x54b   :  { %v2862_v32 = vsel %vm2816_vm2, %v6549_v26, 0.0 }
 0x54c   :  { %2863 = vadd.xlane.f32.xlu1 %v2862_v32  ;;  %v2681_v21 = vpop.f32.mrf.mxu1 }
 0x54d   :  { %v6554_v0 = vadd.f32 %v6439_v60, %v2681_v21 }
 0x54e   :  { %v4305_v17 = vpop.f32.mrf.mxu1 }
 0x54f   :  { %v2865_v10 = vsel %vm2816_vm2, %v6554_v0, 0.0 }
 0x550   :  { %v2684_v43 = vpop.f32.mrf.mxu1  ;;  %2866 = vadd.xlane.f32.xlu0 %v2865_v10 }
 0x551   :  { %v6559_v38 = vadd.f32 %v6439_v60, %v2684_v43 }
 0x552   :  { %v4306_v6 = vpop.f32.mrf.mxu1 }
 0x553   :  { %v2868_v1 = vsel %vm2816_vm2, %v6559_v38, 0.0 }
 0x554   :  { %2869 = vadd.xlane.f32.xlu1 %v2868_v1  ;;  %v2689_v22 = vpop.f32.mrf.mxu1  ;;  %v2052_v23 = vpop.xlane.xlu0 %2051 }
 0x555   :  { %v6564_v19 = vadd.f32 %v6439_v60, %v2689_v22  ;;  %v2120_v37 = vmul.f32 0.015625, %v2052_v23 }
 0x556   :  { %v4309_v13 = vpop.f32.mrf.mxu1 }
 0x557   :  { %v2170_v25 = vadd.f32 1e-05, %v2120_v37  ;;  %v2871_v28 = vsel %vm2816_vm2, %v6564_v19, 0.0 }
 0x558   :  { %v2692_v44 = vpop.f32.mrf.mxu1  ;;  %2872 = vadd.xlane.f32.xlu0 %v2871_v28  ;;  %v2055_v62 = vpop.xlane.xlu1 %2054 }
 0x559   :  { %4601 = vrsqrt.f32 %v2170_v25  ;;  %v6569_v30 = vadd.f32 %v6439_v60, %v2692_v44  ;;  %v2121_v33 = vmul.f32 0.015625, %v2055_v62 }
 0x55a   :  { %v4310_v20 = vpop.f32.mrf.mxu1 }
 0x55b   :  { %v2171_v11 = vadd.f32 1e-05, %v2121_v33  ;;  %v2874_v45 = vsel %vm2816_vm2, %v6569_v30, 0.0 }
 0x55c   :  { %2875 = vadd.xlane.f32.xlu1 %v2874_v45  ;;  %v2058_v35 = vpop.xlane.xlu0 %2057 }
 0x55d   :  { %4603 = vrsqrt.f32 %v2171_v11  ;;  %v2122_v52 = vmul.f32 0.015625, %v2058_v35 }
 0x55f   :  { %v2172_v54 = vadd.f32 1e-05, %v2122_v52 }
 0x561   :  { %4605 = vrsqrt.f32 %v2172_v54  ;;  %v2061_v36 = vpop.xlane.xlu1 %2060 }
 0x562   :  { %v2123_v41 = vmul.f32 0.015625, %v2061_v36 }
 0x564   :  { %v2173_v34 = vadd.f32 1e-05, %v2123_v41 }
 0x565   :  { %v2064_v8 = vpop.xlane.xlu0 %2063 }
 0x566   :  { %v4602_v2 = vpop.eup %4601  ;;  %4607 = vrsqrt.f32 %v2173_v34  ;;  %v2124_v9 = vmul.f32 0.015625, %v2064_v8 }
 0x567   :  { %v2270_v50 = vmul.f32 %v4602_v2, %v6309_v18 }
 0x568   :  { %v2174_v12 = vadd.f32 1e-05, %v2124_v9 }
 0x569   :  { %v2067_v32 = vpop.xlane.xlu1 %2066  ;;  %v2327_v21 = vmul.f32 %v6414_v58, %v2270_v50 }
 0x56a   :  { %v4604_v17 = vpop.eup %4603  ;;  %4609 = vrsqrt.f32 %v2174_v12  ;;  %v2125_v10 = vmul.f32 0.015625, %v2067_v32 }
 0x56b   :  { %v2271_v43 = vmul.f32 %v4604_v17, %v6314_v63  ;;  %v2384_v23 = vadd.f32 %v6427_v31, %v2327_v21 }
 0x56c   :  { %v2175_v6 = vadd.f32 1e-05, %v2125_v10 }
 0x56d   :  { %v2070_v1 = vpop.xlane.xlu0 %2069  ;;  %v2328_v22 = vmul.f32 %v6414_v58, %v2271_v43  ;;  %v2434_v62 = vmax.f32 %v2384_v23, 0.0 }
 0x56e   :  { %v4606_v37 = vpop.eup %4605  ;;  %4611 = vrsqrt.f32 %v2175_v6  ;;  %v2126_v13 = vmul.f32 0.015625, %v2070_v1 }
 0x56f   :  { %v2272_v18 = vmul.f32 %v4606_v37, %v6320_v3  ;;  %v2385_v25 = vadd.f32 %v6427_v31, %v2328_v22 }
 0x570   :  { %v2176_v28 = vadd.f32 1e-05, %v2126_v13 }
 0x571   :  { %v2073_v44 = vpop.xlane.xlu1 %2072  ;;  %v2435_v33 = vmax.f32 %v2385_v25, 0.0  ;;  %v2329_v20 = vmul.f32 %v6414_v58, %v2272_v18 }
 0x572   :  { %4613 = vrsqrt.f32 %v2176_v28  ;;  %v2127_v63 = vmul.f32 0.015625, %v2073_v44 }
 0x573   :  { %v4608_v11 = vpop.eup %4607  ;;  %v2464_v45 = vpack.c.bf16 %v2435_v33, %v2434_v62  ;;  %v2386_v3 = vadd.f32 %v6427_v31, %v2329_v20 }
 0x574   :  { %v2273_v35 = vmul.f32 %v4608_v11, %v6328_v27  ;;  %v2177_v52 = vadd.f32 1e-05, %v2127_v63 }
 0x575   :  { %v2076_v54 = vpop.xlane.xlu0 %2075  ;;  %4352 = vmatmul.mubr.msk.bf16.gmra.mxu1 %vm1628_vm1, %v2464_v45  ;;  %v2436_v50 = vmax.f32 %v2386_v3, 0.0 }
 0x576   :  { %4615 = vrsqrt.f32 %v2177_v52  ;;  %v2128_v36 = vmul.f32 0.015625, %v2076_v54  ;;  %4355 = vmatprep.mubr.msk.bf16.mxu1 %vm4756_vm0, %v7652_v46  ;;  %v2330_v41 = vmul.f32 %v6414_v58, %v2273_v35 }
 0x577   :  { %v4610_v34 = vpop.eup %4609 }
 0x578   :  { %v2274_v8 = vmul.f32 %v4610_v34, %v6335_v48  ;;  %v2178_v2 = vadd.f32 1e-05, %v2128_v36  ;;  %v2387_v9 = vadd.f32 %v6427_v31, %v2330_v41 }
 0x579   :  { %v2079_v27 = vpop.xlane.xlu1 %2078 }
 0x57a   :  { %4617 = vrsqrt.f32 %v2178_v2  ;;  %v2129_v12 = vmul.f32 0.015625, %v2079_v27  ;;  %v2437_v32 = vmax.f32 %v2387_v9, 0.0  ;;  %v2331_v21 = vmul.f32 %v6414_v58, %v2274_v8 }
 0x57b   :  { %v4612_v17 = vpop.eup %4611 }
 0x57c   :  { %v2275_v10 = vmul.f32 %v4612_v17, %v6345_v49  ;;  %v2179_v43 = vadd.f32 1e-05, %v2129_v12  ;;  %v2465_v6 = vpack.c.bf16 %v2437_v32, %v2436_v50  ;;  %v2388_v1 = vadd.f32 %v6427_v31, %v2331_v21 }
 0x57e   :  { %4619 = vrsqrt.f32 %v2179_v43  ;;  %4356 = vmatmul.mubr.msk.bf16.gmra.mxu1 %vm1628_vm1, %v2465_v6  ;;  %v2332_v48 = vmul.f32 %v6414_v58, %v2275_v10  ;;  %v2438_v13 = vmax.f32 %v2388_v1, 0.0 }
 0x57f   :  { %v4614_v22 = vpop.eup %4613  ;;  %4359 = vmatprep.mubr.msk.bf16.mxu1 %vm4756_vm0, %v7652_v46 }
 0x580   :  { %v2276_v23 = vmul.f32 %v4614_v22, %v6352_v40  ;;  %v2389_v37 = vadd.f32 %v6427_v31, %v2332_v48 }
 0x582   :  { %v2439_v18 = vmax.f32 %v2389_v37, 0.0  ;;  %v2333_v49 = vmul.f32 %v6414_v58, %v2276_v23 }
 0x583   :  { %v4616_v25 = vpop.eup %4615 }
 0x584   :  { %v2277_v28 = vmul.f32 %v4616_v25, %v6364_v15  ;;  %v2466_v44 = vpack.c.bf16 %v2439_v18, %v2438_v13  ;;  %v2390_v33 = vadd.f32 %v6427_v31, %v2333_v49 }
 0x586   :  { %4360 = vmatmul.mubr.msk.bf16.gmra.mxu1 %vm1628_vm1, %v2466_v44  ;;  %v2334_v62 = vmul.f32 %v6414_v58, %v2277_v28  ;;  %v2440_v11 = vmax.f32 %v2390_v33, 0.0 }
 0x587   :  { %v4618_v20 = vpop.eup %4617  ;;  %4363 = vmatprep.mubr.msk.bf16.mxu1 %vm4756_vm0, %v7652_v46 }
 0x588   :  { %v2278_v40 = vmul.f32 %v4618_v20, %v6373_v53  ;;  %v2391_v63 = vadd.f32 %v6427_v31, %v2334_v62 }
 0x58a   :  { %v2441_v45 = vmax.f32 %v2391_v63, 0.0  ;;  %v2335_v35 = vmul.f32 %v6414_v58, %v2278_v40 }
 0x58b   :  { %v4620_v15 = vpop.eup %4619 }
 0x58c   :  { %v2279_v52 = vmul.f32 %v4620_v15, %v6384_v16  ;;  %v2467_v54 = vpack.c.bf16 %v2441_v45, %v2440_v11  ;;  %v2392_v36 = vadd.f32 %v6427_v31, %v2335_v35 }
 0x58e   :  { %4364 = vmatmul.mubr.msk.bf16.gmra.mxu1 %vm1628_vm1, %v2467_v54  ;;  %v2336_v3 = vmul.f32 %v6414_v58, %v2279_v52  ;;  %v2442_v41 = vmax.f32 %v2392_v36, 0.0 }
 0x58f   :  { %4367 = vmatprep.mubr.msk.bf16.mxu1 %vm4756_vm0, %v7652_v46 }
 0x590   :  { %v2393_v53 = vadd.f32 %v6427_v31, %v2336_v3 }
 0x592   :  { %v2443_v34 = vmax.f32 %v2393_v53, 0.0 }
 0x594   :  { %v2468_v8 = vpack.c.bf16 %v2443_v34, %v2442_v41 }
 0x596   :  { %4368 = vmatmul.mubr.msk.bf16.gmra.mxu1 %vm1628_vm1, %v2468_v8 }
 0x5a0   :  { %v2697_v2 = vpop.f32.mrf.mxu1 }
 0x5a1   :  { %v6617_v16 = vadd.f32 %v6439_v60, %v2697_v2 }
 0x5a2   :  { %v4313_v9 = vpop.f32.mrf.mxu1 }
 0x5a3   :  { %v2877_v58 = vsel %vm2816_vm2, %v6617_v16, 0.0 }
 0x5a4   :  { %v2700_v27 = vpop.f32.mrf.mxu1  ;;  %2878 = vadd.xlane.f32.xlu0 %v2877_v58 }
 0x5a5   :  { %v6622_v50 = vadd.f32 %v6439_v60, %v2700_v27 }
 0x5a6   :  { %v4314_v46 = vpop.f32.mrf.mxu1 }
 0x5a7   :  { %v2880_v31 = vsel %vm2816_vm2, %v6622_v50, 0.0 }
 0x5a8   :  { %2881 = vadd.xlane.f32.xlu1 %v2880_v31 }
 0x5aa   :  { %v2705_v12 = vpop.f32.mrf.mxu1 }
 0x5ab   :  { %v6627_v32 = vadd.f32 %v6439_v60, %v2705_v12 }
 0x5ac   :  { %v4317_v21 = vpop.f32.mrf.mxu1 }
 0x5ad   :  { %v2883_v17 = vsel %vm2816_vm2, %v6627_v32, 0.0 }
 0x5ae   :  { %v2708_v10 = vpop.f32.mrf.mxu1  ;;  %2884 = vadd.xlane.f32.xlu0 %v2883_v17 }
 0x5af   :  { %v6632_v43 = vadd.f32 %v6439_v60, %v2708_v10 }
 0x5b0   :  { %v4318_v6 = vpop.f32.mrf.mxu1 }
 0x5b1   :  { %v2886_v48 = vsel %vm2816_vm2, %v6632_v43, 0.0 }
 0x5b2   :  { %2887 = vadd.xlane.f32.xlu1 %v2886_v48  ;;  %v2713_v1 = vpop.f32.mrf.mxu1 }
 0x5b3   :  { %v6637_v22 = vadd.f32 %v6439_v60, %v2713_v1  ;;  %v2819_v1 = vpop.xlane.xlu0 %2818 }
 0x5b4   :  { %v4321_v23 = vpop.f32.mrf.mxu1 }
 0x5b5   :  { %v2889_v37 = vsel %vm2816_vm2, %v6637_v22, 0.0 }
 0x5b6   :  { %v2716_v13 = vpop.f32.mrf.mxu1  ;;  %2890 = vadd.xlane.f32.xlu0 %v2889_v37 }
 0x5b7   :  { %v6642_v18 = vadd.f32 %v6439_v60, %v2716_v13 }
 0x5b8   :  { %v4322_v49 = vpop.f32.mrf.mxu1 }
 0x5b9   :  { %v2892_v25 = vsel %vm2816_vm2, %v6642_v18, 0.0  ;;  %v2968_v49 = vmul.f32 0.03125, %v2819_v1 }
 0x5ba   :  { %2893 = vadd.xlane.f32.xlu1 %v2892_v25  ;;  %v2721_v28 = vpop.f32.mrf.mxu1 }
 0x5bb   :  { %v6647_v44 = vadd.f32 %v6439_v60, %v2721_v28 }
 0x5bc   :  { %v4325_v62 = vpop.f32.mrf.mxu1 }
 0x5bd   :  { %v2895_v33 = vsel %vm2816_vm2, %v6647_v44, 0.0  ;;  %v2822_v62 = vpop.xlane.xlu1 %2821 }
 0x5be   :  { %v2724_v20 = vpop.f32.mrf.mxu1  ;;  %2896 = vadd.xlane.f32.xlu0 %v2895_v33 }
 0x5bf   :  { %v6652_v40 = vadd.f32 %v6439_v60, %v2724_v20 }
 0x5c0   :  { %v4326_v63 = vpop.f32.mrf.mxu1 }
 0x5c1   :  { %v2898_v11 = vsel %vm2816_vm2, %v6652_v40, 0.0  ;;  %v6695_v63 = vsub.f32 %v6446_v55, %v2968_v49 }
 0x5c2   :  { %2899 = vadd.xlane.f32.xlu1 %v2898_v11  ;;  %v2729_v45 = vpop.f32.mrf.mxu1 }
 0x5c3   :  { %v6657_v35 = vadd.f32 %v6439_v60, %v2729_v45  ;;  %v2969_v45 = vmul.f32 0.03125, %v2822_v62 }
 0x5c4   :  { %v4329_v15 = vpop.f32.mrf.mxu1 }
 0x5c5   :  { %v2901_v52 = vsel %vm2816_vm2, %v6657_v35, 0.0 }
 0x5c6   :  { %v2732_v54 = vpop.f32.mrf.mxu1  ;;  %2902 = vadd.xlane.f32.xlu0 %v2901_v52  ;;  %v2825_v52 = vpop.xlane.xlu0 %2824 }
 0x5c7   :  { %v6662_v3 = vadd.f32 %v6439_v60, %v2732_v54  ;;  %v2970_v55 = vmul.f32 0.03125, %v2825_v52 }
 0x5c8   :  { %v4330_v36 = vpop.f32.mrf.mxu1 }
 0x5c9   :  { %v2904_v53 = vsel %vm2816_vm2, %v6662_v3, 0.0 }
 0x5ca   :  { %2905 = vadd.xlane.f32.xlu1 %v2904_v53  ;;  %v2737_v41 = vpop.f32.mrf.mxu1 }
 0x5cb   :  { %v6667_v34 = vadd.f32 %v6439_v60, %v2737_v41  ;;  %v3068_v41 = vmul.f32 %v6695_v63, %v6695_v63 }
 0x5cc   :  { %v4333_v8 = vpop.f32.mrf.mxu1 }
 0x5cd   :  { %v2907_v2 = vsel %vm2816_vm2, %v6667_v34, 0.0  ;;  %v6705_v8 = vsub.f32 %v6454_v29, %v2969_v45 }
 0x5ce   :  { %2908 = vadd.xlane.f32.xlu0 %v2907_v2  ;;  %v2740_v9 = vpop.f32.mrf.mxu1 }
 0x5cf   :  { %v6672_v58 = vadd.f32 %v6439_v60, %v2740_v9  ;;  %v2828_v9 = vpop.xlane.xlu1 %2827 }
 0x5d0   :  { %v4334_v27 = vpop.f32.mrf.mxu1 }
 0x5d1   :  { %v2910_v46 = vsel %vm2816_vm2, %v6672_v58, 0.0 }
 0x5d2   :  { %2911 = vadd.xlane.f32.xlu1 %v2910_v46  ;;  %v2745_v31 = vpop.f32.mrf.mxu1 }
 0x5d3   :  { %v6677_v12 = vadd.f32 %v6439_v60, %v2745_v31 }
 0x5d4   :  { %v4337_v21 = vpop.f32.mrf.mxu1 }
 0x5d5   :  { %v2913_v17 = vsel %vm2816_vm2, %v6677_v12, 0.0  ;;  %v3118_v21 = vsel %vm2816_vm2, %v3068_v41, 0.0  ;;  %v2834_v41 = vpop.xlane.xlu1 %2833 }
 0x5d6   :  { %2914 = vadd.xlane.f32.xlu0 %v2913_v17  ;;  %v2748_v10 = vpop.f32.mrf.mxu1  ;;  %v6714_v17 = vsub.f32 %v6465_v56, %v2970_v55 }
 0x5d7   :  { %v6682_v6 = vadd.f32 %v6439_v60, %v2748_v10  ;;  %v2971_v10 = vmul.f32 0.03125, %v2828_v9 }
 0x5d8   :  { %v4338_v48 = vpop.f32.mrf.mxu1 }
 0x5d9   :  { %v2916_v23 = vsel %vm2816_vm2, %v6682_v6, 0.0  ;;  %v3069_v48 = vmul.f32 %v6705_v8, %v6705_v8  ;;  %v6724_v49 = vsub.f32 %v6473_v7, %v2971_v10 }
 0x5da   :  { %2917 = vadd.xlane.f32.xlu1 %v2916_v23  ;;  %v2753_v37 = vpop.f32.mrf.mxu1 }
 0x5db   :  { %v6687_v13 = vadd.f32 %v6439_v60, %v2753_v37  ;;  %v3121_v56 = vsel %vm2816_vm2, %v3069_v48, 0.0 }
 0x5dc   :  { %v4341_v25 = vpop.f32.mrf.mxu1 }
 0x5dd   :  { %v2919_v28 = vsel %vm2816_vm2, %v6687_v13, 0.0 }
 0x5de   :  { %2920 = vadd.xlane.f32.xlu0 %v2919_v28  ;;  %v2756_v33 = vpop.f32.mrf.mxu1  ;;  %v3070_v28 = vmul.f32 %v6714_v17, %v6714_v17 }
 0x5df   :  { %v6692_v20 = vadd.f32 %v6439_v60, %v2756_v33 }
 0x5e0   :  { %v4342_v11 = vpop.f32.mrf.mxu1  ;;  %v3124_v7 = vsel %vm2816_vm2, %v3070_v28, 0.0 }
 0x5e1   :  { %v2922_v15 = vsel %vm2816_vm2, %v6692_v20, 0.0 }
 0x5e2   :  { %2923 = vadd.xlane.f32.xlu1 %v2922_v15  ;;  %v2761_v54 = vpop.f32.mrf.mxu1  ;;  %v3071_v15 = vmul.f32 %v6724_v49, %v6724_v49 }
 0x5e3   :  { %v6700_v36 = vadd.f32 %v6439_v60, %v2761_v54  ;;  %v2831_v54 = vpop.xlane.xlu0 %2830 }
 0x5e4   :  { %v4345_v53 = vpop.f32.mrf.mxu1  ;;  %v3127_v52 = vsel %vm2816_vm2, %v3071_v15, 0.0 }
 0x5e5   :  { %v2925_v2 = vsel %vm2816_vm2, %v6700_v36, 0.0  ;;  %v2972_v53 = vmul.f32 0.03125, %v2831_v54 }
 0x5e6   :  { %2926 = vadd.xlane.f32.xlu0 %v2925_v2  ;;  %v2764_v27 = vpop.f32.mrf.mxu1  ;;  %v2973_v2 = vmul.f32 0.03125, %v2834_v41 }
 0x5e7   :  { %v6710_v46 = vadd.f32 %v6439_v60, %v2764_v27  ;;  %v6741_v55 = vsub.f32 %v6484_v42, %v2972_v53  ;;  %v2837_v9 = vpop.xlane.xlu0 %2836  ;;  %v2840_v42 = vpop.xlane.xlu1 %2839 }
 0x5e8   :  { %v4346_v31 = vpop.f32.mrf.mxu1  ;;  %v6747_v10 = vsub.f32 %v6492_v61, %v2973_v2 }
 0x5e9   :  { %v2928_v29 = vsel %vm2816_vm2, %v6710_v46, 0.0 }
 0x5ea   :  { %2929 = vadd.xlane.f32.xlu1 %v2928_v29  ;;  %v2769_v1 = vpop.f32.mrf.mxu1  ;;  %3119 = vadd.xlane.f32.xlu0 %v3118_v21  ;;  %v2974_v29 = vmul.f32 0.03125, %v2837_v9 }
 0x5eb   :  { %v6721_v23 = vadd.f32 %v6439_v60, %v2769_v1  ;;  %v3072_v1 = vmul.f32 %v6741_v55, %v6741_v55 }
 0x5ec   :  { %v4349_v37 = vpop.f32.mrf.mxu1  ;;  %v6757_v28 = vsub.f32 %v6501_v14, %v2974_v29 }
 0x5ed   :  { %v2931_v25 = vsel %vm2816_vm2, %v6721_v23, 0.0 }
 0x5ee   :  { %3122 = vadd.xlane.f32.xlu1 %v3121_v56  ;;  %v2772_v62 = vpop.f32.mrf.mxu1  ;;  %2932 = vadd.xlane.f32.xlu0 %v2931_v25  ;;  %7660 = vst [vmem:[#allocation7_spill] sm:$0xff] %v6757_v28  ;;  %v3074_v53 = vmul.f32 %v6757_v28, %v6757_v28 }
 0x5ef   :  { %v6732_v33 = vadd.f32 %v6439_v60, %v2772_v62  ;;  %v3130_v62 = vsel %vm2816_vm2, %v3072_v1, 0.0 }
 0x5f0   :  { %v4350_v11 = vpop.f32.mrf.mxu1  ;;  %v3136_v1 = vsel %vm2816_vm2, %v3074_v53, 0.0 }
 0x5f1   :  { %v2934_v45 = vsel %vm2816_vm2, %v6732_v33, 0.0  ;;  %v3073_v11 = vmul.f32 %v6747_v10, %v6747_v10 }
 0x5f2   :  { %2935 = vadd.xlane.f32.xlu1 %v2934_v45  ;;  %3125 = vadd.xlane.f32.xlu0 %v3124_v7  ;;  %v2975_v45 = vmul.f32 0.03125, %v2840_v42  ;;  %v2843_v7 = vpop.xlane.xlu0 %2842 }
 0x5f3   :  { %v3133_v14 = vsel %vm2816_vm2, %v3073_v11, 0.0  ;;  %v2976_v2 = vmul.f32 0.03125, %v2843_v7 }
 0x5f4   :  { %v6771_v41 = vsub.f32 %v6506_v5, %v2975_v45 }
 0x5f6   :  { %3128 = vadd.xlane.f32.xlu1 %v3127_v52  ;;  %7661 = vst [vmem:[#allocation8_spill] sm:$0xff] %v6771_v41 }
 0x635   :  { %v2777_v27 = vpop.f32.mrf.mxu1 }
 0x636   :  { %v6744_v31 = vadd.f32 %v6439_v60, %v2777_v27  ;;  %v2846_v27 = vpop.xlane.xlu1 %2845 }
 0x637   :  { %v4353_v21 = vpop.f32.mrf.mxu1  ;;  %v2977_v42 = vmul.f32 0.03125, %v2846_v27 }
 0x638   :  { %v2937_v48 = vsel %vm2816_vm2, %v6744_v31, 0.0 }
 0x639   :  { %v2780_v37 = vpop.f32.mrf.mxu1  ;;  %2938 = vadd.xlane.f32.xlu0 %v2937_v48  ;;  %v6790_v7 = vsub.f32 %v6519_v51, %v2977_v42 }
 0x63a   :  { %v6754_v56 = vadd.f32 %v6439_v60, %v2780_v37  ;;  %v6780_v37 = vsub.f32 %v6514_v57, %v2976_v2  ;;  %v2852_v57 = vpop.xlane.xlu1 %2851 }
 0x63b   :  { %v4354_v25 = vpop.f32.mrf.mxu1  ;;  %7663 = vst [vmem:[#allocation10_spill] sm:$0xff] %v6790_v7 }
 0x63c   :  { %v2940_v61 = vsel %vm2816_vm2, %v6754_v56, 0.0  ;;  %7662 = vst [vmem:[#allocation9_spill] sm:$0xff] %v6780_v37  ;;  %v3075_v25 = vmul.f32 %v6771_v41, %v6771_v41 }
 0x63d   :  { %2941 = vadd.xlane.f32.xlu1 %v2940_v61  ;;  %3131 = vadd.xlane.f32.xlu0 %v3130_v62  ;;  %v2849_v61 = vpop.xlane.xlu0 %2848 }
 0x63e   :  { %v2785_v15 = vpop.f32.mrf.mxu1 }
 0x63f   :  { %v6765_v52 = vadd.f32 %v6439_v60, %v2785_v15  ;;  %v3139_v15 = vsel %vm2816_vm2, %v3075_v25, 0.0 }
 0x640   :  { %v4357_v54 = vpop.f32.mrf.mxu1 }
 0x641   :  { %3134 = vadd.xlane.f32.xlu1 %v3133_v14  ;;  %v2943_v9 = vsel %vm2816_vm2, %v6765_v52, 0.0  ;;  %v3076_v14 = vmul.f32 %v6780_v37, %v6780_v37  ;;  %v2855_v53 = vpop.xlane.xlu0 %2854 }
 0x642   :  { %v2788_v21 = vpop.f32.mrf.mxu1  ;;  %2944 = vadd.xlane.f32.xlu0 %v2943_v9 }
 0x643   :  { %v6776_v29 = vadd.f32 %v6439_v60, %v2788_v21  ;;  %v2858_v21 = vpop.xlane.xlu1 %2857 }
 0x644   :  { %v4358_v48 = vpop.f32.mrf.mxu1 }
 0x645   :  { %v2946_v5 = vsel %vm2816_vm2, %v6776_v29, 0.0  ;;  %v3142_v48 = vsel %vm2816_vm2, %v3076_v14, 0.0  ;;  %v2861_v42 = vpop.xlane.xlu0 %2860 }
 0x646   :  { %2947 = vadd.xlane.f32.xlu1 %v2946_v5  ;;  %v2793_v62 = vpop.f32.mrf.mxu1  ;;  %3137 = vadd.xlane.f32.xlu0 %v3136_v1  ;;  %v3077_v1 = vmul.f32 %v6790_v7, %v6790_v7 }
 0x647   :  { %v6787_v11 = vadd.f32 %v6439_v60, %v2793_v62  ;;  %v2978_v62 = vmul.f32 0.03125, %v2849_v61 }
 0x648   :  { %v4361_v45 = vpop.f32.mrf.mxu1 }
 0x649   :  { %v2949_v54 = vsel %vm2816_vm2, %v6787_v11, 0.0 }
 0x64a   :  { %3140 = vadd.xlane.f32.xlu1 %v3139_v15  ;;  %v2796_v2 = vpop.f32.mrf.mxu1  ;;  %2950 = vadd.xlane.f32.xlu0 %v2949_v54  ;;  %v2864_v15 = vpop.xlane.xlu1 %2863  ;;  %v3145_v54 = vsel %vm2816_vm2, %v3077_v1, 0.0 }
 0x64b   :  { %v6798_v9 = vadd.f32 %v6439_v60, %v2796_v2 }
 0x64c   :  { %v4362_v27 = vpop.f32.mrf.mxu1 }
 0x64d   :  { %v2952_v51 = vsel %vm2816_vm2, %v6798_v9, 0.0  ;;  %v2867_v27 = vpop.xlane.xlu0 %2866 }
 0x64e   :  { %2953 = vadd.xlane.f32.xlu1 %v2952_v51  ;;  %v2801_v5 = vpop.f32.mrf.mxu1  ;;  %3143 = vadd.xlane.f32.xlu0 %v3142_v48  ;;  %v6815_v51 = vsub.f32 %v6524_v59, %v2978_v62  ;;  %v2979_v48 = vmul.f32 0.03125, %v2852_v57  ;;  %v2982_v62 = vmul.f32 0.03125, %v2861_v42 }
 0x64f   :  { %v6806_v25 = vadd.f32 %v6439_v60, %v2801_v5  ;;  %v2980_v5 = vmul.f32 0.03125, %v2855_v53  ;;  %v2981_v53 = vmul.f32 0.03125, %v2858_v21 }
 0x650   :  { %v4365_v45 = vpop.f32.mrf.mxu1  ;;  %v3078_v57 = vmul.f32 %v6815_v51, %v6815_v51 }
 0x651   :  { %v2955_v2 = vsel %vm2816_vm2, %v6806_v25, 0.0  ;;  %v2870_v45 = vpop.xlane.xlu1 %2869  ;;  %v2873_v37 = vpop.xlane.xlu0 %2872  ;;  %v6841_v42 = vsub.f32 %v6539_v24, %v2981_v53 }
 0x652   :  { %3146 = vadd.xlane.f32.xlu1 %v3145_v54  ;;  %v2804_v14 = vpop.f32.mrf.mxu1  ;;  %2956 = vadd.xlane.f32.xlu0 %v2955_v2  ;;  %v6823_v2 = vsub.f32 %v6529_v39, %v2979_v48  ;;  %v2983_v39 = vmul.f32 0.03125, %v2864_v15 }
 0x653   :  { %v6812_v7 = vadd.f32 %v6439_v60, %v2804_v14  ;;  %v6826_v14 = vsub.f32 %v6534_v47, %v2980_v5  ;;  %v3148_v47 = vsel %vm2816_vm2, %v3078_v57, 0.0 }
 0x654   :  { %v4366_v61 = vpop.f32.mrf.mxu1  ;;  %7665 = vst [vmem:[#allocation11_spill] sm:$0xff] %v6823_v2  ;;  %v3079_v5 = vmul.f32 %v6823_v2, %v6823_v2  ;;  %v6849_v57 = vsub.f32 %v6549_v26, %v2983_v39  ;;  %v2986_v2 = vmul.f32 0.03125, %v2873_v37 }
 0x655   :  { %7664 = vst [vmem:[#allocation6_spill] sm:$0xff] %v6812_v7  ;;  %v2958_v1 = vsel %vm2816_vm2, %v6812_v7, 0.0  ;;  %7666 = vst [vmem:[#allocation12_spill] sm:$0xff] %v6826_v14  ;;  %v2876_v61 = vpop.xlane.xlu1 %2875  ;;  %v2879_v28 = vpop.xlane.xlu0 %2878  ;;  %v3080_v21 = vmul.f32 %v6826_v14, %v6826_v14 }
 0x656   :  { %2959 = vadd.xlane.f32.xlu1 %v2958_v1  ;;  %v2809_v41 = vpop.f32.mrf.mxu1  ;;  %v3151_v14 = vsel %vm2816_vm2, %v3079_v5, 0.0  ;;  %v6864_v37 = vsub.f32 %v6564_v19, %v2986_v2  ;;  %v2988_v39 = vmul.f32 0.03125, %v2879_v28 }
 0x657   :  { %v6820_v54 = vadd.f32 %v6439_v60, %v2809_v41 }
 0x658   :  { %v4369_v59 = vpop.f32.mrf.mxu1  ;;  %7667 = vst [vmem:[#allocation13_spill] sm:$0xff] %v6864_v37  ;;  %v3086_v28 = vmul.f32 %v6864_v37, %v6864_v37 }
 0x659   :  { %v2961_v1 = vsel %vm2816_vm2, %v6820_v54, 0.0  ;;  %v6844_v59 = vsub.f32 %v6544_v4, %v2982_v62  ;;  %v2885_v15 = vpop.xlane.xlu0 %2884  ;;  %v3154_v4 = vsel %vm2816_vm2, %v3080_v21, 0.0 }
 0x65a   :  { %v2812_v7 = vpop.f32.mrf.mxu1  ;;  %2962 = vadd.xlane.f32.xlu0 %v2961_v1  ;;  %v2984_v1 = vmul.f32 0.03125, %v2867_v27  ;;  %v3081_v27 = vmul.f32 %v6841_v42, %v6841_v42 }
 0x65b   :  { %v6833_v41 = vadd.f32 %v6439_v60, %v2812_v7  ;;  %v2882_v7 = vpop.xlane.xlu1 %2881  ;;  %v3082_v53 = vmul.f32 %v6844_v59, %v6844_v59 }
 0x65c   :  { %v4370_v48 = vpop.f32.mrf.mxu1  ;;  %v6853_v24 = vsub.f32 %v6554_v0, %v2984_v1  ;;  %v2987_v0 = vmul.f32 0.03125, %v2876_v61  ;;  %v3157_v5 = vsel %vm2816_vm2, %v3081_v27, 0.0  ;;  %v6881_v61 = vsub.f32 %v6617_v16, %v2988_v39 }
 0x65d   :  { %v2964_v60 = vsel %vm2816_vm2, %v6833_v41, 0.0  ;;  %v2985_v48 = vmul.f32 0.03125, %v2870_v45  ;;  %v3083_v45 = vmul.f32 %v6849_v57, %v6849_v57  ;;  %v3160_v21 = vsel %vm2816_vm2, %v3082_v53, 0.0 }
 0x65e   :  { %2965 = vadd.xlane.f32.xlu1 %v2964_v60  ;;  %3149 = vadd.xlane.f32.xlu0 %v3148_v47  ;;  %v2891_v47 = vpop.xlane.xlu0 %2890  ;;  %v3084_v1 = vmul.f32 %v6853_v24, %v6853_v24 }
 0x65f   :  { %v2888_v62 = vpop.xlane.xlu1 %2887  ;;  %v6861_v26 = vsub.f32 %v6559_v38, %v2985_v48  ;;  %v6873_v38 = vsub.f32 %v6569_v30, %v2987_v0  ;;  %v3163_v19 = vsel %vm2816_vm2, %v3083_v45, 0.0  ;;  %v2989_v48 = vmul.f32 0.03125, %v2882_v7 }
 0x660   :  { %v3166_v27 = vsel %vm2816_vm2, %v3084_v1, 0.0  ;;  %v2991_v30 = vmul.f32 0.03125, %v2888_v62  ;;  %v3172_v45 = vsel %vm2816_vm2, %v3086_v28, 0.0  ;;  %v2992_v7 = vmul.f32 0.03125, %v2891_v47 }
 0x661   :  { %v3085_v2 = vmul.f32 %v6861_v26, %v6861_v26  ;;  %v6889_v37 = vsub.f32 %v6622_v50, %v2989_v48 }
 0x662   :  { %3152 = vadd.xlane.f32.xlu1 %v3151_v14  ;;  %3155 = vadd.xlane.f32.xlu0 %v3154_v4  ;;  %v2897_v60 = vpop.xlane.xlu0 %2896  ;;  %v2990_v4 = vmul.f32 0.03125, %v2885_v15  ;;  %v3088_v15 = vmul.f32 %v6881_v61, %v6881_v61  ;;  %v6897_v62 = vsub.f32 %v6632_v43, %v2991_v30  ;;  %v6901_v50 = vsub.f32 %v6637_v22, %v2992_v7 }
 0x663   :  { %v2894_v14 = vpop.xlane.xlu1 %2893  ;;  %v3169_v0 = vsel %vm2816_vm2, %v3085_v2, 0.0  ;;  %v2994_v2 = vmul.f32 0.03125, %v2897_v60  ;;  %v3089_v47 = vmul.f32 %v6889_v37, %v6889_v37 }
 0x664   :  { %v6892_v16 = vsub.f32 %v6627_v32, %v2990_v4  ;;  %v3178_v32 = vsel %vm2816_vm2, %v3088_v15, 0.0  ;;  %v3091_v60 = vmul.f32 %v6897_v62, %v6897_v62 }
 0x666   :  { %3158 = vadd.xlane.f32.xlu1 %v3157_v5  ;;  %3161 = vadd.xlane.f32.xlu0 %v3160_v21  ;;  %v2903_v5 = vpop.xlane.xlu0 %2902  ;;  %v3087_v21 = vmul.f32 %v6873_v38, %v6873_v38  ;;  %v3090_v48 = vmul.f32 %v6892_v16, %v6892_v16 }
 0x667   :  { %v2900_v53 = vpop.xlane.xlu1 %2899  ;;  %v2996_v30 = vmul.f32 0.03125, %v2903_v5 }
 0x668   :  { %v3175_v28 = vsel %vm2816_vm2, %v3087_v21, 0.0  ;;  %v2995_v22 = vmul.f32 0.03125, %v2900_v53  ;;  %v3092_v21 = vmul.f32 %v6901_v50, %v6901_v50 }
 0x66a   :  { %3164 = vadd.xlane.f32.xlu1 %v3163_v19  ;;  %3167 = vadd.xlane.f32.xlu0 %v3166_v27  ;;  %v2909_v1 = vpop.xlane.xlu0 %2908  ;;  %v2993_v19 = vmul.f32 0.03125, %v2894_v14  ;;  %v6912_v14 = vsub.f32 %v6647_v44, %v2994_v2  ;;  %v3187_v44 = vsel %vm2816_vm2, %v3091_v60, 0.0 }
 0x66b   :  { %v2906_v39 = vpop.xlane.xlu1 %2905 }
 0x66c   :  { %v6909_v43 = vsub.f32 %v6642_v18, %v2993_v19  ;;  %v6921_v18 = vsub.f32 %v6652_v40, %v2995_v22  ;;  %v3094_v5 = vmul.f32 %v6912_v14, %v6912_v14  ;;  %v6929_v19 = vsub.f32 %v6657_v35, %v2996_v30 }
 0x66d   :  { %v2997_v2 = vmul.f32 0.03125, %v2906_v39 }
 0x66e   :  { %3170 = vadd.xlane.f32.xlu1 %v3169_v0  ;;  %3173 = vadd.xlane.f32.xlu0 %v3172_v45  ;;  %v2915_v27 = vpop.xlane.xlu0 %2914  ;;  %v3181_v0 = vsel %vm2816_vm2, %v3089_v47, 0.0  ;;  %v3184_v45 = vsel %vm2816_vm2, %v3090_v48, 0.0  ;;  %v3093_v53 = vmul.f32 %v6909_v43, %v6909_v43  ;;  %v3196_v60 = vsel %vm2816_vm2, %v3094_v5, 0.0 }
 0x66f   :  { %v2912_v4 = vpop.xlane.xlu1 %2911  ;;  %v3000_v39 = vmul.f32 0.03125, %v2915_v27 }
 0x670   :  { %v2999_v40 = vmul.f32 0.03125, %v2912_v4  ;;  %v3193_v22 = vsel %vm2816_vm2, %v3093_v53, 0.0 }
 0x672   :  { %3176 = vadd.xlane.f32.xlu1 %v3175_v28  ;;  %3179 = vadd.xlane.f32.xlu0 %v3178_v32  ;;  %v2921_v15 = vpop.xlane.xlu0 %2920  ;;  %v2998_v28 = vmul.f32 0.03125, %v2909_v1  ;;  %v3190_v32 = vsel %vm2816_vm2, %v3092_v21, 0.0  ;;  %v3096_v1 = vmul.f32 %v6929_v19, %v6929_v19  ;;  %v6945_v4 = vsub.f32 %v6672_v58, %v2999_v40 }
 0x673   :  { %v2918_v7 = vpop.xlane.xlu1 %2917 }
 0x674   :  { %v6940_v35 = vsub.f32 %v6667_v34, %v2998_v28  ;;  %v3001_v21 = vmul.f32 0.03125, %v2918_v7  ;;  %v3202_v34 = vsel %vm2816_vm2, %v3096_v1, 0.0 }
 0x676   :  { %3182 = vadd.xlane.f32.xlu1 %v3181_v0  ;;  %3185 = vadd.xlane.f32.xlu0 %v3184_v45  ;;  %v2927_v48 = vpop.xlane.xlu0 %2926  ;;  %v3095_v0 = vmul.f32 %v6921_v18, %v6921_v18  ;;  %v6937_v45 = vsub.f32 %v6662_v3, %v2997_v2  ;;  %v6949_v3 = vsub.f32 %v6677_v12, %v3000_v39 }
 0x677   :  { %v2924_v47 = vpop.xlane.xlu1 %2923  ;;  %v3098_v2 = vmul.f32 %v6940_v35, %v6940_v35  ;;  %v6957_v58 = vsub.f32 %v6682_v6, %v3001_v21  ;;  %v3099_v12 = vmul.f32 %v6945_v4, %v6945_v4 }
 0x678   :  { %v3199_v5 = vsel %vm2816_vm2, %v3095_v0, 0.0  ;;  %v3097_v27 = vmul.f32 %v6937_v45, %v6937_v45 }
 0x67a   :  { %3188 = vadd.xlane.f32.xlu1 %v3187_v44  ;;  %3191 = vadd.xlane.f32.xlu0 %v3190_v32  ;;  %v3002_v44 = vmul.f32 0.03125, %v2921_v15  ;;  %v3120_v53 = vpop.xlane.xlu0 %3119  ;;  %v3003_v15 = vmul.f32 0.03125, %v2924_v47  ;;  %v3004_v32 = vmul.f32 0.03125, %v2927_v48  ;;  %v3205_v40 = vsel %vm2816_vm2, %v3097_v27, 0.0 }
 0x67b   :  { %v2930_v30 = vpop.xlane.xlu1 %2929  ;;  %v3101_v47 = vmul.f32 %v6957_v58, %v6957_v58 }
 0x67c   :  { %v6960_v7 = vsub.f32 %v6687_v13, %v3002_v44  ;;  %v6969_v6 = vsub.f32 %v6692_v20, %v3003_v15  ;;  %v3211_v13 = vsel %vm2816_vm2, %v3099_v12, 0.0  ;;  %v6977_v39 = vsub.f32 %v6700_v36, %v3004_v32 }
 0x67d   :  { %v3005_v1 = vmul.f32 0.03125, %v2930_v30  ;;  %v3217_v20 = vsel %vm2816_vm2, %v3101_v47, 0.0 }
 0x67e   :  { %3194 = vadd.xlane.f32.xlu1 %v3193_v22  ;;  %3197 = vadd.xlane.f32.xlu0 %v3196_v60  ;;  %v3208_v22 = vsel %vm2816_vm2, %v3098_v2, 0.0  ;;  %v3100_v60 = vmul.f32 %v6949_v3, %v6949_v3  ;;  %v2933_v0 = vpop.xlane.xlu0 %2932  ;;  %v3102_v48 = vmul.f32 %v6960_v7, %v6960_v7  ;;  %v3103_v27 = vmul.f32 %v6969_v6, %v6969_v6 }
 0x67f   :  { %v3123_v28 = vpop.xlane.xlu1 %3122  ;;  %v3006_v21 = vmul.f32 0.03125, %v2933_v0  ;;  %v6985_v2 = vsub.f32 %v6710_v46, %v3005_v1  ;;  %v3104_v15 = vmul.f32 %v6977_v39, %v6977_v39 }
 0x680   :  { %v3214_v44 = vsel %vm2816_vm2, %v3100_v60, 0.0  ;;  %v3223_v12 = vsel %vm2816_vm2, %v3103_v27, 0.0 }
 0x681   :  { %v6988_v36 = vsub.f32 %v6721_v23, %v3006_v21  ;;  %v3105_v46 = vmul.f32 %v6985_v2, %v6985_v2 }
 0x682   :  { %3200 = vadd.xlane.f32.xlu1 %v3199_v5  ;;  %3203 = vadd.xlane.f32.xlu0 %v3202_v34  ;;  %v3220_v34 = vsel %vm2816_vm2, %v3102_v48, 0.0  ;;  %v3268_v48 = vmul.f32 0.03125, %v3120_v53  ;;  %v3126_v1 = vpop.xlane.xlu0 %3125 }
 0x683   :  { %v2936_v5 = vpop.xlane.xlu1 %2935  ;;  %v3106_v23 = vmul.f32 %v6988_v36, %v6988_v36 }
 0x684   :  { %v3007_v30 = vmul.f32 0.03125, %v2936_v5  ;;  %v3318_v5 = vadd.f32 1e-05, %v3268_v48 }
 0x685   :  { %v3232_v60 = vsel %vm2816_vm2, %v3106_v23, 0.0 }
 0x686   :  { %3206 = vadd.xlane.f32.xlu1 %v3205_v40  ;;  %3209 = vadd.xlane.f32.xlu0 %v3208_v22  ;;  %v6994_v32 = vsub.f32 %v6732_v33, %v3007_v30  ;;  %v3226_v40 = vsel %vm2816_vm2, %v3104_v15, 0.0  ;;  %v3229_v22 = vsel %vm2816_vm2, %v3105_v46, 0.0 }
 0x687   :  { %v3129_v47 = vpop.xlane.xlu1 %3128 }
 0x688   :  { %v3107_v0 = vmul.f32 %v6994_v32, %v6994_v32 }
 0x68a   :  { %3212 = vadd.xlane.f32.xlu1 %v3211_v13  ;;  %3215 = vadd.xlane.f32.xlu0 %v3214_v44  ;;  %v3235_v33 = vsel %vm2816_vm2, %v3107_v0, 0.0  ;;  %v3269_v13 = vmul.f32 0.03125, %v3123_v28  ;;  %v3271_v44 = vmul.f32 0.03125, %v3129_v47 }
 0x68c   :  { %v3319_v21 = vadd.f32 1e-05, %v3269_v13 }
 0x68e   :  { %3218 = vadd.xlane.f32.xlu1 %v3217_v20  ;;  %3221 = vadd.xlane.f32.xlu0 %v3220_v34  ;;  %v3270_v20 = vmul.f32 0.03125, %v3126_v1  ;;  %4621 = vrsqrt.f32 %v3319_v21  ;;  %v3321_v34 = vadd.f32 1e-05, %v3271_v44 }
 0x68f   :  { %4623 = vrsqrt.f32 %v3318_v5 }
 0x690   :  { %v3320_v27 = vadd.f32 1e-05, %v3270_v20  ;;  %4625 = vrsqrt.f32 %v3321_v34 }
 0x692   :  { %3224 = vadd.xlane.f32.xlu1 %v3223_v12  ;;  %3227 = vadd.xlane.f32.xlu0 %v3226_v40  ;;  %4627 = vrsqrt.f32 %v3320_v27 }
 0x696   :  { %3230 = vadd.xlane.f32.xlu1 %v3229_v22  ;;  %3233 = vadd.xlane.f32.xlu0 %v3232_v60 }
 0x69a   :  { %3236 = vadd.xlane.f32.xlu1 %v3235_v33 }
 0x69b   :  { %v4622_v48 = vpop.eup %4621 }
 0x69c   :  { %v4624_v5 = vpop.eup %4623  ;;  %v3419_v27 = vmul.f32 %v4622_v48, %v6705_v8 }
 0x6c2   :  { %v2939_v30 = vpop.xlane.xlu0 %2938 }
 0x6c3   :  { %v3008_v15 = vmul.f32 0.03125, %v2939_v30  ;;  %v4626_v30 = vpop.eup %4625 }
 0x6c5   :  { %v7007_v12 = vsub.f32 %v6744_v31, %v3008_v15 }
 0x6c6   :  { %v2942_v40 = vpop.xlane.xlu1 %2941  ;;  %v3132_v28 = vpop.xlane.xlu0 %3131 }
 0x6c7   :  { %v3009_v46 = vmul.f32 0.03125, %v2942_v40  ;;  %v3272_v53 = vmul.f32 0.03125, %v3132_v28  ;;  %v3108_v23 = vmul.f32 %v7007_v12, %v7007_v12 }
 0x6c9   :  { %v7012_v22 = vsub.f32 %v6754_v56, %v3009_v46  ;;  %v3322_v60 = vadd.f32 1e-05, %v3272_v53  ;;  %v3238_v0 = vsel %vm2816_vm2, %v3108_v23, 0.0  ;;  %v3418_v46 = vmul.f32 %v4624_v5, %v6695_v63  ;;  %v4628_v53 = vpop.eup %4627 }
 0x6ca   :  { %v3135_v33 = vpop.xlane.xlu1 %3134  ;;  %3239 = vadd.xlane.f32.xlu0 %v3238_v0  ;;  %v7032_v0 = vld [vmem:[%s7624_s11] ss:$0 sm:$0xff] }
 0x6cb   :  { %4629 = vrsqrt.f32 %v3322_v60  ;;  %v3273_v13 = vmul.f32 0.03125, %v3135_v33  ;;  %v2945_v47 = vpop.xlane.xlu0 %2944  ;;  %v3109_v31 = vmul.f32 %v7012_v22, %v7012_v22  ;;  %v3475_v48 = vmul.f32 %v7032_v0, %v3418_v46 }
 0x6cc   :  { %v3010_v1 = vmul.f32 0.03125, %v2945_v47  ;;  %v3421_v47 = vmul.f32 %v4626_v30, %v6724_v49  ;;  %v7047_v49 = vld [vmem:[%s7625_s12] ss:$0 sm:$0xff] }
 0x6cd   :  { %v3323_v21 = vadd.f32 1e-05, %v3273_v13  ;;  %v3241_v44 = vsel %vm2816_vm2, %v3109_v31, 0.0  ;;  %v3476_v13 = vmul.f32 %v7032_v0, %v3419_v27 }
 0x6ce   :  { %v7019_v56 = vsub.f32 %v6765_v52, %v3010_v1  ;;  %3242 = vadd.xlane.f32.xlu1 %v3241_v44  ;;  %v3420_v1 = vmul.f32 %v4628_v53, %v6714_v17  ;;  %v3478_v30 = vmul.f32 %v7032_v0, %v3421_v47 }
 0x6cf   :  { %4631 = vrsqrt.f32 %v3323_v21  ;;  %v2948_v20 = vpop.xlane.xlu1 %2947  ;;  %v3138_v34 = vpop.xlane.xlu0 %3137  ;;  %v3533_v27 = vadd.f32 %v7047_v49, %v3476_v13 }
 0x6d0   :  { %v3011_v15 = vmul.f32 0.03125, %v2948_v20  ;;  %v3274_v40 = vmul.f32 0.03125, %v3138_v34  ;;  %v3110_v28 = vmul.f32 %v7019_v56, %v7019_v56  ;;  %v3477_v46 = vmul.f32 %v7032_v0, %v3420_v1 }
 0x6d1   :  { %v3583_v13 = vmax.f32 %v3533_v27, 0.0  ;;  %v3535_v47 = vadd.f32 %v7047_v49, %v3478_v30 }
 0x6d2   :  { %v7026_v23 = vsub.f32 %v6776_v29, %v3011_v15  ;;  %v3324_v52 = vadd.f32 1e-05, %v3274_v40  ;;  %v3244_v60 = vsel %vm2816_vm2, %v3110_v28, 0.0  ;;  %v3532_v28 = vadd.f32 %v7047_v49, %v3475_v48 }
 0x6d3   :  { %v3141_v8 = vpop.xlane.xlu1 %3140  ;;  %3245 = vadd.xlane.f32.xlu0 %v3244_v60  ;;  %v2951_v33 = vpop.xlane.xlu0 %2950 }
 0x6d4   :  { %4633 = vrsqrt.f32 %v3324_v52  ;;  %v3275_v63 = vmul.f32 0.03125, %v3141_v8  ;;  %v3012_v31 = vmul.f32 0.03125, %v2951_v33  ;;  %v3111_v29 = vmul.f32 %v7026_v23, %v7026_v23 }
 0x6d6   :  { %v3325_v21 = vadd.f32 1e-05, %v3275_v63  ;;  %v7041_v44 = vsub.f32 %v6787_v11, %v3012_v31  ;;  %v3247_v5 = vsel %vm2816_vm2, %v3111_v29, 0.0 }
 0x6d7   :  { %v2954_v20 = vpop.xlane.xlu1 %2953  ;;  %3248 = vadd.xlane.f32.xlu1 %v3247_v5  ;;  %v3144_v34 = vpop.xlane.xlu0 %3143 }
 0x6d8   :  { %v4630_v15 = vpop.eup %4629  ;;  %4635 = vrsqrt.f32 %v3325_v21  ;;  %v3013_v17 = vmul.f32 0.03125, %v2954_v20  ;;  %v3276_v40 = vmul.f32 0.03125, %v3144_v34  ;;  %v3112_v11 = vmul.f32 %v7041_v44, %v7041_v44 }
 0x6d9   :  { %v3422_v63 = vmul.f32 %v4630_v15, %v6741_v55  ;;  %v3534_v21 = vadd.f32 %v7047_v49, %v3477_v46  ;;  %v3585_v15 = vmax.f32 %v3535_v47, 0.0 }
 0x6da   :  { %v7056_v53 = vsub.f32 %v6798_v9, %v3013_v17  ;;  %v3326_v52 = vadd.f32 1e-05, %v3276_v40  ;;  %v3250_v60 = vsel %vm2816_vm2, %v3112_v11, 0.0  ;;  %v3582_v9 = vmax.f32 %v3532_v28, 0.0 }
 0x6db   :  { %v3147_v8 = vpop.xlane.xlu1 %3146  ;;  %3251 = vadd.xlane.f32.xlu0 %v3250_v60  ;;  %v2957_v33 = vpop.xlane.xlu0 %2956  ;;  %v3479_v17 = vmul.f32 %v7032_v0, %v3422_v63  ;;  %v3584_v46 = vmax.f32 %v3534_v21, 0.0 }
 0x6dc   :  { %v4632_v31 = vpop.eup %4631  ;;  %4637 = vrsqrt.f32 %v3326_v52  ;;  %v3277_v29 = vmul.f32 0.03125, %v3147_v8  ;;  %v3014_v48 = vmul.f32 0.03125, %v2957_v33  ;;  %v3113_v1 = vmul.f32 %v7056_v53, %v7056_v53  ;;  %v7668_v52 = vld [vmem:[#allocation6_spill] sm:$0xff]  ;;  %v7670_v33 = vld [vmem:[#allocation7_spill] sm:$0xff] }
 0x6dd   :  { %v3423_v5 = vmul.f32 %v4632_v31, %v6747_v10  ;;  %v3632_v55 = vpack.c.bf16 %v3583_v13, %v3582_v9  ;;  %v3633_v31 = vpack.c.bf16 %v3585_v15, %v3584_v46  ;;  %v7085_v9 = vld [vmem:[%s7626_s13] ss:$0 sm:$0xff] }
 0x6de   :  { %v3327_v20 = vadd.f32 1e-05, %v3277_v29  ;;  %v7066_v34 = vsub.f32 %v6806_v25, %v3014_v48  ;;  %v3253_v27 = vsel %vm2816_vm2, %v3113_v1, 0.0  ;;  %v3536_v29 = vadd.f32 %v7047_v49, %v3479_v17  ;;  %v7672_v17 = vld [vmem:[#allocation8_spill] sm:$0xff] }
 0x6df   :  { %v2960_v30 = vpop.xlane.xlu1 %2959  ;;  %3254 = vadd.xlane.f32.xlu1 %v3253_v27  ;;  %v3480_v40 = vmul.f32 %v7032_v0, %v3423_v5  ;;  %v3657_v63 = vunpack.c.l.bf16 %v3632_v55  ;;  %v3658_v5 = vunpack.c.h.bf16 %v3632_v55  ;;  %v3659_v46 = vunpack.c.l.bf16 %v3633_v31 }
 0x6e0   :  { %4639 = vrsqrt.f32 %v3327_v20  ;;  %v3015_v11 = vmul.f32 0.03125, %v2960_v30  ;;  %v3114_v28 = vmul.f32 %v7066_v34, %v7066_v34 }
 0x6e1   :  { %v4634_v10 = vpop.eup %4633  ;;  %v3537_v25 = vadd.f32 %v7047_v49, %v3480_v40 }
 0x6e2   :  { %v7075_v60 = vsub.f32 %v7668_v52, %v3015_v11  ;;  %v3256_v8 = vsel %vm2816_vm2, %v3114_v28, 0.0  ;;  %v3424_v13 = vmul.f32 %v4634_v10, %v7670_v33  ;;  %v3714_v10 = vmul.f32 %v7085_v9, %v3657_v63 }
 0x6e3   :  { %3257 = vadd.xlane.f32.xlu0 %v3256_v8  ;;  %v2963_v47 = vpop.xlane.xlu0 %2962  ;;  %v3587_v20 = vmax.f32 %v3537_v25, 0.0  ;;  %v3586_v52 = vmax.f32 %v3536_v29, 0.0 }
 0x6e4   :  { %7669 = vst [vmem:[#allocation6_spill] sm:$0xff] %v7075_v60  ;;  %v3016_v48 = vmul.f32 0.03125, %v2963_v47  ;;  %v3115_v1 = vmul.f32 %v7075_v60, %v7075_v60  ;;  %v3481_v27 = vmul.f32 %v7032_v0, %v3424_v13  ;;  %v3715_v13 = vmul.f32 %v7085_v9, %v3658_v5  ;;  %v7673_v5 = vld [vmem:[#allocation9_spill] sm:$0xff] }
 0x6e5   :  { %v4636_v21 = vpop.eup %4635  ;;  %v3634_v47 = vpack.c.bf16 %v3587_v20, %v3586_v52 }
 0x6e6   :  { %v7089_v30 = vsub.f32 %v6820_v54, %v3016_v48  ;;  %v3259_v15 = vsel %vm2816_vm2, %v3115_v1, 0.0  ;;  %v3425_v40 = vmul.f32 %v4636_v21, %v7672_v17  ;;  %v3538_v48 = vadd.f32 %v7047_v49, %v3481_v27 }
 0x6e7   :  { %3260 = vadd.xlane.f32.xlu1 %v3259_v15  ;;  %v2966_v11 = vpop.xlane.xlu1 %2965  ;;  %v3150_v28 = vpop.xlane.xlu0 %3149 }
 0x6e8   :  { %7671 = vst [vmem:[#allocation7_spill] sm:$0xff] %v7089_v30  ;;  %v3017_v8 = vmul.f32 0.03125, %v2966_v11  ;;  %v3278_v33 = vmul.f32 0.03125, %v3150_v28  ;;  %v3116_v55 = vmul.f32 %v7089_v30, %v7089_v30  ;;  %v3482_v25 = vmul.f32 %v7032_v0, %v3425_v40 }
 0x6e9   :  { %v4638_v54 = vpop.eup %4637  ;;  %v3764_v11 = vsel %vm2816_vm2, %v3714_v10, 0.0  ;;  %v3716_v40 = vmul.f32 %v7085_v9, %v3659_v46  ;;  %v3660_v28 = vunpack.c.h.bf16 %v3633_v31  ;;  %v7674_v46 = vld [vmem:[#allocation10_spill] sm:$0xff] }
 0x6ea   :  { %v7100_v1 = vsub.f32 %v6833_v41, %v3017_v8  ;;  %v3328_v21 = vadd.f32 1e-05, %v3278_v33  ;;  %v3262_v63 = vsel %vm2816_vm2, %v3116_v55, 0.0  ;;  %v3539_v29 = vadd.f32 %v7047_v49, %v3482_v25 }
 0x6eb   :  { %v3153_v15 = vpop.xlane.xlu1 %3152  ;;  %3263 = vadd.xlane.f32.xlu0 %v3262_v63  ;;  %v3156_v17 = vpop.xlane.xlu0 %3155  ;;  %v3426_v20 = vmul.f32 %v4638_v54, %v7673_v5  ;;  %v3661_v33 = vunpack.c.l.bf16 %v3634_v47  ;;  %v3588_v55 = vmax.f32 %v3538_v48, 0.0 }
 0x6ec   :  { %4641 = vrsqrt.f32 %v3328_v21  ;;  %v3279_v27 = vmul.f32 0.03125, %v3153_v15  ;;  %v3280_v52 = vmul.f32 0.03125, %v3156_v17  ;;  %v3117_v41 = vmul.f32 %v7100_v1, %v7100_v1 }
 0x6ed   :  { %v4640_v8 = vpop.eup %4639  ;;  %v3589_v25 = vmax.f32 %v3539_v29, 0.0  ;;  %v3483_v63 = vmul.f32 %v7032_v0, %v3426_v20  ;;  %v3767_v15 = vsel %vm2816_vm2, %v3715_v13, 0.0  ;;  %v3717_v17 = vmul.f32 %v7085_v9, %v3660_v28 }
 0x6ee   :  { %v3329_v30 = vadd.f32 1e-05, %v3279_v27  ;;  %v3330_v60 = vadd.f32 1e-05, %v3280_v52  ;;  %v3265_v10 = vsel %vm2816_vm2, %v3117_v41, 0.0  ;;  %v3427_v31 = vmul.f32 %v4640_v8, %v7674_v46 }
 0x6ef   :  { %3266 = vadd.xlane.f32.xlu1 %v3265_v10  ;;  %v3159_v54 = vpop.xlane.xlu1 %3158  ;;  %3765 = vadd.xlane.f32.xlu0 %v3764_v11  ;;  %v3162_v21 = vpop.xlane.xlu0 %3161  ;;  %v3635_v5 = vpack.c.bf16 %v3589_v25, %v3588_v55  ;;  %v3540_v48 = vadd.f32 %v7047_v49, %v3483_v63  ;;  %v3770_v52 = vsel %vm2816_vm2, %v3716_v40, 0.0  ;;  %v3718_v41 = vmul.f32 %v7085_v9, %v3661_v33 }
 0x6f0   :  { %4643 = vrsqrt.f32 %v3329_v30  ;;  %v3281_v29 = vmul.f32 0.03125, %v3159_v54  ;;  %v3282_v20 = vmul.f32 0.03125, %v3162_v21  ;;  %v3484_v27 = vmul.f32 %v7032_v0, %v3427_v31 }
 0x6f1   :  { %4645 = vrsqrt.f32 %v3330_v60  ;;  %v3662_v8 = vunpack.c.h.bf16 %v3634_v47  ;;  %v3663_v46 = vunpack.c.l.bf16 %v3635_v5  ;;  %v3773_v30 = vsel %vm2816_vm2, %v3717_v17, 0.0 }
 0x6f2   :  { %v3331_v11 = vadd.f32 1e-05, %v3281_v29  ;;  %v3332_v10 = vadd.f32 1e-05, %v3282_v20  ;;  %v3541_v13 = vadd.f32 %v7047_v49, %v3484_v27  ;;  %v3590_v25 = vmax.f32 %v3540_v48, 0.0 }
 0x6f3   :  { %v3165_v28 = vpop.xlane.xlu1 %3164  ;;  %3768 = vadd.xlane.f32.xlu1 %v3767_v15  ;;  %3771 = vadd.xlane.f32.xlu0 %v3770_v52  ;;  %v3168_v55 = vpop.xlane.xlu0 %3167  ;;  %v3776_v40 = vsel %vm2816_vm2, %v3718_v41, 0.0  ;;  %v3719_v47 = vmul.f32 %v7085_v9, %v3662_v8  ;;  %v3664_v33 = vunpack.c.h.bf16 %v3635_v5  ;;  %v3720_v29 = vmul.f32 %v7085_v9, %v3663_v46 }
 0x6f4   :  { %4647 = vrsqrt.f32 %v3331_v11  ;;  %v3283_v63 = vmul.f32 0.03125, %v3165_v28  ;;  %v3284_v60 = vmul.f32 0.03125, %v3168_v55  ;;  %v3591_v31 = vmax.f32 %v3541_v13, 0.0 }
 0x6f5   :  { %4649 = vrsqrt.f32 %v3332_v10  ;;  %v3779_v41 = vsel %vm2816_vm2, %v3719_v47, 0.0  ;;  %v3721_v8 = vmul.f32 %v7085_v9, %v3664_v33  ;;  %v3782_v13 = vsel %vm2816_vm2, %v3720_v29, 0.0 }
 0x6f6   :  { %v3333_v54 = vadd.f32 1e-05, %v3283_v63  ;;  %v3334_v21 = vadd.f32 1e-05, %v3284_v60  ;;  %v3636_v15 = vpack.c.bf16 %v3591_v31, %v3590_v25 }
 0x6f7   :  { %v3171_v20 = vpop.xlane.xlu1 %3170  ;;  %3774 = vadd.xlane.f32.xlu1 %v3773_v30  ;;  %3777 = vadd.xlane.f32.xlu0 %v3776_v40  ;;  %v3174_v17 = vpop.xlane.xlu0 %3173 }
 0x6f8   :  { %4651 = vrsqrt.f32 %v3333_v54  ;;  %v3285_v48 = vmul.f32 0.03125, %v3171_v20  ;;  %v3286_v27 = vmul.f32 0.03125, %v3174_v17  ;;  %v3665_v52 = vunpack.c.l.bf16 %v3636_v15 }
 0x6f9   :  { %v4642_v11 = vpop.eup %4641  ;;  %4653 = vrsqrt.f32 %v3334_v21  ;;  %v3666_v5 = vunpack.c.h.bf16 %v3636_v15  ;;  %v3785_v21 = vsel %vm2816_vm2, %v3721_v8, 0.0 }
 0x6fa   :  { %v3335_v10 = vadd.f32 1e-05, %v3285_v48  ;;  %v3722_v46 = vmul.f32 %v7085_v9, %v3665_v52  ;;  %v3428_v28 = vmul.f32 %v4642_v11, %v6815_v51  ;;  %v3336_v55 = vadd.f32 1e-05, %v3286_v27  ;;  %v7675_v51 = vld [vmem:[#allocation11_spill] sm:$0xff]  ;;  %v7676_v52 = vld [vmem:[#allocation12_spill] sm:$0xff] }
 0x6fb   :  { %v3177_v30 = vpop.xlane.xlu1 %3176  ;;  %3780 = vadd.xlane.f32.xlu1 %v3779_v41  ;;  %3783 = vadd.xlane.f32.xlu0 %v3782_v13  ;;  %v3180_v25 = vpop.xlane.xlu0 %3179  ;;  %v3723_v40 = vmul.f32 %v7085_v9, %v3666_v5 }
 0x6fc   :  { %4655 = vrsqrt.f32 %v3335_v10  ;;  %v3287_v63 = vmul.f32 0.03125, %v3177_v30  ;;  %v3288_v60 = vmul.f32 0.03125, %v3180_v25  ;;  %v3485_v47 = vmul.f32 %v7032_v0, %v3428_v28 }
 0x6fd   :  { %v4644_v31 = vpop.eup %4643  ;;  %v3788_v29 = vsel %vm2816_vm2, %v3722_v46, 0.0  ;;  %4657 = vrsqrt.f32 %v3336_v55  ;;  %v3791_v8 = vsel %vm2816_vm2, %v3723_v40, 0.0 }
 0x6fe   :  { %v4646_v33 = vpop.eup %4645  ;;  %v3337_v54 = vadd.f32 1e-05, %v3287_v63  ;;  %v3429_v15 = vmul.f32 %v4644_v31, %v7675_v51  ;;  %v3338_v20 = vadd.f32 1e-05, %v3288_v60  ;;  %v3542_v27 = vadd.f32 %v7047_v49, %v3485_v47 }
 0x6ff   :  { %v3183_v17 = vpop.xlane.xlu1 %3182  ;;  %3786 = vadd.xlane.f32.xlu1 %v3785_v21  ;;  %3789 = vadd.xlane.f32.xlu0 %v3788_v29  ;;  %v3186_v48 = vpop.xlane.xlu0 %3185  ;;  %v3430_v11 = vmul.f32 %v4646_v33, %v7676_v52 }
 0x700   :  { %v3289_v41 = vmul.f32 0.03125, %v3183_v17  ;;  %v3290_v5 = vmul.f32 0.03125, %v3186_v48  ;;  %v3486_v10 = vmul.f32 %v7032_v0, %v3429_v15  ;;  %4659 = vrsqrt.f32 %v3337_v54 }
 0x701   :  { %v4648_v13 = vpop.eup %4647  ;;  %v3487_v46 = vmul.f32 %v7032_v0, %v3430_v11  ;;  %4661 = vrsqrt.f32 %v3338_v20  ;;  %v3592_v47 = vmax.f32 %v3542_v27, 0.0 }
 0x702   :  { %v4650_v28 = vpop.eup %4649  ;;  %v3339_v55 = vadd.f32 1e-05, %v3289_v41  ;;  %v3340_v30 = vadd.f32 1e-05, %v3290_v5  ;;  %v3543_v25 = vadd.f32 %v7047_v49, %v3486_v10  ;;  %v3431_v63 = vmul.f32 %v4648_v13, %v6841_v42 }
 0x703   :  { %v3189_v60 = vpop.xlane.xlu1 %3188  ;;  %3792 = vadd.xlane.f32.xlu1 %v3791_v8  ;;  %v3192_v31 = vpop.xlane.xlu0 %3191  ;;  %v3544_v33 = vadd.f32 %v7047_v49, %v3487_v46  ;;  %v3432_v54 = vmul.f32 %v4650_v28, %v6844_v59 }
 0x704   :  { %4663 = vrsqrt.f32 %v3339_v55  ;;  %v3291_v40 = vmul.f32 0.03125, %v3189_v60  ;;  %v3292_v21 = vmul.f32 0.03125, %v3192_v31  ;;  %v3593_v29 = vmax.f32 %v3543_v25, 0.0 }
 0x705   :  { %v4652_v51 = vpop.eup %4651  ;;  %4665 = vrsqrt.f32 %v3340_v30  ;;  %v3488_v15 = vmul.f32 %v7032_v0, %v3431_v63  ;;  %v3489_v17 = vmul.f32 %v7032_v0, %v3432_v54  ;;  %v3594_v5 = vmax.f32 %v3544_v33, 0.0 }
 0x706   :  { %v4654_v42 = vpop.eup %4653  ;;  %v3341_v20 = vadd.f32 1e-05, %v3291_v40  ;;  %v3342_v48 = vadd.f32 1e-05, %v3292_v21  ;;  %v3637_v52 = vpack.c.bf16 %v3593_v29, %v3592_v47  ;;  %v3433_v27 = vmul.f32 %v4652_v51, %v6849_v57 }
 0x707   :  { %v3195_v11 = vpop.xlane.xlu1 %3194  ;;  %v3198_v41 = vpop.xlane.xlu0 %3197  ;;  %v3545_v59 = vadd.f32 %v7047_v49, %v3488_v15  ;;  %v3546_v10 = vadd.f32 %v7047_v49, %v3489_v17  ;;  %v3434_v13 = vmul.f32 %v4654_v42, %v6853_v24 }
 0x708   :  { %4667 = vrsqrt.f32 %v3341_v20  ;;  %v3293_v8 = vmul.f32 0.03125, %v3195_v11  ;;  %v3294_v46 = vmul.f32 0.03125, %v3198_v41  ;;  %v3668_v28 = vunpack.c.h.bf16 %v3637_v52 }
 0x709   :  { %v4656_v55 = vpop.eup %4655  ;;  %4669 = vrsqrt.f32 %v3342_v48  ;;  %v3667_v30 = vunpack.c.l.bf16 %v3637_v52  ;;  %v3595_v25 = vmax.f32 %v3545_v59, 0.0  ;;  %v3490_v63 = vmul.f32 %v7032_v0, %v3433_v27 }
 0x70a   :  { %v3343_v57 = vadd.f32 1e-05, %v3293_v8  ;;  %v3344_v60 = vadd.f32 1e-05, %v3294_v46  ;;  %v3725_v31 = vmul.f32 %v7085_v9, %v3668_v28  ;;  %v3596_v47 = vmax.f32 %v3546_v10, 0.0  ;;  %v4658_v51 = vpop.eup %4657 }
 0x70b   :  { %v3201_v33 = vpop.xlane.xlu1 %3200  ;;  %v3204_v54 = vpop.xlane.xlu0 %3203  ;;  %v3724_v40 = vmul.f32 %v7085_v9, %v3667_v30  ;;  %v3638_v24 = vpack.c.bf16 %v3595_v25, %v3594_v5  ;;  %v3547_v21 = vadd.f32 %v7047_v49, %v3490_v63  ;;  %v3435_v29 = vmul.f32 %v4656_v55, %v6861_v26  ;;  %v7677_v55 = vld [vmem:[#allocation13_spill] sm:$0xff] }
 0x70c   :  { %4671 = vrsqrt.f32 %v3343_v57  ;;  %v3295_v15 = vmul.f32 0.03125, %v3201_v33  ;;  %v3296_v17 = vmul.f32 0.03125, %v3204_v54  ;;  %v3797_v42 = vsel %vm2816_vm2, %v3725_v31, 0.0 }
 0x70d   :  { %4673 = vrsqrt.f32 %v3344_v60  ;;  %3798 = vadd.xlane.f32.xlu1 %v3797_v42  ;;  %v3794_v20 = vsel %vm2816_vm2, %v3724_v40, 0.0  ;;  %v3670_v48 = vunpack.c.h.bf16 %v3638_v24  ;;  %v3669_v52 = vunpack.c.l.bf16 %v3638_v24  ;;  %v4660_v27 = vpop.eup %4659 }
 0x70e   :  { %v3345_v11 = vadd.f32 1e-05, %v3295_v15  ;;  %v3346_v41 = vadd.f32 1e-05, %v3296_v17  ;;  %3795 = vadd.xlane.f32.xlu0 %v3794_v20  ;;  %v3597_v59 = vmax.f32 %v3547_v21, 0.0  ;;  %v3491_v5 = vmul.f32 %v7032_v0, %v3434_v13  ;;  %v4662_v25 = vpop.eup %4661 }
 0x70f   :  { %v3207_v26 = vpop.xlane.xlu1 %3206  ;;  %v3210_v10 = vpop.xlane.xlu0 %3209  ;;  %v3727_v8 = vmul.f32 %v7085_v9, %v3670_v48  ;;  %v3726_v46 = vmul.f32 %v7085_v9, %v3669_v52  ;;  %v3492_v28 = vmul.f32 %v7032_v0, %v3435_v29  ;;  %v3436_v30 = vmul.f32 %v4658_v51, %v7677_v55 }
 0x710   :  { %4675 = vrsqrt.f32 %v3345_v11  ;;  %v3297_v63 = vmul.f32 0.03125, %v3207_v26  ;;  %v3298_v57 = vmul.f32 0.03125, %v3210_v10  ;;  %v3639_v60 = vpack.c.bf16 %v3597_v59, %v3596_v47 }
 0x711   :  { %v4664_v31 = vpop.eup %4663  ;;  %4677 = vrsqrt.f32 %v3346_v41  ;;  %v3803_v33 = vsel %vm2816_vm2, %v3727_v8, 0.0  ;;  %v3800_v13 = vsel %vm2816_vm2, %v3726_v46, 0.0  ;;  %v3548_v54 = vadd.f32 %v7047_v49, %v3491_v5 }
 0x712   :  { %v4666_v40 = vpop.eup %4665  ;;  %v3347_v24 = vadd.f32 1e-05, %v3297_v63  ;;  %v3348_v21 = vadd.f32 1e-05, %v3298_v57  ;;  %3804 = vadd.xlane.f32.xlu1 %v3803_v33  ;;  %3801 = vadd.xlane.f32.xlu0 %v3800_v13  ;;  %v3672_v29 = vunpack.c.h.bf16 %v3639_v60  ;;  %v3671_v51 = vunpack.c.l.bf16 %v3639_v60 }
 0x713   :  { %v3213_v15 = vpop.xlane.xlu1 %3212  ;;  %v3216_v17 = vpop.xlane.xlu0 %3215  ;;  %v3549_v42 = vadd.f32 %v7047_v49, %v3492_v28  ;;  %v3598_v47 = vmax.f32 %v3548_v54, 0.0  ;;  %v3437_v20 = vmul.f32 %v4660_v27, %v6873_v38  ;;  %v3493_v48 = vmul.f32 %v7032_v0, %v3436_v30 }
 0x714   :  { %4679 = vrsqrt.f32 %v3347_v24  ;;  %v3299_v52 = vmul.f32 0.03125, %v3213_v15  ;;  %v3300_v11 = vmul.f32 0.03125, %v3216_v17  ;;  %v3729_v41 = vmul.f32 %v7085_v9, %v3672_v29 }
 0x715   :  { %v4668_v59 = vpop.eup %4667  ;;  %4681 = vrsqrt.f32 %v3348_v21  ;;  %v3728_v5 = vmul.f32 %v7085_v9, %v3671_v51  ;;  %v3599_v26 = vmax.f32 %v3549_v42, 0.0  ;;  %v3494_v10 = vmul.f32 %v7032_v0, %v3437_v20 }
 0x716   :  { %v7169_v8 = vpop.eup %4669  ;;  %v3349_v46 = vadd.f32 1e-05, %v3299_v52  ;;  %v3350_v28 = vadd.f32 1e-05, %v3300_v11  ;;  %v3809_v38 = vsel %vm2816_vm2, %v3729_v41, 0.0  ;;  %v3550_v27 = vadd.f32 %v7047_v49, %v3493_v48 }
 0x717   :  { %3810 = vadd.xlane.f32.xlu1 %v3809_v38  ;;  %v3806_v55 = vsel %vm2816_vm2, %v3728_v5, 0.0  ;;  %v3219_v30 = vpop.xlane.xlu1 %3218  ;;  %v3222_v63 = vpop.xlane.xlu0 %3221  ;;  %v3640_v57 = vpack.c.bf16 %v3599_v26, %v3598_v47  ;;  %v3551_v60 = vadd.f32 %v7047_v49, %v3494_v10  ;;  %v3438_v33 = vmul.f32 %v4662_v25, %v6881_v61 }
 0x718   :  { %4683 = vrsqrt.f32 %v3349_v46  ;;  %3807 = vadd.xlane.f32.xlu0 %v3806_v55  ;;  %v3301_v13 = vmul.f32 0.03125, %v3219_v30  ;;  %v3302_v54 = vmul.f32 0.03125, %v3222_v63  ;;  %v3600_v24 = vmax.f32 %v3550_v27, 0.0 }
 0x719   :  { %v4672_v21 = vpop.eup %4671  ;;  %4685 = vrsqrt.f32 %v3350_v28  ;;  %v3674_v29 = vunpack.c.h.bf16 %v3640_v57  ;;  %v3673_v51 = vunpack.c.l.bf16 %v3640_v57  ;;  %v3601_v15 = vmax.f32 %v3551_v60, 0.0 }
 0x71a   :  { %v4674_v17 = vpop.eup %4673  ;;  %v3351_v42 = vadd.f32 1e-05, %v3301_v13  ;;  %v3352_v20 = vadd.f32 1e-05, %v3302_v54  ;;  %v3439_v48 = vmul.f32 %v4664_v31, %v6889_v37  ;;  %v3495_v47 = vmul.f32 %v7032_v0, %v3438_v33 }
 0x71b   :  { %v3731_v52 = vmul.f32 %v7085_v9, %v3674_v29  ;;  %v3730_v61 = vmul.f32 %v7085_v9, %v3673_v51  ;;  %v3225_v25 = vpop.xlane.xlu1 %3224  ;;  %v3228_v11 = vpop.xlane.xlu0 %3227  ;;  %v3641_v41 = vpack.c.bf16 %v3601_v15, %v3600_v24  ;;  %v3440_v5 = vmul.f32 %v4666_v40, %v6892_v16 }
 0x71c   :  { %4687 = vrsqrt.f32 %v3351_v42  ;;  %v3303_v26 = vmul.f32 0.03125, %v3225_v25  ;;  %v3304_v10 = vmul.f32 0.03125, %v3228_v11  ;;  %v3496_v46 = vmul.f32 %v7032_v0, %v3439_v48 }
 0x71d   :  { %v4676_v28 = vpop.eup %4675  ;;  %4689 = vrsqrt.f32 %v3352_v20  ;;  %v3815_v37 = vsel %vm2816_vm2, %v3731_v52, 0.0  ;;  %v3812_v31 = vsel %vm2816_vm2, %v3730_v61, 0.0  ;;  %v3676_v38 = vunpack.c.h.bf16 %v3641_v41 }
 0x71e   :  { %v7184_v27 = vpop.eup %4677  ;;  %3816 = vadd.xlane.f32.xlu1 %v3815_v37  ;;  %3813 = vadd.xlane.f32.xlu0 %v3812_v31  ;;  %v3353_v55 = vadd.f32 1e-05, %v3303_v26  ;;  %v3354_v30 = vadd.f32 1e-05, %v3304_v10  ;;  %v3675_v63 = vunpack.c.l.bf16 %v3641_v41  ;;  %v3552_v16 = vadd.f32 %v7047_v49, %v3495_v47 }
 0x71f   :  { %v3733_v40 = vmul.f32 %v7085_v9, %v3676_v38  ;;  %v3231_v57 = vpop.xlane.xlu1 %3230  ;;  %v3234_v60 = vpop.xlane.xlu0 %3233  ;;  %v3553_v33 = vadd.f32 %v7047_v49, %v3496_v46  ;;  %v3441_v13 = vmul.f32 %v4668_v59, %v6897_v62  ;;  %v3497_v54 = vmul.f32 %v7032_v0, %v3440_v5 }
 0x720   :  { %4691 = vrsqrt.f32 %v3353_v55  ;;  %v3732_v24 = vmul.f32 %v7085_v9, %v3675_v63  ;;  %v3305_v29 = vmul.f32 0.03125, %v3231_v57  ;;  %v3306_v51 = vmul.f32 0.03125, %v3234_v60 }
 0x721   :  { %v4680_v15 = vpop.eup %4679  ;;  %4693 = vrsqrt.f32 %v3354_v30  ;;  %v3821_v42 = vsel %vm2816_vm2, %v3733_v40, 0.0  ;;  %v3602_v20 = vmax.f32 %v3552_v16, 0.0  ;;  %v3603_v48 = vmax.f32 %v3553_v33, 0.0 }
 0x722   :  { %v4682_v47 = vpop.eup %4681  ;;  %3822 = vadd.xlane.f32.xlu1 %v3821_v42  ;;  %v3818_v52 = vsel %vm2816_vm2, %v3732_v24, 0.0  ;;  %v3355_v61 = vadd.f32 1e-05, %v3305_v29  ;;  %v3356_v25 = vadd.f32 1e-05, %v3306_v51  ;;  %v3498_v62 = vmul.f32 %v7032_v0, %v3441_v13 }
 0x723   :  { %3819 = vadd.xlane.f32.xlu0 %v3818_v52  ;;  %v3642_v59 = vpack.c.bf16 %v3603_v48, %v3602_v20  ;;  %v3237_v11 = vpop.xlane.xlu1 %3236  ;;  %v3554_v41 = vadd.f32 %v7047_v49, %v3497_v54  ;;  %v3442_v5 = vmul.f32 %v7169_v8, %v6901_v50  ;;  %v3443_v26 = vmul.f32 %v4672_v21, %v6909_v43 }
 0x724   :  { %4695 = vrsqrt.f32 %v3355_v61  ;;  %v3307_v10 = vmul.f32 0.03125, %v3237_v11  ;;  %v3555_v46 = vadd.f32 %v7047_v49, %v3498_v62  ;;  %v3444_v37 = vmul.f32 %v4674_v17, %v6912_v14 }
 0x725   :  { %v4684_v31 = vpop.eup %4683  ;;  %4697 = vrsqrt.f32 %v3356_v25  ;;  %v3678_v38 = vunpack.c.h.bf16 %v3642_v59  ;;  %v3677_v55 = vunpack.c.l.bf16 %v3642_v59  ;;  %v3604_v30 = vmax.f32 %v3554_v41, 0.0 }
 0x726   :  { %v7201_v63 = vpop.eup %4685  ;;  %v3357_v16 = vadd.f32 1e-05, %v3307_v10  ;;  %v3605_v40 = vmax.f32 %v3555_v46, 0.0  ;;  %v3499_v57 = vmul.f32 %v7032_v0, %v3442_v5  ;;  %v3500_v50 = vmul.f32 %v7032_v0, %v3443_v26 }
 0x727   :  { %v3735_v43 = vmul.f32 %v7085_v9, %v3678_v38  ;;  %v3734_v8 = vmul.f32 %v7085_v9, %v3677_v55  ;;  %v3445_v21 = vmul.f32 %v4676_v28, %v6921_v18  ;;  %v3501_v14 = vmul.f32 %v7032_v0, %v3444_v37 }
 0x728   :  { %4699 = vrsqrt.f32 %v3357_v16  ;;  %v3643_v17 = vpack.c.bf16 %v3605_v40, %v3604_v30  ;;  %v3556_v60 = vadd.f32 %v7047_v49, %v3499_v57  ;;  %v3557_v33 = vadd.f32 %v7047_v49, %v3500_v50 }
 0x729   :  { %v4688_v13 = vpop.eup %4687  ;;  %v3827_v54 = vsel %vm2816_vm2, %v3735_v43, 0.0  ;;  %v3824_v24 = vsel %vm2816_vm2, %v3734_v8, 0.0  ;;  %v3502_v29 = vmul.f32 %v7032_v0, %v3445_v21  ;;  %v3558_v51 = vadd.f32 %v7047_v49, %v3501_v14 }
 0x72a   :  { %v4690_v42 = vpop.eup %4689  ;;  %3828 = vadd.xlane.f32.xlu1 %v3827_v54  ;;  %3825 = vadd.xlane.f32.xlu0 %v3824_v24  ;;  %v3680_v18 = vunpack.c.h.bf16 %v3643_v17  ;;  %v3679_v28 = vunpack.c.l.bf16 %v3643_v17  ;;  %v3606_v20 = vmax.f32 %v3556_v60, 0.0  ;;  %v3607_v48 = vmax.f32 %v3557_v33, 0.0 }
 0x72b   :  { %v3559_v52 = vadd.f32 %v7047_v49, %v3502_v29  ;;  %v3608_v61 = vmax.f32 %v3558_v51, 0.0  ;;  %v3446_v25 = vmul.f32 %v7184_v27, %v6929_v19  ;;  %v3447_v62 = vmul.f32 %v4680_v15, %v6937_v45 }
 0x72c   :  { %v3737_v59 = vmul.f32 %v7085_v9, %v3680_v18  ;;  %v3736_v11 = vmul.f32 %v7085_v9, %v3679_v28  ;;  %v3644_v41 = vpack.c.bf16 %v3607_v48, %v3606_v20  ;;  %v3448_v5 = vmul.f32 %v4682_v47, %v6940_v35 }
 0x72d   :  { %v4692_v26 = vpop.eup %4691  ;;  %v3609_v10 = vmax.f32 %v3559_v52, 0.0  ;;  %v3503_v46 = vmul.f32 %v7032_v0, %v3446_v25  ;;  %v3504_v37 = vmul.f32 %v7032_v0, %v3447_v62  ;;  %v3449_v38 = vmul.f32 %v4684_v31, %v6945_v4 }
 0x72e   :  { %v7225_v55 = vpop.eup %4693  ;;  %v3833_v19 = vsel %vm2816_vm2, %v3737_v59, 0.0  ;;  %v3830_v45 = vsel %vm2816_vm2, %v3736_v11, 0.0  ;;  %v3682_v27 = vunpack.c.h.bf16 %v3644_v41  ;;  %v3681_v15 = vunpack.c.l.bf16 %v3644_v41 }
 0x72f   :  { %3834 = vadd.xlane.f32.xlu1 %v3833_v19  ;;  %3831 = vadd.xlane.f32.xlu0 %v3830_v45  ;;  %v3645_v30 = vpack.c.bf16 %v3609_v10, %v3608_v61  ;;  %v3560_v35 = vadd.f32 %v7047_v49, %v3503_v46  ;;  %v3561_v47 = vadd.f32 %v7047_v49, %v3504_v37 }
 0x730   :  { %v3739_v16 = vmul.f32 %v7085_v9, %v3682_v27  ;;  %v3738_v40 = vmul.f32 %v7085_v9, %v3681_v15  ;;  %v3505_v4 = vmul.f32 %v7032_v0, %v3448_v5  ;;  %v3506_v31 = vmul.f32 %v7032_v0, %v3449_v38 }
 0x731   :  { %v4696_v57 = vpop.eup %4695  ;;  %v3684_v50 = vunpack.c.h.bf16 %v3645_v30  ;;  %v3683_v43 = vunpack.c.l.bf16 %v3645_v30  ;;  %v3610_v8 = vmax.f32 %v3560_v35, 0.0  ;;  %v3611_v21 = vmax.f32 %v3561_v47, 0.0 }
 0x732   :  { %v4698_v14 = vpop.eup %4697  ;;  %v3839_v17 = vsel %vm2816_vm2, %v3739_v16, 0.0  ;;  %v3836_v60 = vsel %vm2816_vm2, %v3738_v40, 0.0  ;;  %v3562_v33 = vadd.f32 %v7047_v49, %v3505_v4  ;;  %v3563_v54 = vadd.f32 %v7047_v49, %v3506_v31 }
 0x733   :  { %3840 = vadd.xlane.f32.xlu1 %v3839_v17  ;;  %3837 = vadd.xlane.f32.xlu0 %v3836_v60  ;;  %v3741_v24 = vmul.f32 %v7085_v9, %v3684_v50  ;;  %v3740_v29 = vmul.f32 %v7085_v9, %v3683_v43  ;;  %v3646_v51 = vpack.c.bf16 %v3611_v21, %v3610_v8 }
 0x734   :  { %v3612_v18 = vmax.f32 %v3562_v33, 0.0  ;;  %v3613_v28 = vmax.f32 %v3563_v54, 0.0  ;;  %v3450_v20 = vmul.f32 %v7201_v63, %v6949_v3  ;;  %v3451_v48 = vmul.f32 %v4688_v13, %v6957_v58 }
 0x735   :  { %v4700_v52 = vpop.eup %4699  ;;  %v3845_v61 = vsel %vm2816_vm2, %v3741_v24, 0.0  ;;  %v3842_v25 = vsel %vm2816_vm2, %v3740_v29, 0.0  ;;  %v3686_v62 = vunpack.c.h.bf16 %v3646_v51  ;;  %v3685_v59 = vunpack.c.l.bf16 %v3646_v51 }
 0x736   :  { %v3647_v11 = vpack.c.bf16 %v3613_v28, %v3612_v18  ;;  %v3507_v41 = vmul.f32 %v7032_v0, %v3450_v20  ;;  %v3508_v5 = vmul.f32 %v7032_v0, %v3451_v48  ;;  %v3452_v10 = vmul.f32 %v4690_v42, %v6960_v7 }
 0x737   :  { %3846 = vadd.xlane.f32.xlu1 %v3845_v61  ;;  %3843 = vadd.xlane.f32.xlu0 %v3842_v25  ;;  %v3743_v3 = vmul.f32 %v7085_v9, %v3686_v62  ;;  %v3742_v58 = vmul.f32 %v7085_v9, %v3685_v59  ;;  %v3453_v63 = vmul.f32 %v4692_v26, %v6969_v6 }
 0x738   :  { %v3688_v13 = vunpack.c.h.bf16 %v3647_v11  ;;  %v3687_v46 = vunpack.c.l.bf16 %v3647_v11  ;;  %v3564_v37 = vadd.f32 %v7047_v49, %v3507_v41  ;;  %v3565_v38 = vadd.f32 %v7047_v49, %v3508_v5 }
 0x739   :  { %v3851_v19 = vsel %vm2816_vm2, %v3743_v3, 0.0  ;;  %v3848_v45 = vsel %vm2816_vm2, %v3742_v58, 0.0  ;;  %v3509_v7 = vmul.f32 %v7032_v0, %v3452_v10  ;;  %v3510_v42 = vmul.f32 %v7032_v0, %v3453_v63 }
 0x73a   :  { %v3745_v27 = vmul.f32 %v7085_v9, %v3688_v13  ;;  %v3744_v15 = vmul.f32 %v7085_v9, %v3687_v46  ;;  %v3614_v30 = vmax.f32 %v3564_v37, 0.0  ;;  %v3615_v6 = vmax.f32 %v3565_v38, 0.0 }
 0x73b   :  { %3852 = vadd.xlane.f32.xlu1 %v3851_v19  ;;  %3849 = vadd.xlane.f32.xlu0 %v3848_v45  ;;  %v3566_v26 = vadd.f32 %v7047_v49, %v3509_v7  ;;  %v3567_v35 = vadd.f32 %v7047_v49, %v3510_v42  ;;  %v3454_v47 = vmul.f32 %v7225_v55, %v6977_v39 }
 0x73c   :  { %v3857_v16 = vsel %vm2816_vm2, %v3745_v27, 0.0  ;;  %v3854_v40 = vsel %vm2816_vm2, %v3744_v15, 0.0  ;;  %v3648_v4 = vpack.c.bf16 %v3615_v6, %v3614_v30  ;;  %v3455_v31 = vmul.f32 %v4696_v57, %v6985_v2 }
 0x73d   :  { %v3616_v50 = vmax.f32 %v3566_v26, 0.0  ;;  %v3617_v43 = vmax.f32 %v3567_v35, 0.0  ;;  %v3511_v8 = vmul.f32 %v7032_v0, %v3454_v47  ;;  %v3456_v21 = vmul.f32 %v4698_v14, %v6988_v36  ;;  %v7279_v36 = vld [vmem:[%s7624_s11] ss:$0 sm:$0xff] }
 0x73e   :  { %v3690_v17 = vunpack.c.h.bf16 %v3648_v4  ;;  %v3689_v60 = vunpack.c.l.bf16 %v3648_v4  ;;  %v3512_v33 = vmul.f32 %v7032_v0, %v3455_v31  ;;  %v3457_v54 = vmul.f32 %v4700_v52, %v6994_v32 }
 0x73f   :  { %3858 = vadd.xlane.f32.xlu1 %v3857_v16  ;;  %3855 = vadd.xlane.f32.xlu0 %v3854_v40  ;;  %v3649_v39 = vpack.c.bf16 %v3617_v43, %v3616_v50  ;;  %v3568_v55 = vadd.f32 %v7047_v49, %v3511_v8  ;;  %v3513_v24 = vmul.f32 %v7032_v0, %v3456_v21 }
 0x740   :  { %v3747_v2 = vmul.f32 %v7085_v9, %v3690_v17  ;;  %v3746_v57 = vmul.f32 %v7085_v9, %v3689_v60  ;;  %v3569_v29 = vadd.f32 %v7047_v49, %v3512_v33  ;;  %v3514_v32 = vmul.f32 %v7279_v36, %v3457_v54 }
 0x741   :  { %v3692_v14 = vunpack.c.h.bf16 %v3649_v39  ;;  %v3691_v51 = vunpack.c.l.bf16 %v3649_v39  ;;  %v3618_v18 = vmax.f32 %v3568_v55, 0.0  ;;  %v3570_v28 = vadd.f32 %v7047_v49, %v3513_v24 }
 0x742   :  { %v3863_v0 = vsel %vm2816_vm2, %v3747_v2, 0.0  ;;  %v3860_v20 = vsel %vm2816_vm2, %v3746_v57, 0.0  ;;  %v3619_v48 = vmax.f32 %v3569_v29, 0.0  ;;  %v3571_v52 = vadd.f32 %v7047_v49, %v3514_v32  ;;  %v7305_v29 = vld [vmem:[%s7625_s12] ss:$0 sm:$0xff] }
 0x743   :  { %3864 = vadd.xlane.f32.xlu1 %v3863_v0  ;;  %3861 = vadd.xlane.f32.xlu0 %v3860_v20  ;;  %v3749_v61 = vmul.f32 %v7085_v9, %v3692_v14  ;;  %v3748_v25 = vmul.f32 %v7085_v9, %v3691_v51  ;;  %v3620_v59 = vmax.f32 %v3570_v28, 0.0 }
 0x744   :  { %v3650_v62 = vpack.c.bf16 %v3619_v48, %v3618_v18  ;;  %v3621_v11 = vmax.f32 %v3571_v52, 0.0 }
 0x745   :  { %v3869_v41 = vsel %vm2816_vm2, %v3749_v61, 0.0  ;;  %v3866_v5 = vsel %vm2816_vm2, %v3748_v25, 0.0 }
 0x746   :  { %v3694_v10 = vunpack.c.h.bf16 %v3650_v62  ;;  %v3693_v3 = vunpack.c.l.bf16 %v3650_v62  ;;  %v3651_v58 = vpack.c.bf16 %v3621_v11, %v3620_v59 }
 0x747   :  { %3870 = vadd.xlane.f32.xlu1 %v3869_v41  ;;  %3867 = vadd.xlane.f32.xlu0 %v3866_v5 }
 0x748   :  { %v3751_v49 = vmul.f32 %v7085_v9, %v3694_v10  ;;  %v3750_v63 = vmul.f32 %v7085_v9, %v3693_v3  ;;  %v3696_v13 = vunpack.c.h.bf16 %v3651_v58  ;;  %v3695_v46 = vunpack.c.l.bf16 %v3651_v58 }
 0x74a   :  { %v3875_v37 = vsel %vm2816_vm2, %v3751_v49, 0.0  ;;  %v3872_v38 = vsel %vm2816_vm2, %v3750_v63, 0.0  ;;  %v3753_v19 = vmul.f32 %v7085_v9, %v3696_v13  ;;  %v3752_v45 = vmul.f32 %v7085_v9, %v3695_v46  ;;  %v7322_v63 = vld [vmem:[%s7626_s13] ss:$0 sm:$0xff] }
 0x74b   :  { %3876 = vadd.xlane.f32.xlu1 %v3875_v37  ;;  %3873 = vadd.xlane.f32.xlu0 %v3872_v38  ;;  %v7317_v49 = vstv %s7627_s14 }
 0x74c   :  { %v3881_v7 = vsel %vm2816_vm2, %v3753_v19, 0.0  ;;  %v3878_v42 = vsel %vm2816_vm2, %v3752_v45, 0.0 }
 0x74f   :  { %3882 = vadd.xlane.f32.xlu1 %v3881_v7  ;;  %3879 = vadd.xlane.f32.xlu0 %v3878_v42 }
 0x753   :  { %v3240_v27 = vpop.xlane.xlu0 %3239 }
 0x754   :  { %v3308_v15 = vmul.f32 0.03125, %v3240_v27 }
 0x756   :  { %v3358_v30 = vadd.f32 1e-05, %v3308_v15 }
 0x757   :  { %v3243_v6 = vpop.xlane.xlu1 %3242 }
 0x758   :  { %4701 = vrsqrt.f32 %v3358_v30  ;;  %v3309_v26 = vmul.f32 0.03125, %v3243_v6 }
 0x75a   :  { %v3359_v35 = vadd.f32 1e-05, %v3309_v26 }
 0x75c   :  { %4703 = vrsqrt.f32 %v3359_v35  ;;  %v3246_v47 = vpop.xlane.xlu0 %3245 }
 0x75d   :  { %v3310_v16 = vmul.f32 0.03125, %v3246_v47 }
 0x75f   :  { %v3360_v40 = vadd.f32 1e-05, %v3310_v16 }
 0x760   :  { %v3249_v9 = vpop.xlane.xlu1 %3248 }
 0x761   :  { %4705 = vrsqrt.f32 %v3360_v40  ;;  %v3311_v4 = vmul.f32 0.03125, %v3249_v9 }
 0x763   :  { %v3361_v31 = vadd.f32 1e-05, %v3311_v4 }
 0x764   :  { %v3252_v50 = vpop.xlane.xlu0 %3251 }
 0x765   :  { %v4702_v43 = vpop.eup %4701  ;;  %4707 = vrsqrt.f32 %v3361_v31  ;;  %v3312_v8 = vmul.f32 0.03125, %v3252_v50 }
 0x766   :  { %v3458_v21 = vmul.f32 %v4702_v43, %v7007_v12 }
 0x767   :  { %v3362_v17 = vadd.f32 1e-05, %v3312_v8 }
 0x768   :  { %v3255_v60 = vpop.xlane.xlu1 %3254  ;;  %v3515_v33 = vmul.f32 %v7279_v36, %v3458_v21 }
 0x769   :  { %v4704_v54 = vpop.eup %4703  ;;  %4709 = vrsqrt.f32 %v3362_v17  ;;  %v3313_v39 = vmul.f32 0.03125, %v3255_v60 }
 0x76a   :  { %v3459_v55 = vmul.f32 %v4704_v54, %v7012_v22  ;;  %v3572_v12 = vadd.f32 %v7305_v29, %v3515_v33 }
 0x76b   :  { %v3363_v24 = vadd.f32 1e-05, %v3313_v39 }
 0x76c   :  { %v3258_v2 = vpop.xlane.xlu0 %3257  ;;  %v3516_v57 = vmul.f32 %v7279_v36, %v3459_v55  ;;  %v3622_v0 = vmax.f32 %v3572_v12, 0.0 }
 0x76d   :  { %4711 = vrsqrt.f32 %v3363_v24  ;;  %v3314_v32 = vmul.f32 0.03125, %v3258_v2 }
 0x76e   :  { %v4706_v14 = vpop.eup %4705  ;;  %v3573_v51 = vadd.f32 %v7305_v29, %v3516_v57 }
 0x76f   :  { %v3364_v18 = vadd.f32 1e-05, %v3314_v32  ;;  %v3460_v28 = vmul.f32 %v4706_v14, %v7019_v56 }
 0x770   :  { %v3261_v22 = vpop.xlane.xlu1 %3260  ;;  %v3623_v20 = vmax.f32 %v3573_v51, 0.0 }
 0x771   :  { %4713 = vrsqrt.f32 %v3364_v18  ;;  %v3315_v48 = vmul.f32 0.03125, %v3261_v22  ;;  %v3517_v52 = vmul.f32 %v7279_v36, %v3460_v28  ;;  %v7678_v18 = vld [vmem:[#allocation6_spill] sm:$0xff] }
 0x772   :  { %v4708_v61 = vpop.eup %4707  ;;  %v3652_v25 = vpack.c.bf16 %v3623_v20, %v3622_v0 }
 0x773   :  { %v3365_v62 = vadd.f32 1e-05, %v3315_v48  ;;  %v3461_v59 = vmul.f32 %v4708_v61, %v7026_v23  ;;  %v3574_v10 = vadd.f32 %v7305_v29, %v3517_v52 }
 0x774   :  { %v3264_v11 = vpop.xlane.xlu0 %3263  ;;  %v3698_v41 = vunpack.c.h.bf16 %v3652_v25  ;;  %v3697_v5 = vunpack.c.l.bf16 %v3652_v25 }
 0x775   :  { %4715 = vrsqrt.f32 %v3365_v62  ;;  %v3316_v3 = vmul.f32 0.03125, %v3264_v11  ;;  %v3518_v56 = vmul.f32 %v7279_v36, %v3461_v59  ;;  %v3624_v27 = vmax.f32 %v3574_v10, 0.0 }
 0x776   :  { %v4710_v58 = vpop.eup %4709  ;;  %v3755_v23 = vmul.f32 %v7322_v63, %v3698_v41  ;;  %v3754_v13 = vmul.f32 %v7322_v63, %v3697_v5  ;;  %v7679_v5 = vld [vmem:[#allocation7_spill] sm:$0xff] }
 0x777   :  { %v3366_v46 = vadd.f32 1e-05, %v3316_v3  ;;  %v3575_v37 = vadd.f32 %v7305_v29, %v3518_v56  ;;  %v3462_v38 = vmul.f32 %v4710_v58, %v7041_v44 }
 0x778   :  { %v3267_v19 = vpop.xlane.xlu1 %3266  ;;  %v3766_v45 = vpop.xlane.xlu0 %3765  ;;  %v3887_v7 = vsel %vm2816_vm2, %v3755_v23, 0.0  ;;  %v3884_v42 = vsel %vm2816_vm2, %v3754_v13, 0.0 }
 0x779   :  { %4717 = vrsqrt.f32 %v3366_v46  ;;  %v3317_v15 = vmul.f32 0.03125, %v3267_v19  ;;  %v3916_v30 = vadd.f32 %v7317_v49, %v3766_v45  ;;  %3888 = vadd.xlane.f32.xlu1 %v3887_v7  ;;  %3885 = vadd.xlane.f32.xlu0 %v3884_v42  ;;  %v3625_v6 = vmax.f32 %v3575_v37, 0.0 }
 0x77a   :  { %v4712_v26 = vpop.eup %4711  ;;  %v3519_v35 = vmul.f32 %v7279_v36, %v3462_v38 }
 0x77b   :  { %v3367_v47 = vadd.f32 1e-05, %v3317_v15  ;;  %3967 = vst.msk [vmem:[%s7628_s15] sm:$0xff] %vm3966_vm3, %v3916_v30  ;;  %v3653_v44 = vpack.c.bf16 %v3625_v6, %v3624_v27  ;;  %v3463_v16 = vmul.f32 %v4712_v26, %v7056_v53 }
 0x77c   :  { %v3769_v40 = vpop.xlane.xlu1 %3768  ;;  %v3772_v9 = vpop.xlane.xlu0 %3771  ;;  %v3576_v17 = vadd.f32 %v7305_v29, %v3519_v35 }
 0x77d   :  { %4719 = vrsqrt.f32 %v3367_v47  ;;  %v3917_v4 = vadd.f32 %v7317_v49, %v3769_v40  ;;  %v3918_v31 = vadd.f32 %v7317_v49, %v3772_v9  ;;  %v3700_v50 = vunpack.c.h.bf16 %v3653_v44 }
 0x77e   :  { %v4714_v43 = vpop.eup %4713  ;;  %v3699_v8 = vunpack.c.l.bf16 %v3653_v44  ;;  %v3520_v21 = vmul.f32 %v7279_v36, %v3463_v16  ;;  %v3626_v51 = vmax.f32 %v3576_v17, 0.0 }
 0x77f   :  { %3968 = vst.msk [vmem:[%s7628_s15 + $0x8] sm:$0xff] %vm3966_vm3, %v3917_v4  ;;  %3969 = vst.msk [vmem:[%s7628_s15 + $0x10] sm:$0xff] %vm3966_vm3, %v3918_v31  ;;  %v3757_v53 = vmul.f32 %v7322_v63, %v3700_v50  ;;  %v3464_v60 = vmul.f32 %v4714_v43, %v7066_v34 }
 0x780   :  { %v3775_v33 = vpop.xlane.xlu1 %3774  ;;  %v3778_v54 = vpop.xlane.xlu0 %3777  ;;  %v3756_v39 = vmul.f32 %v7322_v63, %v3699_v8  ;;  %v3577_v55 = vadd.f32 %v7305_v29, %v3520_v21 }
 0x781   :  { %v3919_v24 = vadd.f32 %v7317_v49, %v3775_v33  ;;  %v3920_v2 = vadd.f32 %v7317_v49, %v3778_v54  ;;  %v3893_v57 = vsel %vm2816_vm2, %v3757_v53, 0.0  ;;  %v3521_v12 = vmul.f32 %v7279_v36, %v3464_v60 }
 0x782   :  { %v4716_v32 = vpop.eup %4715  ;;  %3894 = vadd.xlane.f32.xlu1 %v3893_v57  ;;  %v3890_v14 = vsel %vm2816_vm2, %v3756_v39, 0.0  ;;  %v3627_v34 = vmax.f32 %v3577_v55, 0.0 }
 0x783   :  { %3970 = vst.msk [vmem:[%s7628_s15 + $0x18] sm:$0xff] %vm3966_vm3, %v3919_v24  ;;  %3971 = vst.msk [vmem:[%s7628_s15 + $0x20] sm:$0xff] %vm3966_vm3, %v3920_v2  ;;  %3891 = vadd.xlane.f32.xlu0 %v3890_v14  ;;  %v3465_v28 = vmul.f32 %v4716_v32, %v7678_v18  ;;  %v3578_v48 = vadd.f32 %v7305_v29, %v3521_v12 }
 0x784   :  { %v3781_v22 = vpop.xlane.xlu1 %3780  ;;  %v3784_v0 = vpop.xlane.xlu0 %3783  ;;  %v3654_v20 = vpack.c.bf16 %v3627_v34, %v3626_v51 }
 0x785   :  { %v3921_v52 = vadd.f32 %v7317_v49, %v3781_v22  ;;  %v3922_v61 = vadd.f32 %v7317_v49, %v3784_v0  ;;  %v3522_v25 = vmul.f32 %v7279_v36, %v3465_v28  ;;  %v3628_v13 = vmax.f32 %v3578_v48, 0.0 }
 0x786   :  { %v4718_v62 = vpop.eup %4717  ;;  %v3702_v59 = vunpack.c.h.bf16 %v3654_v20  ;;  %v3701_v11 = vunpack.c.l.bf16 %v3654_v20 }
 0x787   :  { %3972 = vst.msk [vmem:[%s7628_s15 + $0x28] sm:$0xff] %vm3966_vm3, %v3921_v52  ;;  %3973 = vst.msk [vmem:[%s7628_s15 + $0x30] sm:$0xff] %vm3966_vm3, %v3922_v61  ;;  %v3579_v41 = vadd.f32 %v7305_v29, %v3522_v25  ;;  %v3466_v10 = vmul.f32 %v4718_v62, %v7679_v5 }
 0x788   :  { %v3787_v3 = vpop.xlane.xlu1 %3786  ;;  %v3790_v56 = vpop.xlane.xlu0 %3789  ;;  %v3759_v58 = vmul.f32 %v7322_v63, %v3702_v59  ;;  %v3758_v23 = vmul.f32 %v7322_v63, %v3701_v11 }
 0x789   :  { %v3923_v46 = vadd.f32 %v7317_v49, %v3787_v3  ;;  %v3924_v37 = vadd.f32 %v7317_v49, %v3790_v56  ;;  %v3629_v38 = vmax.f32 %v3579_v41, 0.0  ;;  %v3523_v19 = vmul.f32 %v7279_v36, %v3466_v10 }
 0x78a   :  { %v4720_v45 = vpop.eup %4719  ;;  %v3899_v7 = vsel %vm2816_vm2, %v3759_v58, 0.0  ;;  %v3896_v42 = vsel %vm2816_vm2, %v3758_v23, 0.0 }
 0x78b   :  { %3974 = vst.msk [vmem:[%s7628_s15 + $0x38] sm:$0xff] %vm3966_vm3, %v3923_v46  ;;  %3975 = vst.msk [vmem:[%s7628_s15 + $0x40] sm:$0xff] %vm3966_vm3, %v3924_v37  ;;  %3900 = vadd.xlane.f32.xlu1 %v3899_v7  ;;  %3897 = vadd.xlane.f32.xlu0 %v3896_v42  ;;  %v3655_v27 = vpack.c.bf16 %v3629_v38, %v3628_v13  ;;  %v3467_v15 = vmul.f32 %v4720_v45, %v7100_v1 }
 0x78c   :  { %v3793_v30 = vpop.xlane.xlu1 %3792  ;;  %v3580_v6 = vadd.f32 %v7305_v29, %v3523_v19 }
 0x78d   :  { %v3925_v26 = vadd.f32 %v7317_v49, %v3793_v30  ;;  %v3704_v35 = vunpack.c.h.bf16 %v3655_v27  ;;  %v3703_v47 = vunpack.c.l.bf16 %v3655_v27  ;;  %v3524_v44 = vmul.f32 %v7279_v36, %v3467_v15 }
 0x78e   :  { %v3630_v31 = vmax.f32 %v3580_v6, 0.0 }
 0x78f   :  { %3976 = vst.msk [vmem:[%s7628_s15 + $0x48] sm:$0xff] %vm3966_vm3, %v3925_v26  ;;  %v3761_v16 = vmul.f32 %v7322_v63, %v3704_v35  ;;  %v3760_v40 = vmul.f32 %v7322_v63, %v3703_v47  ;;  %v3581_v1 = vadd.f32 %v7305_v29, %v3524_v44 }
 0x791   :  { %v3905_v9 = vsel %vm2816_vm2, %v3761_v16, 0.0  ;;  %v3902_v4 = vsel %vm2816_vm2, %v3760_v40, 0.0  ;;  %v3631_v50 = vmax.f32 %v3581_v1, 0.0 }
 0x792   :  { %3906 = vadd.xlane.f32.xlu1 %v3905_v9  ;;  %3903 = vadd.xlane.f32.xlu0 %v3902_v4 }
 0x793   :  { %v3656_v36 = vpack.c.bf16 %v3631_v50, %v3630_v31 }
 0x795   :  { %v3706_v43 = vunpack.c.h.bf16 %v3656_v36  ;;  %v3705_v8 = vunpack.c.l.bf16 %v3656_v36 }
 0x796   :  { %v3799_v21 = vpop.xlane.xlu1 %3798 }
 0x797   :  { %v3927_v17 = vadd.f32 %v7317_v49, %v3799_v21  ;;  %v3796_v53 = vpop.xlane.xlu0 %3795  ;;  %v3763_v60 = vmul.f32 %v7322_v63, %v3706_v43  ;;  %v3762_v33 = vmul.f32 %v7322_v63, %v3705_v8 }
 0x798   :  { %v3926_v29 = vadd.f32 %v7317_v49, %v3796_v53 }
 0x799   :  { %3978 = vst.msk [vmem:[%s7628_s15 + $0x58] sm:$0xff] %vm3966_vm3, %v3927_v17  ;;  %v3911_v54 = vsel %vm2816_vm2, %v3763_v60, 0.0  ;;  %v3908_v39 = vsel %vm2816_vm2, %v3762_v33, 0.0 }
 0x79a   :  { %3977 = vst.msk [vmem:[%s7628_s15 + $0x50] sm:$0xff] %vm3966_vm3, %v3926_v29  ;;  %3912 = vadd.xlane.f32.xlu1 %v3911_v54  ;;  %3909 = vadd.xlane.f32.xlu0 %v3908_v39 }
 0x79b   :  { %v3805_v55 = vpop.xlane.xlu1 %3804  ;;  %v3802_v63 = vpop.xlane.xlu0 %3801 }
 0x79c   :  { %v3929_v24 = vadd.f32 %v7317_v49, %v3805_v55  ;;  %v3928_v2 = vadd.f32 %v7317_v49, %v3802_v63 }
 0x79e   :  { %3980 = vst.msk [vmem:[%s7628_s15 + $0x68] sm:$0xff] %vm3966_vm3, %v3929_v24  ;;  %3979 = vst.msk [vmem:[%s7628_s15 + $0x60] sm:$0xff] %vm3966_vm3, %v3928_v2 }
 0x7a0   :  { %v3811_v57 = vpop.xlane.xlu1 %3810 }
 0x7a1   :  { %v3931_v12 = vadd.f32 %v7317_v49, %v3811_v57  ;;  %v3808_v32 = vpop.xlane.xlu0 %3807 }
 0x7a2   :  { %v3930_v14 = vadd.f32 %v7317_v49, %v3808_v32 }
 0x7a3   :  { %3982 = vst.msk [vmem:[%s7628_s15 + $0x78] sm:$0xff] %vm3966_vm3, %v3931_v12 }
 0x7a4   :  { %3981 = vst.msk [vmem:[%s7628_s15 + $0x70] sm:$0xff] %vm3966_vm3, %v3930_v14 }
 0x7a7   :  { %v3817_v51 = vpop.xlane.xlu1 %3816  ;;  %v3814_v34 = vpop.xlane.xlu0 %3813 }
 0x7a8   :  { %v3933_v18 = vadd.f32 %v7317_v49, %v3817_v51  ;;  %v3932_v28 = vadd.f32 %v7317_v49, %v3814_v34 }
 0x7aa   :  { %3984 = vst.msk [vmem:[%s7628_s15 + $0x88] sm:$0xff] %vm3966_vm3, %v3933_v18  ;;  %3983 = vst.msk [vmem:[%s7628_s15 + $0x80] sm:$0xff] %vm3966_vm3, %v3932_v28 }
 0x7ab   :  { %v3823_v22 = vpop.xlane.xlu1 %3822 }
 0x7ac   :  { %v3935_v0 = vadd.f32 %v7317_v49, %v3823_v22  ;;  %v3820_v20 = vpop.xlane.xlu0 %3819 }
 0x7ad   :  { %v3934_v48 = vadd.f32 %v7317_v49, %v3820_v20 }
 0x7ae   :  { %3986 = vst.msk [vmem:[%s7628_s15 + $0x98] sm:$0xff] %vm3966_vm3, %v3935_v0 }
 0x7af   :  { %3985 = vst.msk [vmem:[%s7628_s15 + $0x90] sm:$0xff] %vm3966_vm3, %v3934_v48 }
 0x7b3   :  { %v3829_v52 = vpop.xlane.xlu1 %3828  ;;  %v3826_v61 = vpop.xlane.xlu0 %3825 }
 0x7b4   :  { %v3937_v25 = vadd.f32 %v7317_v49, %v3829_v52  ;;  %v3936_v62 = vadd.f32 %v7317_v49, %v3826_v61 }
 0x7b6   :  { %3988 = vst.msk [vmem:[%s7628_s15 + $0xa8] sm:$0xff] %vm3966_vm3, %v3937_v25  ;;  %3987 = vst.msk [vmem:[%s7628_s15 + $0xa0] sm:$0xff] %vm3966_vm3, %v3936_v62 }
 0x7b8   :  { %v3835_v59 = vpop.xlane.xlu1 %3834  ;;  %v3832_v11 = vpop.xlane.xlu0 %3831 }
 0x7b9   :  { %v3939_v41 = vadd.f32 %v7317_v49, %v3835_v59  ;;  %v3938_v5 = vadd.f32 %v7317_v49, %v3832_v11 }
 0x7bb   :  { %3990 = vst.msk [vmem:[%s7628_s15 + $0xb8] sm:$0xff] %vm3966_vm3, %v3939_v41  ;;  %3989 = vst.msk [vmem:[%s7628_s15 + $0xb0] sm:$0xff] %vm3966_vm3, %v3938_v5 }
 0x7bc   :  { %v3841_v10 = vpop.xlane.xlu1 %3840  ;;  %v3838_v3 = vpop.xlane.xlu0 %3837 }
 0x7bd   :  { %v3941_v56 = vadd.f32 %v7317_v49, %v3841_v10  ;;  %v3940_v58 = vadd.f32 %v7317_v49, %v3838_v3 }
 0x7bf   :  { %3992 = vst.msk [vmem:[%s7628_s15 + $0xc8] sm:$0xff] %vm3966_vm3, %v3941_v56  ;;  %3991 = vst.msk [vmem:[%s7628_s15 + $0xc0] sm:$0xff] %vm3966_vm3, %v3940_v58 }
 0x7c0   :  { %v3847_v23 = vpop.xlane.xlu1 %3846  ;;  %v3844_v13 = vpop.xlane.xlu0 %3843 }
 0x7c1   :  { %v3943_v46 = vadd.f32 %v7317_v49, %v3847_v23  ;;  %v3942_v37 = vadd.f32 %v7317_v49, %v3844_v13 }
 0x7c3   :  { %3994 = vst.msk [vmem:[%s7628_s15 + $0xd8] sm:$0xff] %vm3966_vm3, %v3943_v46  ;;  %3993 = vst.msk [vmem:[%s7628_s15 + $0xd0] sm:$0xff] %vm3966_vm3, %v3942_v37 }
 0x7c4   :  { %v3853_v38 = vpop.xlane.xlu1 %3852  ;;  %v3850_v19 = vpop.xlane.xlu0 %3849 }
 0x7c5   :  { %v3945_v45 = vadd.f32 %v7317_v49, %v3853_v38  ;;  %v3944_v7 = vadd.f32 %v7317_v49, %v3850_v19 }
 0x7c7   :  { %3996 = vst.msk [vmem:[%s7628_s15 + $0xe8] sm:$0xff] %vm3966_vm3, %v3945_v45  ;;  %3995 = vst.msk [vmem:[%s7628_s15 + $0xe0] sm:$0xff] %vm3966_vm3, %v3944_v7 }
 0x7c8   :  { %v3859_v42 = vpop.xlane.xlu1 %3858  ;;  %v3856_v27 = vpop.xlane.xlu0 %3855 }
 0x7c9   :  { %v3947_v15 = vadd.f32 %v7317_v49, %v3859_v42  ;;  %v3946_v30 = vadd.f32 %v7317_v49, %v3856_v27 }
 0x7cb   :  { %3998 = vst.msk [vmem:[%s7628_s15 + $0xf8] sm:$0xff] %vm3966_vm3, %v3947_v15  ;;  %3997 = vst.msk [vmem:[%s7628_s15 + $0xf0] sm:$0xff] %vm3966_vm3, %v3946_v30 }
 0x7cc   :  { %v3865_v6 = vpop.xlane.xlu1 %3864  ;;  %v3862_v26 = vpop.xlane.xlu0 %3861 }
 0x7cd   :  { %v3949_v35 = vadd.f32 %v7317_v49, %v3865_v6  ;;  %v3948_v47 = vadd.f32 %v7317_v49, %v3862_v26 }
 0x7cf   :  { %4000 = vst.msk [vmem:[%s7628_s15 + $0x108] sm:$0xff] %vm3966_vm3, %v3949_v35  ;;  %3999 = vst.msk [vmem:[%s7628_s15 + $0x100] sm:$0xff] %vm3966_vm3, %v3948_v47 }
 0x7d0   :  { %v3871_v44 = vpop.xlane.xlu1 %3870  ;;  %v3868_v16 = vpop.xlane.xlu0 %3867 }
 0x7d1   :  { %v3951_v40 = vadd.f32 %v7317_v49, %v3871_v44  ;;  %v3950_v1 = vadd.f32 %v7317_v49, %v3868_v16 }
 0x7d3   :  { %4002 = vst.msk [vmem:[%s7628_s15 + $0x118] sm:$0xff] %vm3966_vm3, %v3951_v40  ;;  %4001 = vst.msk [vmem:[%s7628_s15 + $0x110] sm:$0xff] %vm3966_vm3, %v3950_v1 }
 0x7d4   :  { %v3877_v9 = vpop.xlane.xlu1 %3876  ;;  %v3874_v4 = vpop.xlane.xlu0 %3873 }
 0x7d5   :  { %v3953_v31 = vadd.f32 %v7317_v49, %v3877_v9  ;;  %v3952_v50 = vadd.f32 %v7317_v49, %v3874_v4 }
 0x7d7   :  { %4004 = vst.msk [vmem:[%s7628_s15 + $0x128] sm:$0xff] %vm3966_vm3, %v3953_v31  ;;  %4003 = vst.msk [vmem:[%s7628_s15 + $0x120] sm:$0xff] %vm3966_vm3, %v3952_v50 }
 0x7d8   :  { %v3883_v36 = vpop.xlane.xlu1 %3882  ;;  %v3880_v43 = vpop.xlane.xlu0 %3879 }
 0x7d9   :  { %v3955_v8 = vadd.f32 %v7317_v49, %v3883_v36  ;;  %v3954_v21 = vadd.f32 %v7317_v49, %v3880_v43 }
 0x7db   :  { %4006 = vst.msk [vmem:[%s7628_s15 + $0x138] sm:$0xff] %vm3966_vm3, %v3955_v8  ;;  %4005 = vst.msk [vmem:[%s7628_s15 + $0x130] sm:$0xff] %vm3966_vm3, %v3954_v21 }
 0x802   :  { %v3889_v17 = vpop.xlane.xlu1 %3888  ;;  %v3886_v53 = vpop.xlane.xlu0 %3885 }
 0x803   :  { %v3957_v60 = vadd.f32 %v7317_v49, %v3889_v17  ;;  %v3956_v33 = vadd.f32 %v7317_v49, %v3886_v53 }
 0x805   :  { %4008 = vst.msk [vmem:[%s7628_s15 + $0x148] sm:$0xff] %vm3966_vm3, %v3957_v60  ;;  %4007 = vst.msk [vmem:[%s7628_s15 + $0x140] sm:$0xff] %vm3966_vm3, %v3956_v33 }
 0x80b   :  { %v3895_v29 = vpop.xlane.xlu1 %3894 }
 0x80c   :  { %v3959_v54 = vadd.f32 %v7317_v49, %v3895_v29  ;;  %v3892_v39 = vpop.xlane.xlu0 %3891 }
 0x80d   :  { %v3958_v55 = vadd.f32 %v7317_v49, %v3892_v39 }
 0x80e   :  { %4010 = vst.msk [vmem:[%s7628_s15 + $0x158] sm:$0xff] %vm3966_vm3, %v3959_v54 }
 0x80f   :  { %4009 = vst.msk [vmem:[%s7628_s15 + $0x150] sm:$0xff] %vm3966_vm3, %v3958_v55 }
 0x814   :  { %v3901_v63 = vpop.xlane.xlu1 %3900  ;;  %v3898_v24 = vpop.xlane.xlu0 %3897 }
 0x815   :  { %v3961_v2 = vadd.f32 %v7317_v49, %v3901_v63  ;;  %v3960_v57 = vadd.f32 %v7317_v49, %v3898_v24 }
 0x817   :  { %4012 = vst.msk [vmem:[%s7628_s15 + $0x168] sm:$0xff] %vm3966_vm3, %v3961_v2  ;;  %4011 = vst.msk [vmem:[%s7628_s15 + $0x160] sm:$0xff] %vm3966_vm3, %v3960_v57 }
 0x81b   :  { %v3907_v12 = vpop.xlane.xlu1 %3906  ;;  %v3904_v32 = vpop.xlane.xlu0 %3903 }
 0x81c   :  { %v3963_v14 = vadd.f32 %v7317_v49, %v3907_v12  ;;  %v3962_v51 = vadd.f32 %v7317_v49, %v3904_v32 }
 0x81e   :  { %4014 = vst.msk [vmem:[%s7628_s15 + $0x178] sm:$0xff] %vm3966_vm3, %v3963_v14  ;;  %4013 = vst.msk [vmem:[%s7628_s15 + $0x170] sm:$0xff] %vm3966_vm3, %v3962_v51 }
 0x823   :  { %v3913_v34 = vpop.xlane.xlu1 %3912  ;;  %v3910_v18 = vpop.xlane.xlu0 %3909 }
 0x824   :  { %v3965_v28 = vadd.f32 %v7317_v49, %v3913_v34  ;;  %v3964_v22 = vadd.f32 %v7317_v49, %v3910_v18 }
 0x826   :  { %4016 = vst.msk [vmem:[%s7628_s15 + $0x188] sm:$0xff] %vm3966_vm3, %v3965_v28  ;;  %4015 = vst.msk [vmem:[%s7628_s15 + $0x180] sm:$0xff] %vm3966_vm3, %v3964_v22 }
 0x827   :  { %4021 = vsyncpa [#allocation4], 1 }

</bundles_post_ra>
